<compile_context>
chip_gen: v7x
topology: tpu7x:2x2x1
jax: 0.10.0
libtpu: 0.0.40
codegen_flags: <defaults>
</compile_context>

<pallas_src>
import functools

import jax
import jax.numpy as jnp
from jax.experimental import pallas as pl
from jax.experimental.pallas import tpu as pltpu


def _round_up(x, m):
    return ((x + m - 1) // m) * m


def _lanes(d):
    return _round_up(d, 128)


# -----------------------------------------------------------------------------
# Kernel
# -----------------------------------------------------------------------------
def reid_kernel(points_ref, boxfeat_ref,
                w1_ref, w2_ref, w3_ref, b3_ref, wg_ref, wo_ref, bo_ref,
                out_ref, *, tb, n, slope):
    """One grid step = TB instances.

    points_ref : (TB*N, C+1) bf16  flattened point features + ones column
    boxfeat_ref: (TB, HE)    f32   precomputed xyxys @ wb + bh
    out_ref    : (TB, 128)   f32   lane-dense embedding slab ([:, :OUT] valid)
    """
    x = points_ref[...]                                               # (TB*N, C+1) bf16

    # Layer 1: b1 folded into w1 via the ones input column.  w1 output is
    # lane-padded to 128 with a chained ones channel at column H1 and zeros
    # above, so h1's padding lanes are exactly zero.
    h = jnp.dot(x, w1_ref[...], preferred_element_type=jnp.float32)   # f32 acc
    h = h.astype(jnp.bfloat16)
    h = jnp.maximum(h, slope * h)                                     # bf16 LeakyReLU

    # Layer 2: b2 folded via the chained ones channel (row H1 of w2 is b2).
    h = jnp.dot(h, w2_ref[...], preferred_element_type=jnp.float32)
    h = h.astype(jnp.bfloat16)
    h = jnp.maximum(h, slope * h)

    # Layer 3: bias added in bf16 (folding it would widen h2 past 128 lanes).
    h = jnp.dot(h, w3_ref[...], preferred_element_type=jnp.float32)
    h = h.astype(jnp.bfloat16) + b3_ref[...]
    h = jnp.maximum(h, slope * h)                                     # (TB*N, H3) bf16

    # PointNet symmetric aggregation: per-instance max over the point axis.
    g = jnp.max(h.reshape(tb, n, h.shape[-1]), axis=1)                # (TB, H3) bf16

    # Fusion: concat([g, box]) @ W == g @ wg + (box @ wb + bh); the box term
    # arrives precomputed as boxfeat_ref (hoisted tiny matmul in the wrapper).
    e = jnp.dot(g, wg_ref[...], preferred_element_type=jnp.float32) + boxfeat_ref[...]
    e = jnp.maximum(e, slope * e)                                     # (TB, HE) f32, tiny

    # Final head: bf16 weights padded to a lane-dense 128-wide slab -> full
    # unmasked vector store; the wrapper slices the first OUT columns.
    out_ref[...] = (jnp.dot(e.astype(jnp.bfloat16), wo_ref[...],
                            preferred_element_type=jnp.float32) + bo_ref[...])


# -----------------------------------------------------------------------------
# One-time parameter preparation (bf16 cast, bias folding, head padding)
# -----------------------------------------------------------------------------
def prepare_params(params, out_pad=128):
    (w1, b1, w2, b2, w3, b3, wg, wb, bh, wo, bo) = params
    c_in, h1 = w1.shape
    h2 = w2.shape[1]
    h3 = w3.shape[1]
    he = wg.shape[1]
    out_d = wo.shape[1]

    # Layer-1 weight: [real w1 | ones channel | zero pad] x [input feats ; b1].
    h1p = max(128, _round_up(h1 + 1, 128))
    w1a = jnp.zeros((c_in + 1, h1p), jnp.float32)
    w1a = w1a.at[:c_in, :h1].set(w1)
    w1a = w1a.at[c_in, :h1].set(b1[0])      # b1 bias row (ones input column)
    w1a = w1a.at[c_in, h1].set(1.0)         # chained ones channel -> folds b2

    # Layer-2 weight absorbs b2 as a bias row at the ones-channel position.
    w2a = jnp.zeros((h1p, h2), jnp.float32)
    w2a = w2a.at[:h1, :].set(w2)
    w2a = w2a.at[h1, :].set(b2[0])

    # Head padded to a lane-dense 128-wide output slab.
    wo_pad = jnp.zeros((he, out_pad), jnp.float32).at[:, :out_d].set(wo)
    bo_pad = jnp.zeros((1, out_pad), jnp.float32).at[:, :out_d].set(bo)

    return {
        "w1": w1a.astype(jnp.bfloat16),
        "w2": w2a.astype(jnp.bfloat16),
        "w3": w3.astype(jnp.bfloat16),
        "b3": b3.astype(jnp.bfloat16),
        "wg": wg.astype(jnp.bfloat16),
        "wb": wb.astype(jnp.float32),
        "bh": bh.astype(jnp.float32),
        "wo": wo_pad.astype(jnp.bfloat16),
        "bo": bo_pad.astype(jnp.float32),
        "dims": {"c_in": c_in, "h1": h1, "h1p": h1p, "h2": h2, "h3": h3,
                 "he": he, "out_d": out_d, "out_pad": out_pad},
    }


def _kernel_vmem_bytes(tb, n, c_aug, h1p, h2, h3, he, out_pad):
    """Rough live-VMEM estimate for one grid step (double-buffered inputs)."""
    m = tb * n
    pts = 2 * m * _lanes(c_aug) * 2                       # bf16 points block x2
    inter = m * (2 * h1p + 2 * h2 + 6 * h3)               # h1/h2 bf16, h3 f32+bf16
    box_out = 2 * tb * (_lanes(he) + out_pad) * 4
    weights = 2 * 2 * (c_aug * h1p + h1p * h2 + h2 * h3 + h3 + h3 * he
                       + he * out_pad)
    return pts + inter + box_out + weights


# -----------------------------------------------------------------------------
# Wrapper
# -----------------------------------------------------------------------------
def reid_forward(points, xyxys, prep, *, tb=None, min_grid_steps=2):
    """points: (B, N, C) f32, xyxys: (B, 4) f32 -> (B, OUT) f32 embeddings."""
    dims = prep["dims"]
    B, N, C = points.shape
    assert C == dims["c_in"], (C, dims["c_in"])
    H1P, H2, H3 = dims["h1p"], dims["h2"], dims["h3"]
    HE, OUT, OUT_PAD = dims["he"], dims["out_d"], dims["out_pad"]

    # ---- per-step block (TB instances) -------------------------------------
    b_pad8 = _round_up(max(B, 1), 8)
    if tb is None:
        # Cap so live intermediates stay well inside every generation's scoped
        # VMEM default (v5e 16 MiB, v7x 32 MiB of 64 MiB physical); within the
        # cap split into >= min_grid_steps blocks so v7x's 2 TensorCores can
        # both take "parallel" steps (v5e/v6e just see one extra cheap step).
        tb = min(32, b_pad8)
        if min_grid_steps > 1 and b_pad8 >= 16:
            tb = min(tb, _round_up(pl.cdiv(b_pad8, min_grid_steps), 8))
    b_pad = _round_up(max(B, 1), tb)

    # ---- input prep ---------------------------------------------------------
    # Pad the instance axis; padded (zero) instances are sliced off at the end
    # and never contaminate valid rows (max-pool is per-instance).  The ones
    # column folds b1/b2 into the layer-1/2 weights.
    pts = jnp.zeros((b_pad, N, C + 1), jnp.float32)
    pts = pts.at[:B, :, :C].set(points.astype(jnp.float32))
    pts = pts.at[:, :, C].set(1.0)
    pts_flat = pts.reshape(b_pad * N, C + 1).astype(jnp.bfloat16)     # (B_pad*N, C+1)

    # Box branch hoisted out of the kernel: tiny (B,4)@(4,HE) XLA matmul.
    box = jnp.zeros((b_pad, 4), jnp.float32).at[:B].set(xyxys.astype(jnp.float32))
    box_feat = box @ prep["wb"] + prep["bh"]                          # (B_pad, HE) f32

    weights = (prep["w1"], prep["w2"], prep["w3"], prep["b3"],
               prep["wg"], prep["wo"], prep["bo"])
    # Constant index_map -> each weight is DMA'd once and stays resident across
    # grid steps.  (pipeline_mode=pl.Buffered(1) could reclaim the redundant
    # second buffer; skipped — the ~0.2 MB it saves is noise at these shapes.)
    weight_specs = [pl.BlockSpec(w.shape, lambda b: (0, 0)) for w in weights]

    in_specs = [
        pl.BlockSpec((tb * N, C + 1), lambda b: (b, 0)),   # flattened points (+ ones)
        pl.BlockSpec((tb, HE), lambda b: (b, 0)),          # precomputed box feature
    ] + weight_specs

    # ---- compiler params ----------------------------------------------------
    cp_kwargs = {"dimension_semantics": ("parallel",)}     # v7x: shard batch over 2 TCs
    vmem_est = _kernel_vmem_bytes(tb, N, C + 1, H1P, H2, H3, HE, OUT_PAD)
    if vmem_est > 14 * 2**20:
        # Only needed for large caller-supplied TB; v5e's 16 MiB scoped default
        # is the binding constraint, keep the cap under v7x's 64 MiB physical.
        cp_kwargs["vmem_limit_bytes"] = int(min(max(2 * vmem_est, 32 * 2**20),
                                                48 * 2**20))
    compiler_params = pltpu.CompilerParams(**cp_kwargs)

    flops = (2 * b_pad * N * ((C + 1) * H1P + H1P * H2 + H2 * H3)
             + 2 * b_pad * (H3 * HE + HE * OUT_PAD))
    bytes_accessed = (pts_flat.size * 2 + box_feat.size * 4
                      + sum(int(w.size) * w.dtype.itemsize for w in weights)
                      + b_pad * OUT_PAD * 4)
    cost = pl.CostEstimate(flops=flops, transcendentals=0,
                           bytes_accessed=bytes_accessed)

    out = pl.pallas_call(
        functools.partial(reid_kernel, tb=tb, n=N, slope=0.01),
        out_shape=jax.ShapeDtypeStruct((b_pad, OUT_PAD), jnp.float32),
        grid_spec=pltpu.PrefetchScalarGridSpec(
            num_scalar_prefetch=0,
            grid=(b_pad // tb,),
            in_specs=in_specs,
            out_specs=pl.BlockSpec((tb, OUT_PAD), lambda b: (b, 0)),
        ),
        compiler_params=compiler_params,
        cost_estimate=cost,
    )(pts_flat, box_feat, *weights)

    return out[:B, :OUT]


# -----------------------------------------------------------------------------
# Pure-JAX f32 reference (mirrors the PyTorch TrackerOffsetEmb inference path)
# -----------------------------------------------------------------------------
def reid_reference(points, xyxys, params, slope=0.01):
    (w1, b1, w2, b2, w3, b3, wg, wb, bh, wo, bo) = params
    lrelu = lambda v: jnp.maximum(v, slope * v)
    h = lrelu(points @ w1 + b1)            # per-point MLP (1x1 Conv1d stack)
    h = lrelu(h @ w2 + b2)
    h = lrelu(h @ w3 + b3)
    g = jnp.max(h, axis=1)                 # PointNet max-pool per instance
    e = lrelu(g @ wg + (xyxys @ wb + bh))  # concat([g, box]) @ W, split form
    return e @ wo + bo                     # (B, OUT)


def init_params(key, c_in=8, h1=64, h2=128, h3=256, pb=4, he=128, out_d=32):
    """Deterministic synthetic parameters (no checkpoint load)."""
    ks = jax.random.split(key, 11)

    def dense(k, fan_in, fan_out):
        scale = 1.0 / jnp.sqrt(jnp.float32(fan_in))
        return jax.random.uniform(k, (fan_in, fan_out), jnp.float32, -scale, scale)

    def bias(k, fan_in, n):
        scale = 1.0 / jnp.sqrt(jnp.float32(fan_in))
        return jax.random.uniform(k, (1, n), jnp.float32, -scale, scale)

    w1 = dense(ks[0], c_in, h1); b1 = bias(ks[1], c_in, h1)
    w2 = dense(ks[2], h1, h2);   b2 = bias(ks[3], h1, h2)
    w3 = dense(ks[4], h2, h3);   b3 = bias(ks[5], h2, h3)
    wg = dense(ks[6], h3, he)
    wb = dense(ks[7], pb, he)
    bh = bias(ks[8], h3 + pb, he)
    wo = dense(ks[9], he, out_d)
    bo = bias(ks[10], he, out_d)
    return (w1, b1, w2, b2, w3, b3, wg, wb, bh, wo, bo)


if __name__ == "__main__":
    key = jax.random.PRNGKey(0)
    k_pts, k_box, k_par = jax.random.split(key, 3)

    # Small-shape stand-ins consistent with the module:
    #   B = 3 detected instances in a frame,
    #   N = 128 sampled points per instance (stand-in for num_points=1000 +
    #       env_points=500), C = 8 per-point features (2 offset + 3 color +
    #       border_ic=3 / category), outputD = 32.
    B, N, C = 3, 128, 8
    points = jax.random.normal(k_pts, (B, N, C), jnp.float32)
    xyxys = jax.random.uniform(k_box, (B, 4), jnp.float32)

    params = init_params(k_par, c_in=C)
    prep = prepare_params(params)          # one-time bf16 / bias-fold / pad prep

    emb = reid_forward(points, xyxys, prep)
    emb = jax.block_until_ready(emb)

    assert emb.shape == (B, 32) and emb.dtype == jnp.float32
    assert bool(jnp.all(jnp.isfinite(emb)))

    # Validate the bf16 kernel against the f32 reference (loose tolerance for
    # bf16 rounding through the 5-layer stack).
    ref = reid_reference(points, xyxys, params)
    rel_err = float(jnp.linalg.norm(emb - ref) / (jnp.linalg.norm(ref) + 1e-6))
    assert rel_err < 0.1, rel_err

    # The original forward returns, per frame, a list of per-instance re-id
    # vectors; emulate that packaging on the host.
    reid_samples = [[emb[i] for i in range(B)]]

    print("KERNEL_OK")
</pallas_src>

<mosaic_0001>
module attributes {stable_mosaic.version = 11 : i64} {
  func.func @reid_kernel(%arg0: i32, %arg1: memref<1024x9xbf16, #tpu.memory_space<vmem>>, %arg2: memref<8x128xf32, #tpu.memory_space<vmem>>, %arg3: memref<9x128xbf16, #tpu.memory_space<vmem>>, %arg4: memref<128x128xbf16, #tpu.memory_space<vmem>>, %arg5: memref<128x256xbf16, #tpu.memory_space<vmem>>, %arg6: memref<1x256xbf16, #tpu.memory_space<vmem>>, %arg7: memref<256x128xbf16, #tpu.memory_space<vmem>>, %arg8: memref<128x128xbf16, #tpu.memory_space<vmem>>, %arg9: memref<1x128xf32, #tpu.memory_space<vmem>>, %arg10: memref<8x128xf32, #tpu.memory_space<vmem>>) attributes {dimension_semantics = [#tpu.dimension_semantics<parallel>], iteration_bounds = array<i64: 1>, scalar_prefetch = 0 : i64, scratch_operands = 0 : i64, tpu.core_type = #tpu.core_type<tc>, window_params = [{transform_indices = @transform_0, window_bounds = array<i64: 1024, 9>}, {transform_indices = @transform_1, window_bounds = array<i64: 8, 128>}, {pipeline_mode = #tpu.pipeline_mode<synchronous>, transform_indices = @transform_2, window_bounds = array<i64: 9, 128>}, {pipeline_mode = #tpu.pipeline_mode<synchronous>, transform_indices = @transform_3, window_bounds = array<i64: 128, 128>}, {pipeline_mode = #tpu.pipeline_mode<synchronous>, transform_indices = @transform_4, window_bounds = array<i64: 128, 256>}, {pipeline_mode = #tpu.pipeline_mode<synchronous>, transform_indices = @transform_5, window_bounds = array<i64: 1, 256>}, {pipeline_mode = #tpu.pipeline_mode<synchronous>, transform_indices = @transform_6, window_bounds = array<i64: 256, 128>}, {pipeline_mode = #tpu.pipeline_mode<synchronous>, transform_indices = @transform_7, window_bounds = array<i64: 128, 128>}, {pipeline_mode = #tpu.pipeline_mode<synchronous>, transform_indices = @transform_8, window_bounds = array<i64: 1, 128>}, {transform_indices = @transform_9, window_bounds = array<i64: 8, 128>}]} {
    %c0 = arith.constant 0 : index
    %c0_0 = arith.constant 0 : index
    %0 = vector.load %arg1[%c0, %c0_0] : memref<1024x9xbf16, #tpu.memory_space<vmem>>, vector<1024x9xbf16>
    %c0_1 = arith.constant 0 : index
    %c0_2 = arith.constant 0 : index
    %1 = vector.load %arg3[%c0_1, %c0_2] : memref<9x128xbf16, #tpu.memory_space<vmem>>, vector<9x128xbf16>
    %cst = arith.constant dense<0.000000e+00> : vector<1024x128xf32>
    %2 = tpu.matmul %0, %1, %cst {dimension_numbers = #tpu.dot_dimension_numbers<[1], [0], [0], [1], [0, 0, 1, 1], [], []>} : vector<1024x9xbf16>, vector<9x128xbf16>, vector<1024x128xf32> -> vector<1024x128xf32>
    %3 = arith.truncf %2 : vector<1024x128xf32> to vector<1024x128xbf16>
    %cst_3 = arith.constant 1.000980e-02 : bf16
    %4 = vector.broadcast %cst_3 : bf16 to vector<1024x128xbf16>
    %5 = arith.mulf %4, %3 : vector<1024x128xbf16>
    %6 = arith.maximumf %3, %5 : vector<1024x128xbf16>
    %c0_4 = arith.constant 0 : index
    %c0_5 = arith.constant 0 : index
    %7 = vector.load %arg4[%c0_4, %c0_5] : memref<128x128xbf16, #tpu.memory_space<vmem>>, vector<128x128xbf16>
    %cst_6 = arith.constant dense<0.000000e+00> : vector<1024x128xf32>
    %8 = tpu.matmul %6, %7, %cst_6 {dimension_numbers = #tpu.dot_dimension_numbers<[1], [0], [0], [1], [0, 0, 1, 1], [], []>} : vector<1024x128xbf16>, vector<128x128xbf16>, vector<1024x128xf32> -> vector<1024x128xf32>
    %9 = arith.truncf %8 : vector<1024x128xf32> to vector<1024x128xbf16>
    %cst_7 = arith.constant 1.000980e-02 : bf16
    %10 = vector.broadcast %cst_7 : bf16 to vector<1024x128xbf16>
    %11 = arith.mulf %10, %9 : vector<1024x128xbf16>
    %12 = arith.maximumf %9, %11 : vector<1024x128xbf16>
    %c0_8 = arith.constant 0 : index
    %c0_9 = arith.constant 0 : index
    %13 = vector.load %arg5[%c0_8, %c0_9] : memref<128x256xbf16, #tpu.memory_space<vmem>>, vector<128x256xbf16>
    %cst_10 = arith.constant dense<0.000000e+00> : vector<1024x256xf32>
    %14 = tpu.matmul %12, %13, %cst_10 {dimension_numbers = #tpu.dot_dimension_numbers<[1], [0], [0], [1], [0, 0, 1, 1], [], []>} : vector<1024x128xbf16>, vector<128x256xbf16>, vector<1024x256xf32> -> vector<1024x256xf32>
    %15 = arith.truncf %14 : vector<1024x256xf32> to vector<1024x256xbf16>
    %c0_11 = arith.constant 0 : index
    %c0_12 = arith.constant 0 : index
    %16 = vector.load %arg6[%c0_11, %c0_12] : memref<1x256xbf16, #tpu.memory_space<vmem>>, vector<1x256xbf16>
    %17 = vector.broadcast %16 : vector<1x256xbf16> to vector<1024x256xbf16>
    %18 = arith.addf %15, %17 : vector<1024x256xbf16>
    %cst_13 = arith.constant 1.000980e-02 : bf16
    %19 = vector.broadcast %cst_13 : bf16 to vector<1024x256xbf16>
    %20 = arith.mulf %19, %18 : vector<1024x256xbf16>
    %21 = arith.maximumf %18, %20 : vector<1024x256xbf16>
    %22 = vector.shape_cast %21 : vector<1024x256xbf16> to vector<8x128x256xbf16>
    %cst_14 = arith.constant dense<0xFF80> : vector<8x256xbf16>
    %23 = vector.multi_reduction <maximumf>, %22, %cst_14 [1] : vector<8x128x256xbf16> to vector<8x256xbf16>
    %c0_15 = arith.constant 0 : index
    %c0_16 = arith.constant 0 : index
    %24 = vector.load %arg7[%c0_15, %c0_16] : memref<256x128xbf16, #tpu.memory_space<vmem>>, vector<256x128xbf16>
    %cst_17 = arith.constant dense<0.000000e+00> : vector<8x128xf32>
    %25 = tpu.matmul %23, %24, %cst_17 {dimension_numbers = #tpu.dot_dimension_numbers<[1], [0], [0], [1], [0, 0, 1, 1], [], []>} : vector<8x256xbf16>, vector<256x128xbf16>, vector<8x128xf32> -> vector<8x128xf32>
    %c0_18 = arith.constant 0 : index
    %c0_19 = arith.constant 0 : index
    %26 = vector.load %arg2[%c0_18, %c0_19] : memref<8x128xf32, #tpu.memory_space<vmem>>, vector<8x128xf32>
    %27 = arith.addf %25, %26 : vector<8x128xf32>
    %cst_20 = arith.constant 0.00999999977 : f32
    %28 = vector.broadcast %cst_20 : f32 to vector<8x128xf32>
    %29 = arith.mulf %28, %27 : vector<8x128xf32>
    %30 = arith.maximumf %27, %29 : vector<8x128xf32>
    %31 = arith.truncf %30 : vector<8x128xf32> to vector<8x128xbf16>
    %c0_21 = arith.constant 0 : index
    %c0_22 = arith.constant 0 : index
    %32 = vector.load %arg8[%c0_21, %c0_22] : memref<128x128xbf16, #tpu.memory_space<vmem>>, vector<128x128xbf16>
    %cst_23 = arith.constant dense<0.000000e+00> : vector<8x128xf32>
    %33 = tpu.matmul %31, %32, %cst_23 {dimension_numbers = #tpu.dot_dimension_numbers<[1], [0], [0], [1], [0, 0, 1, 1], [], []>} : vector<8x128xbf16>, vector<128x128xbf16>, vector<8x128xf32> -> vector<8x128xf32>
    %c0_24 = arith.constant 0 : index
    %c0_25 = arith.constant 0 : index
    %34 = vector.load %arg9[%c0_24, %c0_25] : memref<1x128xf32, #tpu.memory_space<vmem>>, vector<1x128xf32>
    %35 = vector.broadcast %34 : vector<1x128xf32> to vector<8x128xf32>
    %36 = arith.addf %33, %35 : vector<8x128xf32>
    %c0_26 = arith.constant 0 : index
    %c0_27 = arith.constant 0 : index
    %37 = vector.load %arg10[%c0_26, %c0_27] : memref<8x128xf32, #tpu.memory_space<vmem>>, vector<8x128xf32>
    tpu.vector_store %arg10[%c0_26, %c0_27], %36 {strides = array<i32>} : memref<8x128xf32, #tpu.memory_space<vmem>>, vector<8x128xf32>,
    return
  }
  func.func @transform_0(%arg0: i32) -> (i32, i32) {
    %c0_i32 = arith.constant 0 : i32
    %c0_i32_0 = arith.constant 0 : i32
    return %arg0, %c0_i32 : i32, i32
  }
  func.func @transform_1(%arg0: i32) -> (i32, i32) {
    %c0_i32 = arith.constant 0 : i32
    %c0_i32_0 = arith.constant 0 : i32
    return %arg0, %c0_i32 : i32, i32
  }
  func.func @transform_2(%arg0: i32) -> (i32, i32) {
    %c0_i32 = arith.constant 0 : i32
    %c0_i32_0 = arith.constant 0 : i32
    %c0_i32_1 = arith.constant 0 : i32
    return %c0_i32, %c0_i32_0 : i32, i32
  }
  func.func @transform_3(%arg0: i32) -> (i32, i32) {
    %c0_i32 = arith.constant 0 : i32
    %c0_i32_0 = arith.constant 0 : i32
    %c0_i32_1 = arith.constant 0 : i32
    return %c0_i32, %c0_i32_0 : i32, i32
  }
  func.func @transform_4(%arg0: i32) -> (i32, i32) {
    %c0_i32 = arith.constant 0 : i32
    %c0_i32_0 = arith.constant 0 : i32
    %c0_i32_1 = arith.constant 0 : i32
    return %c0_i32, %c0_i32_0 : i32, i32
  }
  func.func @transform_5(%arg0: i32) -> (i32, i32) {
    %c0_i32 = arith.constant 0 : i32
    %c0_i32_0 = arith.constant 0 : i32
    %c0_i32_1 = arith.constant 0 : i32
    return %c0_i32, %c0_i32_0 : i32, i32
  }
  func.func @transform_6(%arg0: i32) -> (i32, i32) {
    %c0_i32 = arith.constant 0 : i32
    %c0_i32_0 = arith.constant 0 : i32
    %c0_i32_1 = arith.constant 0 : i32
    return %c0_i32, %c0_i32_0 : i32, i32
  }
  func.func @transform_7(%arg0: i32) -> (i32, i32) {
    %c0_i32 = arith.constant 0 : i32
    %c0_i32_0 = arith.constant 0 : i32
    %c0_i32_1 = arith.constant 0 : i32
    return %c0_i32, %c0_i32_0 : i32, i32
  }
  func.func @transform_8(%arg0: i32) -> (i32, i32) {
    %c0_i32 = arith.constant 0 : i32
    %c0_i32_0 = arith.constant 0 : i32
    %c0_i32_1 = arith.constant 0 : i32
    return %c0_i32, %c0_i32_0 : i32, i32
  }
  func.func @transform_9(%arg0: i32) -> (i32, i32) {
    %c0_i32 = arith.constant 0 : i32
    %c0_i32_0 = arith.constant 0 : i32
    return %arg0, %c0_i32 : i32, i32
  }
}

</mosaic_0001>

<bundles_post_ra>
// kernel: tpu_custom_call.1
= control target key start
LH: loop header
LB: loop body
LE: loop exit
PB: predicated region body
PF: predicated region fallthrough
CT: control target
= control target key end

     0   :  { %vm683_vm0 = vcmask 1043456   ;;  %vm684_vm1 = vcmask 1044480   ;;  %v4968_v2 = vmov 65535   ;;  %vm490_vm2 = vcmask 72704   ;;  %s5989_s0 = inlined_call_operand.vmem [shape: bf16[1024,9], index: 0, kind: input, shape index: {}]   ;;  %s5990_s1 = inlined_call_operand.vmem [shape: f32[8,128], index: 1, kind: input, shape index: {}]   ;;  %s5991_s2 = inlined_call_operand.vmem [shape: bf16[9,128], index: 2, kind: input, shape index: {}]   ;;  %s5992_s3 = inlined_call_operand.vmem [shape: bf16[128,128], index: 3, kind: input, shape index: {}]   ;;  %s5993_s4 = inlined_call_operand.vmem [shape: bf16[128,256], index: 4, kind: input, shape index: {}]   ;;  %s5994_s5 = inlined_call_operand.vmem [shape: bf16[1,256], index: 5, kind: input, shape index: {}]   ;;  %s5995_s6 = inlined_call_operand.vmem [shape: bf16[256,128], index: 6, kind: input, shape index: {}]   ;;  %s5996_s7 = inlined_call_operand.vmem [shape: bf16[128,128], index: 7, kind: input, shape index: {}]   ;;  %s5997_s8 = inlined_call_operand.vmem [shape: f32[1,128], index: 8, kind: input, shape index: {}]   ;;  %s5998_s9 = inlined_call_operand.hbm [shape: f32[8,128], index: 9, kind: output, shape index: {}]  }
   0x1   :  { %v4823_v0 = vld [vmem:[%s5991_s2] sm:$0x1f]   ;;  %v685_v3 = vsel %vm683_vm0, 4294967295, %v4968_v2  ;;  %v4826_v7 = vld [vmem:[%s5989_s0 + $0x8] sm:$0xff]   ;;  %v4829_v10 = vld [vmem:[%s5989_s0 + $0x50] sm:$0xff]  }
   0x2   :  { %v4824_v1 = vld [vmem:[%s5989_s0] sm:$0xff]   ;;  %v686_v4 = vsel %vm684_vm1, %v685_v3, 0  ;;  %v4827_v8 = vld [vmem:[%s5989_s0 + $0x48] sm:$0xff]   ;;  %v4831_v11 = vld [vmem:[%s5989_s0 + $0x10] sm:$0xff]  }
   0x3   :  { %4523 = vmatprep.mubr.msk.bf16.mxu0 %vm490_vm2, %v4824_v1  ;;  %v4825_v5 = vld [vmem:[%s5989_s0 + $0x40] sm:$0xff]   ;;  %v688_v6 = vand.u32 %v4823_v0, %v686_v4  ;;  %v4830_v12 = vld [vmem:[%s5989_s0 + $0x58] sm:$0xff]   ;;  %v4841_v16 = vld [vmem:[%s5992_s3 + $0x8] sm:$0xff]  }
   0x4   :  { %4539 = vmatprep.mubr.msk.bf16.mxu1 %vm490_vm2, %v4825_v5  ;;  %v4828_v9 = vld [vmem:[%s5992_s3] sm:$0xff]   ;;  %v4832_v13 = vld [vmem:[%s5989_s0 + $0x18] sm:$0xff]   ;;  %v4834_v17 = vld [vmem:[%s5989_s0 + $0x68] sm:$0xff]  }
   0x5   :  { %4521 = vmatprep.subr.bf16.mxu0 %v688_v6  ;;  %4815 = vmatprep.subr.bf16.mxu1 %v688_v6  ;;  %v4833_v14 = vld [vmem:[%s5989_s0 + $0x60] sm:$0xff]   ;;  %v4836_v18 = vld [vmem:[%s5989_s0 + $0x28] sm:$0xff]   ;;  %v4837_v19 = vld [vmem:[%s5989_s0 + $0x70] sm:$0xff]  }
   0x6   :  { %4522 = vmatpush3.bf16.msra.mxu0 %v688_v6  ;;  %4816 = vmatpush3.bf16.msra.mxu1 %v688_v6  ;;  %v4835_v15 = vld [vmem:[%s5989_s0 + $0x20] sm:$0xff]   ;;  %v4839_v20 = vld [vmem:[%s5989_s0 + $0x30] sm:$0xff]   ;;  %v4838_v22 = vld [vmem:[%s5989_s0 + $0x78] sm:$0xff]  }
   0x7   :  { %4651 = vmatprep.subr.bf16.mxu1 %v4828_v9  ;;  %v4850_v21 = vld [vmem:[%s5992_s3 + $0x10] sm:$0xff]   ;;  %v4840_v23 = vld [vmem:[%s5989_s0 + $0x38] sm:$0xff]   ;;  %v4842_v24 = vld [vmem:[%s5989_s0 + $0x80] sm:$0xff]  }
   0x8   :  { %v4857_v25 = vld [vmem:[%s5992_s3 + $0x18] sm:$0xff]   ;;  %v4843_v26 = vld [vmem:[%s5989_s0 + $0x88] sm:$0xff]   ;;  %v4844_v27 = vld [vmem:[%s5989_s0 + $0x90] sm:$0xff]  }
   0x9   :  { %4524 = vmatmul.mubr.msk.bf16.vlgmr.msra.gmra.mrb[0].mxu0 %vm490_vm2, %v4826_v7  ;;  %4540 = vmatmul.mubr.msk.bf16.vlgmr.msra.gmra.mrb[0].mxu1 %vm490_vm2, %v4827_v8  ;;  %v4866_v28 = vld [vmem:[%s5992_s3 + $0x20] sm:$0xff]   ;;  %v4845_v29 = vld [vmem:[%s5989_s0 + $0x98] sm:$0xff]   ;;  %v4873_v31 = vld [vmem:[%s5992_s3 + $0x28] sm:$0xff]  }
   0xa   :  { %4652 = vmatpush3.bf16.msra.mxu1 %v4828_v9  ;;  %4543 = vmatprep.mubr.msk.bf16.mxu1 %vm490_vm2, %v4829_v10  ;;  %v4846_v30 = vld [vmem:[%s5989_s0 + $0xa0] sm:$0xff]   ;;  %v4847_v32 = vld [vmem:[%s5989_s0 + $0xa8] sm:$0xff]   ;;  %v4848_v33 = vld [vmem:[%s5989_s0 + $0xb0] sm:$0xff]  }
   0xb   :  { %4527 = vmatprep.mubr.msk.bf16.mxu0 %vm490_vm2, %v4831_v11  ;;  %4653 = vmatprep.subr.bf16.mxu1 %v4841_v16  ;;  %v4882_v34 = vld [vmem:[%s5992_s3 + $0x30] sm:$0xff]   ;;  %v4849_v35 = vld [vmem:[%s5989_s0 + $0xb8] sm:$0xff]   ;;  %v4851_v36 = vld [vmem:[%s5989_s0 + $0xc0] sm:$0xff]  }
   0xc   :  { %v4852_v37 = vld [vmem:[%s5989_s0 + $0xc8] sm:$0xff]   ;;  %v4853_v38 = vld [vmem:[%s5989_s0 + $0xd0] sm:$0xff]   ;;  %v4889_v39 = vld [vmem:[%s5992_s3 + $0x38] sm:$0xff]  }
   0xd   :  { %v4854_v40 = vld [vmem:[%s5989_s0 + $0xd8] sm:$0xff]   ;;  %v4855_v41 = vld [vmem:[%s5989_s0 + $0xe0] sm:$0xff]   ;;  %v4856_v42 = vld [vmem:[%s5989_s0 + $0xe8] sm:$0xff]  }
   0xe   :  { %4654 = vmatpush3.bf16.msra.mxu1 %v4841_v16  ;;  %v4858_v43 = vld [vmem:[%s5989_s0 + $0xf0] sm:$0xff]   ;;  %v4859_v44 = vld [vmem:[%s5989_s0 + $0xf8] sm:$0xff]  }
   0xf   :  { %4655 = vmatprep.subr.bf16.mxu1 %v4850_v21 }
  0x11   :  { %4544 = vmatmul.mubr.msk.bf16.gmra.mrb[4].mxu1 %vm490_vm2, %v4830_v12  ;;  %4528 = vmatmul.mubr.msk.bf16.gmra.mrb[4].mxu0 %vm490_vm2, %v4832_v13 }
  0x12   :  { %4547 = vmatprep.mubr.msk.bf16.mxu1 %vm490_vm2, %v4833_v14  ;;  %4531 = vmatprep.mubr.msk.bf16.mxu0 %vm490_vm2, %v4835_v15 }
  0x13   :  { %4656 = vmatpush3.bf16.msra.mxu1 %v4850_v21 }
  0x14   :  { %4657 = vmatprep.subr.bf16.mxu1 %v4857_v25 }
  0x17   :  { %4658 = vmatpush3.bf16.msra.mxu1 %v4857_v25 }
  0x18   :  { %4659 = vmatprep.subr.bf16.mxu1 %v4866_v28 }
  0x19   :  { %4548 = vmatmul.mubr.msk.bf16.gmra.mrb[8].mxu1 %vm490_vm2, %v4834_v17  ;;  %4532 = vmatmul.mubr.msk.bf16.gmra.mrb[8].mxu0 %vm490_vm2, %v4836_v18 }
  0x1a   :  { %4551 = vmatprep.mubr.msk.bf16.mxu1 %vm490_vm2, %v4837_v19  ;;  %4535 = vmatprep.mubr.msk.bf16.mxu0 %vm490_vm2, %v4839_v20 }
  0x1b   :  { %4660 = vmatpush3.bf16.msra.mxu1 %v4866_v28 }
  0x1c   :  { %4661 = vmatprep.subr.bf16.mxu1 %v4873_v31 }
  0x1f   :  { %4662 = vmatpush3.bf16.msra.mxu1 %v4873_v31 }
  0x20   :  { %4663 = vmatprep.subr.bf16.mxu1 %v4882_v34 }
  0x21   :  { %4552 = vmatmul.mubr.msk.bf16.gmra.mrb[12].mxu1 %vm490_vm2, %v4838_v22  ;;  %4536 = vmatmul.mubr.msk.bf16.gmra.mrb[12].mxu0 %vm490_vm2, %v4840_v23 }
  0x22   :  { %4555 = vmatprep.mubr.msk.bf16.mxu1 %vm490_vm2, %v4842_v24 }
  0x23   :  { %4664 = vmatpush3.bf16.msra.mxu1 %v4882_v34 }
  0x24   :  { %4665 = vmatprep.subr.bf16.mxu1 %v4889_v39 }
  0x27   :  { %4666 = vmatpush3.bf16.msra.mxu1 %v4889_v39 }
  0x29   :  { %4556 = vmatmul.mubr.msk.bf16.gmra.mrb[16].mxu1 %vm490_vm2, %v4843_v26 }
  0x2a   :  { %4559 = vmatprep.mubr.msk.bf16.mxu1 %vm490_vm2, %v4844_v27 }
  0x31   :  { %4560 = vmatmul.mubr.msk.bf16.gmra.mrb[20].mxu1 %vm490_vm2, %v4845_v29 }
  0x32   :  { %4563 = vmatprep.mubr.msk.bf16.mxu1 %vm490_vm2, %v4846_v30 }
  0x39   :  { %4564 = vmatmul.mubr.msk.bf16.gmra.mrb[24].mxu1 %vm490_vm2, %v4847_v32 }
  0x3a   :  { %4567 = vmatprep.mubr.msk.bf16.mxu1 %vm490_vm2, %v4848_v33 }
  0x41   :  { %4568 = vmatmul.mubr.msk.bf16.gmra.mrb[28].mxu1 %vm490_vm2, %v4849_v35 }
  0x42   :  { %4571 = vmatprep.mubr.msk.bf16.mxu1 %vm490_vm2, %v4851_v36 }
  0x49   :  { %4572 = vmatmul.mubr.msk.bf16.gmra.mrb[32].mxu1 %vm490_vm2, %v4852_v37 }
  0x4a   :  { %4575 = vmatprep.mubr.msk.bf16.mxu1 %vm490_vm2, %v4853_v38 }
  0x51   :  { %4576 = vmatmul.mubr.msk.bf16.gmra.mrb[36].mxu1 %vm490_vm2, %v4854_v40 }
  0x52   :  { %4579 = vmatprep.mubr.msk.bf16.mxu1 %vm490_vm2, %v4855_v41 }
  0x59   :  { %4580 = vmatmul.mubr.msk.bf16.gmra.mrb[40].mxu1 %vm490_vm2, %v4856_v42 }
  0x5a   :  { %4583 = vmatprep.mubr.msk.bf16.mxu1 %vm490_vm2, %v4858_v43 }
  0x5b   :  { %14 = vsyncpa [#allocation3], 0  ;;  %v4860_v45 = vld [vmem:[%s5989_s0 + $0x100] sm:$0xff]   ;;  %v4861_v46 = vld [vmem:[%s5989_s0 + $0x108] sm:$0xff]   ;;  %vm3884_vm3 = vcmask 1041409   ;;  %vm3886_vm4 = vcmask 1042434  }
  0x5c   :  { %v4862_v47 = vld [vmem:[%s5989_s0 + $0x110] sm:$0xff]   ;;  %v4863_v48 = vld [vmem:[%s5989_s0 + $0x118] sm:$0xff]   ;;  %v4864_v49 = vld [vmem:[%s5989_s0 + $0x120] sm:$0xff]   ;;  %vm3888_vm5 = vcmask 1043459   ;;  %vm3890_vm6 = vcmask 1044484   ;;  %vm3892_vm7 = vcmask 1045509  }
  0x5d   :  { %v4865_v50 = vld [vmem:[%s5989_s0 + $0x128] sm:$0xff]   ;;  %v4867_v51 = vld [vmem:[%s5989_s0 + $0x130] sm:$0xff]   ;;  %v4868_v52 = vld [vmem:[%s5989_s0 + $0x138] sm:$0xff]   ;;  %vm3894_vm8 = vcmask 1046534   ;;  %vm3896_vm9 = vcmask 1047559   ;;  %vm4972_vm10 = vmmov 0  }
  0x5e   :  { %v4869_v53 = vld [vmem:[%s5989_s0 + $0x140] sm:$0xff]   ;;  %v4870_v54 = vld [vmem:[%s5989_s0 + $0x148] sm:$0xff]   ;;  %v4871_v55 = vld [vmem:[%s5989_s0 + $0x150] sm:$0xff]  }
  0x5f   :  { %v4872_v56 = vld [vmem:[%s5989_s0 + $0x158] sm:$0xff]   ;;  %v4874_v57 = vld [vmem:[%s5989_s0 + $0x160] sm:$0xff]   ;;  %v4875_v58 = vld [vmem:[%s5989_s0 + $0x168] sm:$0xff]  }
  0x60   :  { %v4876_v59 = vld [vmem:[%s5989_s0 + $0x170] sm:$0xff]   ;;  %v4877_v60 = vld [vmem:[%s5989_s0 + $0x178] sm:$0xff]   ;;  %v4878_v61 = vld [vmem:[%s5989_s0 + $0x180] sm:$0xff]  }
  0x61   :  { %4584 = vmatmul.mubr.msk.bf16.gmra.mrb[44].mxu1 %vm490_vm2, %v4859_v44  ;;  %v4879_v62 = vld [vmem:[%s5989_s0 + $0x188] sm:$0xff]   ;;  %v4880_v63 = vld [vmem:[%s5989_s0 + $0x190] sm:$0xff]   ;;  %v4881_v0 = vld [vmem:[%s5989_s0 + $0x198] sm:$0xff]  }
  0x62   :  { %4587 = vmatprep.mubr.msk.bf16.mxu1 %vm490_vm2, %v4860_v45  ;;  %v4883_v1 = vld [vmem:[%s5989_s0 + $0x1a0] sm:$0xff]   ;;  %v4884_v2 = vld [vmem:[%s5989_s0 + $0x1a8] sm:$0xff]   ;;  %v4885_v3 = vld [vmem:[%s5989_s0 + $0x1b0] sm:$0xff]  }
  0x63   :  { %v4886_v4 = vld [vmem:[%s5989_s0 + $0x1b8] sm:$0xff]   ;;  %v4887_v5 = vld [vmem:[%s5989_s0 + $0x1c0] sm:$0xff]   ;;  %v4888_v6 = vld [vmem:[%s5989_s0 + $0x1c8] sm:$0xff]  }
  0x64   :  { %v4890_v7 = vld [vmem:[%s5989_s0 + $0x1d0] sm:$0xff]   ;;  %v4891_v8 = vld [vmem:[%s5989_s0 + $0x1d8] sm:$0xff]   ;;  %v4892_v9 = vld [vmem:[%s5989_s0 + $0x1e0] sm:$0xff]  }
  0x65   :  { %v4893_v10 = vld [vmem:[%s5989_s0 + $0x1e8] sm:$0xff]   ;;  %v4894_v11 = vld [vmem:[%s5989_s0 + $0x1f0] sm:$0xff]   ;;  %v4895_v16 = vld [vmem:[%s5989_s0 + $0x1f8] sm:$0xff]  }
  0x69   :  { %4588 = vmatmul.mubr.msk.bf16.gmra.mrb[48].mxu1 %vm490_vm2, %v4861_v46 }
  0x6a   :  { %4591 = vmatprep.mubr.msk.bf16.mxu1 %vm490_vm2, %v4862_v47 }
  0x71   :  { %4592 = vmatmul.mubr.msk.bf16.gmra.mrb[52].mxu1 %vm490_vm2, %v4863_v48 }
  0x72   :  { %4595 = vmatprep.mubr.msk.bf16.mxu1 %vm490_vm2, %v4864_v49 }
  0x79   :  { %4596 = vmatmul.mubr.msk.bf16.gmra.mrb[56].mxu1 %vm490_vm2, %v4865_v50 }
  0x7a   :  { %4599 = vmatprep.mubr.msk.bf16.mxu1 %vm490_vm2, %v4867_v51 }
  0x81   :  { %4600 = vmatmul.mubr.msk.bf16.gmra.mrb[60].mxu1 %vm490_vm2, %v4868_v52 }
  0x82   :  { %4603 = vmatprep.mubr.msk.bf16.mxu1 %vm490_vm2, %v4869_v53 }
  0x89   :  { %4604 = vmatmul.mubr.msk.bf16.gmra.mrb[64].mxu1 %vm490_vm2, %v4870_v54 }
  0x8a   :  { %4607 = vmatprep.mubr.msk.bf16.mxu1 %vm490_vm2, %v4871_v55 }
  0x91   :  { %4608 = vmatmul.mubr.msk.bf16.gmra.mrb[68].mxu1 %vm490_vm2, %v4872_v56 }
  0x92   :  { %4611 = vmatprep.mubr.msk.bf16.mxu1 %vm490_vm2, %v4874_v57 }
  0x99   :  { %4612 = vmatmul.mubr.msk.bf16.gmra.mrb[72].mxu1 %vm490_vm2, %v4875_v58 }
  0x9a   :  { %4615 = vmatprep.mubr.msk.bf16.mxu1 %vm490_vm2, %v4876_v59 }
  0xa1   :  { %4616 = vmatmul.mubr.msk.bf16.gmra.mrb[76].mxu1 %vm490_vm2, %v4877_v60 }
  0xa2   :  { %4619 = vmatprep.mubr.msk.bf16.mxu1 %vm490_vm2, %v4878_v61 }
  0xa9   :  { %4620 = vmatmul.mubr.msk.bf16.gmra.mrb[80].mxu1 %vm490_vm2, %v4879_v62 }
  0xaa   :  { %4623 = vmatprep.mubr.msk.bf16.mxu1 %vm490_vm2, %v4880_v63 }
  0xb1   :  { %4624 = vmatmul.mubr.msk.bf16.gmra.mrb[84].mxu1 %vm490_vm2, %v4881_v0 }
  0xb2   :  { %4627 = vmatprep.mubr.msk.bf16.mxu1 %vm490_vm2, %v4883_v1 }
  0xb9   :  { %4628 = vmatmul.mubr.msk.bf16.gmra.mrb[88].mxu1 %vm490_vm2, %v4884_v2 }
  0xba   :  { %4631 = vmatprep.mubr.msk.bf16.mxu1 %vm490_vm2, %v4885_v3 }
  0xc1   :  { %4632 = vmatmul.mubr.msk.bf16.gmra.mrb[92].mxu1 %vm490_vm2, %v4886_v4 }
  0xc2   :  { %4635 = vmatprep.mubr.msk.bf16.mxu1 %vm490_vm2, %v4887_v5 }
  0xc9   :  { %4636 = vmatmul.mubr.msk.bf16.gmra.mrb[96].mxu1 %vm490_vm2, %v4888_v6 }
  0xca   :  { %4639 = vmatprep.mubr.msk.bf16.mxu1 %vm490_vm2, %v4890_v7 }
  0xd1   :  { %4640 = vmatmul.mubr.msk.bf16.gmra.mrb[100].mxu1 %vm490_vm2, %v4891_v8 }
  0xd2   :  { %4643 = vmatprep.mubr.msk.bf16.mxu1 %vm490_vm2, %v4892_v9 }
  0xd9   :  { %4644 = vmatmul.mubr.msk.bf16.gmra.mrb[104].mxu1 %vm490_vm2, %v4893_v10 }
  0xda   :  { %4647 = vmatprep.mubr.msk.bf16.mxu1 %vm490_vm2, %v4894_v11 }
  0xdc   :  { %v4525_v12 = vpop.f32.mrb[0].mxu0  ;;  %v4541_v13 = vpop.f32.mrb[0].mxu1 }
  0xdd   :  { %v724_v14 = vpop.f32.mrb[1].mxu0  ;;  %v788_v15 = vpop.f32.mrb[1].mxu1 }
  0xde   :  { %v4526_v17 = vpop.f32.mrb[2].mxu0  ;;  %v4542_v18 = vpop.f32.mrb[2].mxu1 }
  0xdf   :  { %v1236_v19 = vpack.c.bf16 %v4526_v17, %v4525_v12  ;;  %v5306_v20 = vpack.c.bf16 %v4542_v18, %v4541_v13  ;;  %v727_v21 = vpop.f32.mrb[3].mxu0  ;;  %v791_v22 = vpop.f32.mrb[3].mxu1 }
  0xe0   :  { %v1235_v23 = vpack.c.bf16 %v727_v21, %v724_v14  ;;  %v5308_v24 = vpack.c.bf16 %v791_v22, %v788_v15 }
  0xe1   :  { %4648 = vmatmul.mubr.msk.bf16.gmra.mrb[108].mxu1 %vm490_vm2, %v4895_v16  ;;  %v1300_v26 = vmul.bf16 1009007652, %v1236_v19  ;;  %v1308_v22 = vmul.bf16 1009007652, %v5306_v20 }
  0xe2   :  { %v1299_v25 = vmul.bf16 1009007652, %v1235_v23  ;;  %v1307_v11 = vmul.bf16 1009007652, %v5308_v24 }
  0xe3   :  { %v1364_v34 = vmax.bf16 %v1300_v26, %v1236_v19 }
  0xe4   :  { %v4545_v27 = vpop.f32.mrb[4].mxu1  ;;  %v4529_v28 = vpop.f32.mrb[4].mxu0  ;;  %v1363_v29 = vmax.bf16 %v1299_v25, %v1235_v23  ;;  %v1371_v19 = vmax.bf16 %v1307_v11, %v5308_v24 }
  0xe5   :  { %v804_v30 = vpop.f32.mrb[5].mxu1  ;;  %v740_v31 = vpop.f32.mrb[5].mxu0 }
  0xe6   :  { %v4546_v32 = vpop.f32.mrb[6].mxu1  ;;  %4667 = vmatprep.mubr.bf16.mxu1 %v1363_v29  ;;  %v4530_v33 = vpop.f32.mrb[6].mxu0 }
  0xe7   :  { %v5311_v35 = vpack.c.bf16 %v4546_v32, %v4545_v27  ;;  %v807_v36 = vpop.f32.mrb[7].mxu1  ;;  %v1238_v37 = vpack.c.bf16 %v4530_v33, %v4529_v28  ;;  %v743_v38 = vpop.f32.mrb[7].mxu0  ;;  %v1372_v28 = vmax.bf16 %v1308_v22, %v5306_v20 }
  0xe8   :  { %v1245_v39 = vpack.c.bf16 %v807_v36, %v804_v30  ;;  %v1237_v40 = vpack.c.bf16 %v743_v38, %v740_v31 }
  0xe9   :  { %v1302_v41 = vmul.bf16 1009007652, %v1238_v37  ;;  %4668 = vmatmul.mubr.bf16.vlgmr.msra.gmra.mrb[112].mxu1 %v1364_v34  ;;  %v1310_v24 = vmul.bf16 1009007652, %v5311_v35 }
  0xea   :  { %v1301_v42 = vmul.bf16 1009007652, %v1237_v40  ;;  %v1309_v23 = vmul.bf16 1009007652, %v1245_v39 }
  0xeb   :  { %v1366_v48 = vmax.bf16 %v1302_v41, %v1238_v37  ;;  %v1374_v38 = vmax.bf16 %v1310_v24, %v5311_v35 }
  0xec   :  { %v4549_v43 = vpop.f32.mrb[8].mxu1  ;;  %v4533_v44 = vpop.f32.mrb[8].mxu0  ;;  %v1365_v45 = vmax.bf16 %v1301_v42, %v1237_v40  ;;  %v1373_v31 = vmax.bf16 %v1309_v23, %v1245_v39 }
  0xed   :  { %v820_v46 = vpop.f32.mrb[9].mxu1  ;;  %v756_v47 = vpop.f32.mrb[9].mxu0 }
  0xee   :  { %v4550_v49 = vpop.f32.mrb[10].mxu1  ;;  %v4534_v50 = vpop.f32.mrb[10].mxu0  ;;  %4671 = vmatprep.mubr.bf16.mxu1 %v1365_v45 }
  0xef   :  { %v5313_v51 = vpack.c.bf16 %v4550_v49, %v4549_v43  ;;  %v823_v52 = vpop.f32.mrb[11].mxu1  ;;  %v1240_v53 = vpack.c.bf16 %v4534_v50, %v4533_v44  ;;  %v759_v54 = vpop.f32.mrb[11].mxu0 }
  0xf0   :  { %v1247_v55 = vpack.c.bf16 %v823_v52, %v820_v46  ;;  %v1239_v56 = vpack.c.bf16 %v759_v54, %v756_v47 }
  0xf1   :  { %v1304_v57 = vmul.bf16 1009007652, %v1240_v53  ;;  %4672 = vmatmul.mubr.bf16.gmra.mrb[116].mxu1 %v1366_v48  ;;  %v1312_v39 = vmul.bf16 1009007652, %v5313_v51 }
  0xf2   :  { %v1303_v58 = vmul.bf16 1009007652, %v1239_v56  ;;  %v1311_v33 = vmul.bf16 1009007652, %v1247_v55 }
  0xf3   :  { %v1368_v0 = vmax.bf16 %v1304_v57, %v1240_v53  ;;  %v1376_v47 = vmax.bf16 %v1312_v39, %v5313_v51 }
  0xf4   :  { %v4553_v59 = vpop.f32.mrb[12].mxu1  ;;  %v4537_v60 = vpop.f32.mrb[12].mxu0  ;;  %v1367_v61 = vmax.bf16 %v1303_v58, %v1239_v56  ;;  %v1375_v42 = vmax.bf16 %v1311_v33, %v1247_v55 }
  0xf5   :  { %v836_v62 = vpop.f32.mrb[13].mxu1  ;;  %v772_v63 = vpop.f32.mrb[13].mxu0 }
  0xf6   :  { %v4554_v1 = vpop.f32.mrb[14].mxu1  ;;  %v4538_v2 = vpop.f32.mrb[14].mxu0  ;;  %4675 = vmatprep.mubr.bf16.mxu1 %v1367_v61 }
  0xf7   :  { %v5315_v3 = vpack.c.bf16 %v4554_v1, %v4553_v59  ;;  %v839_v4 = vpop.f32.mrb[15].mxu1  ;;  %v1242_v5 = vpack.c.bf16 %v4538_v2, %v4537_v60  ;;  %v775_v6 = vpop.f32.mrb[15].mxu0  ;;  %v4896_v2 = vld [vmem:[%s5993_s4] ss:$8 sps:$4 sm:$0xff]  }
  0xf8   :  { %v1249_v7 = vpack.c.bf16 %v839_v4, %v836_v62  ;;  %v1241_v8 = vpack.c.bf16 %v775_v6, %v772_v63 }
  0xf9   :  { %v1306_v9 = vmul.bf16 1009007652, %v1242_v5  ;;  %4676 = vmatmul.mubr.bf16.gmra.mrb[120].mxu1 %v1368_v0  ;;  %v1314_v52 = vmul.bf16 1009007652, %v5315_v3  ;;  %v4898_v0 = vld [vmem:[%s5993_s4 + $0x4] ss:$8 sps:$4 sm:$0xff]  }
  0xfa   :  { %v1305_v10 = vmul.bf16 1009007652, %v1241_v8  ;;  %v1313_v43 = vmul.bf16 1009007652, %v1249_v7  ;;  %2324 = vmatprep.subr.bf16.mxu0 %v4898_v0 }
  0xfb   :  { %v1370_v15 = vmax.bf16 %v1306_v9, %v1242_v5  ;;  %v1378_v57 = vmax.bf16 %v1314_v52, %v5315_v3  ;;  %2325 = vmatpush1.bf16.msra.mxu0 %v4896_v2  ;;  %v4901_v9 = vld [vmem:[%s5993_s4 + $0x14] ss:$8 sps:$4 sm:$0xff]  }
  0xfc   :  { %v4557_v12 = vpop.f32.mrb[16].mxu1  ;;  %v1369_v13 = vmax.bf16 %v1305_v10, %v1241_v8  ;;  %v1377_v50 = vmax.bf16 %v1313_v43, %v1249_v7  ;;  %v4899_v10 = vld [vmem:[%s5993_s4 + $0x10] ss:$8 sps:$4 sm:$0xff]   ;;  %2326 = vmatprep.subr.bf16.mxu0 %v4901_v9  ;;  %v4916_v43 = vld [vmem:[%s5993_s4 + $0x64] ss:$8 sps:$4 sm:$0xff]  }
  0xfd   :  { %v852_v14 = vpop.f32.mrb[17].mxu1 }
  0xfe   :  { %v4558_v16 = vpop.f32.mrb[18].mxu1  ;;  %4679 = vmatprep.mubr.bf16.mxu1 %v1369_v13 }
  0xff   :  { %v1252_v17 = vpack.c.bf16 %v4558_v16, %v4557_v12  ;;  %v855_v18 = vpop.f32.mrb[19].mxu1  ;;  %2327 = vmatpush1.bf16.msra.mxu0 %v4899_v10  ;;  %v4902_v16 = vld [vmem:[%s5993_s4 + $0x20] ss:$8 sps:$4 sm:$0xff]  }
 0x100   :  { %v1251_v21 = vpack.c.bf16 %v855_v18, %v852_v14  ;;  %v4904_v14 = vld [vmem:[%s5993_s4 + $0x24] ss:$8 sps:$4 sm:$0xff]  }
 0x101   :  { %4680 = vmatmul.mubr.bf16.gmra.mrb[124].mxu1 %v1370_v15  ;;  %v1316_v61 = vmul.bf16 1009007652, %v1252_v17  ;;  %2328 = vmatprep.subr.bf16.mxu0 %v4904_v14 }
 0x102   :  { %4683 = vmatprep.mubr.bf16.mxu1 %v1371_v19  ;;  %v1315_v53 = vmul.bf16 1009007652, %v1251_v21 }
 0x103   :  { %v1380_v4 = vmax.bf16 %v1316_v61, %v1252_v17  ;;  %2329 = vmatpush1.bf16.msra.mxu0 %v4902_v16 }
 0x104   :  { %v4561_v25 = vpop.f32.mrb[20].mxu1  ;;  %v1379_v51 = vmax.bf16 %v1315_v53, %v1251_v21  ;;  %v4919_v53 = vld [vmem:[%s5993_s4 + $0x74] ss:$8 sps:$4 sm:$0xff]  }
 0x105   :  { %v868_v26 = vpop.f32.mrb[21].mxu1 }
 0x106   :  { %v4562_v27 = vpop.f32.mrb[22].mxu1 }
 0x107   :  { %v5321_v29 = vpack.c.bf16 %v4562_v27, %v4561_v25  ;;  %v871_v30 = vpop.f32.mrb[23].mxu1  ;;  %v4907_v25 = vld [vmem:[%s5993_s4 + $0x34] ss:$8 sps:$4 sm:$0xff]  }
 0x108   :  { %v1253_v32 = vpack.c.bf16 %v871_v30, %v868_v26  ;;  %v4905_v26 = vld [vmem:[%s5993_s4 + $0x30] ss:$8 sps:$4 sm:$0xff]   ;;  %2330 = vmatprep.subr.bf16.mxu0 %v4907_v25  ;;  %v4910_v30 = vld [vmem:[%s5993_s4 + $0x44] ss:$8 sps:$4 sm:$0xff]  }
 0x109   :  { %4684 = vmatmul.mubr.bf16.gmra.mrb[128].mxu1 %v1372_v28  ;;  %v1318_v11 = vmul.bf16 1009007652, %v5321_v29  ;;  %2331 = vmatpush1.bf16.msra.mxu0 %v4905_v26 }
 0x10a   :  { %4687 = vmatprep.mubr.bf16.mxu1 %v1373_v31  ;;  %v1317_v62 = vmul.bf16 1009007652, %v1253_v32  ;;  %2332 = vmatprep.subr.bf16.mxu0 %v4910_v30 }
 0x10b   :  { %v1382_v18 = vmax.bf16 %v1318_v11, %v5321_v29 }
 0x10c   :  { %v4565_v34 = vpop.f32.mrb[24].mxu1  ;;  %v1381_v7 = vmax.bf16 %v1317_v62, %v1253_v32  ;;  %v4908_v32 = vld [vmem:[%s5993_s4 + $0x40] ss:$8 sps:$4 sm:$0xff]  }
 0x10d   :  { %v884_v36 = vpop.f32.mrb[25].mxu1  ;;  %2333 = vmatpush1.bf16.msra.mxu0 %v4908_v32 }
 0x10e   :  { %v4566_v37 = vpop.f32.mrb[26].mxu1 }
 0x10f   :  { %v5325_v40 = vpack.c.bf16 %v4566_v37, %v4565_v34  ;;  %v887_v41 = vpop.f32.mrb[27].mxu1 }
 0x110   :  { %v1255_v20 = vpack.c.bf16 %v887_v41, %v884_v36  ;;  %v4913_v41 = vld [vmem:[%s5993_s4 + $0x54] ss:$8 sps:$4 sm:$0xff]  }
 0x111   :  { %4688 = vmatmul.mubr.bf16.gmra.mrb[132].mxu1 %v1374_v38  ;;  %v1320_v27 = vmul.bf16 1009007652, %v5325_v40  ;;  %2334 = vmatprep.subr.bf16.mxu0 %v4913_v41 }
 0x112   :  { %4691 = vmatprep.mubr.bf16.mxu1 %v1375_v42  ;;  %v1319_v12 = vmul.bf16 1009007652, %v1255_v20  ;;  %v4911_v42 = vld [vmem:[%s5993_s4 + $0x50] ss:$8 sps:$4 sm:$0xff]  }
 0x113   :  { %v1384_v33 = vmax.bf16 %v1320_v27, %v5325_v40  ;;  %2335 = vmatpush1.bf16.msra.mxu0 %v4911_v42 }
 0x114   :  { %v4569_v44 = vpop.f32.mrb[28].mxu1  ;;  %v1383_v22 = vmax.bf16 %v1319_v12, %v1255_v20  ;;  %2336 = vmatprep.subr.bf16.mxu0 %v4916_v43 }
 0x115   :  { %v900_v45 = vpop.f32.mrb[29].mxu1 }
 0x116   :  { %v4570_v46 = vpop.f32.mrb[30].mxu1 }
 0x117   :  { %v5329_v48 = vpack.c.bf16 %v4570_v46, %v4569_v44  ;;  %v903_v49 = vpop.f32.mrb[31].mxu1 }
 0x118   :  { %v5331_v35 = vpack.c.bf16 %v903_v49, %v900_v45  ;;  %v4914_v45 = vld [vmem:[%s5993_s4 + $0x60] ss:$8 sps:$4 sm:$0xff]  }
 0x119   :  { %4692 = vmatmul.mubr.bf16.gmra.mrb[136].mxu1 %v1376_v47  ;;  %v1322_v40 = vmul.bf16 1009007652, %v5329_v48  ;;  %2337 = vmatpush1.bf16.msra.mxu0 %v4914_v45 }
 0x11a   :  { %4695 = vmatprep.mubr.bf16.mxu1 %v1377_v50  ;;  %v1321_v28 = vmul.bf16 1009007652, %v5331_v35  ;;  %2338 = vmatprep.subr.bf16.mxu0 %v4919_v53 }
 0x11b   :  { %v1386_v47 = vmax.bf16 %v1322_v40, %v5329_v48 }
 0x11c   :  { %v4573_v54 = vpop.f32.mrb[32].mxu1  ;;  %v1385_v37 = vmax.bf16 %v1321_v28, %v5331_v35 }
 0x11d   :  { %v916_v55 = vpop.f32.mrb[33].mxu1 }
 0x11e   :  { %v4574_v56 = vpop.f32.mrb[34].mxu1 }
 0x11f   :  { %v5335_v58 = vpack.c.bf16 %v4574_v56, %v4573_v54  ;;  %v919_v59 = vpop.f32.mrb[35].mxu1  ;;  %v4917_v54 = vld [vmem:[%s5993_s4 + $0x70] ss:$8 sps:$4 sm:$0xff]   ;;  %s4973_s4 = smov [#allocation2]  }
 0x120   :  { %v5337_v60 = vpack.c.bf16 %v919_v59, %v916_v55  ;;  %2339 = vmatpush1.bf16.msra.mxu0 %v4917_v54  ;;  %v4969_v59 = vmov 0   ;;  %s4166_s25 = sshll.u32 %s4973_s4, 4  ;;  %s4167_s25 = int_to_ptr.vmem [resolvable:$true] %s4166_s25 }
 0x121   :  { %4696 = vmatmul.mubr.bf16.gmra.mrb[140].mxu1 %v1378_v57  ;;  %v1324_v48 = vmul.bf16 1009007652, %v5335_v58  ;;  %2356 = vmatprep.mubr.bf16.mxu0 %v4969_v59  ;;  %p4949_p1 = scmp.lt.s32.totalorder %s4167_s25, %s4167_s25 }
 0x122   :  { %4699 = vmatprep.mubr.bf16.mxu1 %v1379_v51  ;;  %v1323_v20 = vmul.bf16 1009007652, %v5337_v60 }
 0x124   :  { %v4577_v63 = vpop.f32.mrb[36].mxu1  ;;  %v1387_v35 = vmax.bf16 %v1323_v20, %v5337_v60  ;;  %v1388_v60 = vmax.bf16 %v1324_v48, %v5335_v58 }
 0x125   :  { %v932_v1 = vpop.f32.mrb[37].mxu1 }
 0x126   :  { %v4578_v3 = vpop.f32.mrb[38].mxu1 }
 0x127   :  { %v5345_v5 = vpack.c.bf16 %v4578_v3, %v4577_v63  ;;  %v935_v6 = vpop.f32.mrb[39].mxu1 }
 0x128   :  { %v5347_v8 = vpack.c.bf16 %v935_v6, %v932_v1 }
 0x129   :  { %4700 = vmatmul.mubr.bf16.gmra.mrb[144].mxu1 %v1380_v4  ;;  %v1326_v1 = vmul.bf16 1009007652, %v5345_v5 }
 0x12a   :  { %4703 = vmatprep.mubr.bf16.mxu1 %v1381_v7  ;;  %v1325_v55 = vmul.bf16 1009007652, %v5347_v8 }
 0x12b   :  { %v1390_v7 = vmax.bf16 %v1326_v1, %v5345_v5 }
 0x12c   :  { %v4581_v13 = vpop.f32.mrb[40].mxu1  ;;  %v1389_v63 = vmax.bf16 %v1325_v55, %v5347_v8 }
 0x12d   :  { %v948_v15 = vpop.f32.mrb[41].mxu1 }
 0x12e   :  { %v4582_v17 = vpop.f32.mrb[42].mxu1 }
 0x12f   :  { %v5363_v19 = vpack.c.bf16 %v4582_v17, %v4581_v13  ;;  %v951_v21 = vpop.f32.mrb[43].mxu1 }
 0x130   :  { %v5365_v23 = vpack.c.bf16 %v951_v21, %v948_v15 }
 0x131   :  { %4704 = vmatmul.mubr.bf16.gmra.mrb[148].mxu1 %v1382_v18  ;;  %v1328_v8 = vmul.bf16 1009007652, %v5363_v19 }
 0x132   :  { %4707 = vmatprep.mubr.bf16.mxu1 %v1383_v22  ;;  %v1327_v2 = vmul.bf16 1009007652, %v5365_v23 }
 0x133   :  { %v1392_v16 = vmax.bf16 %v1328_v8, %v5363_v19 }
 0x134   :  { %v4585_v29 = vpop.f32.mrb[44].mxu1  ;;  %v1391_v58 = vmax.bf16 %v1327_v2, %v5365_v23 }
 0x135   :  { %v964_v31 = vpop.f32.mrb[45].mxu1 }
 0x136   :  { %v4586_v24 = vpop.f32.mrb[46].mxu1 }
 0x137   :  { %v5382_v34 = vpack.c.bf16 %v4586_v24, %v4585_v29  ;;  %v967_v36 = vpop.f32.mrb[47].mxu1 }
 0x138   :  { %v1265_v38 = vpack.c.bf16 %v967_v36, %v964_v31 }
 0x139   :  { %4708 = vmatmul.mubr.bf16.gmra.mrb[152].mxu1 %v1384_v33  ;;  %v1330_v5 = vmul.bf16 1009007652, %v5382_v34 }
 0x13a   :  { %4711 = vmatprep.mubr.bf16.mxu1 %v1385_v37  ;;  %v1329_v12 = vmul.bf16 1009007652, %v1265_v38 }
 0x13b   :  { %v1394_v28 = vmax.bf16 %v1330_v5, %v5382_v34 }
 0x13c   :  { %v4589_v39 = vpop.f32.mrb[48].mxu1  ;;  %v1393_v21 = vmax.bf16 %v1329_v12, %v1265_v38 }
 0x13d   :  { %v980_v44 = vpop.f32.mrb[49].mxu1 }
 0x13e   :  { %v4590_v46 = vpop.f32.mrb[50].mxu1 }
 0x13f   :  { %v5400_v49 = vpack.c.bf16 %v4590_v46, %v4589_v39  ;;  %v983_v50 = vpop.f32.mrb[51].mxu1 }
 0x140   :  { %v1267_v52 = vpack.c.bf16 %v983_v50, %v980_v44 }
 0x141   :  { %4712 = vmatmul.mubr.bf16.gmra.mrb[156].mxu1 %v1386_v47  ;;  %v1332_v19 = vmul.bf16 1009007652, %v5400_v49 }
 0x142   :  { %4715 = vmatprep.mubr.bf16.mxu1 %v1387_v35  ;;  %v1331_v23 = vmul.bf16 1009007652, %v1267_v52 }
 0x143   :  { %v1396_v38 = vmax.bf16 %v1332_v19, %v5400_v49 }
 0x144   :  { %v4593_v56 = vpop.f32.mrb[52].mxu1  ;;  %v1395_v31 = vmax.bf16 %v1331_v23, %v1267_v52 }
 0x145   :  { %v996_v57 = vpop.f32.mrb[53].mxu1 }
 0x146   :  { %v4594_v51 = vpop.f32.mrb[54].mxu1 }
 0x147   :  { %v1270_v61 = vpack.c.bf16 %v4594_v51, %v4593_v56  ;;  %v999_v62 = vpop.f32.mrb[55].mxu1 }
 0x148   :  { %v1269_v0 = vpack.c.bf16 %v999_v62, %v996_v57 }
 0x149   :  { %4716 = vmatmul.mubr.bf16.gmra.mrb[160].mxu1 %v1388_v60  ;;  %v1334_v34 = vmul.bf16 1009007652, %v1270_v61 }
 0x14a   :  { %4719 = vmatprep.mubr.bf16.mxu1 %v1389_v63  ;;  %v1333_v24 = vmul.bf16 1009007652, %v1269_v0 }
 0x14b   :  { %v1398_v46 = vmax.bf16 %v1334_v34, %v1270_v61 }
 0x14c   :  { %v4597_v3 = vpop.f32.mrb[56].mxu1  ;;  %v1397_v40 = vmax.bf16 %v1333_v24, %v1269_v0 }
 0x14d   :  { %v1012_v4 = vpop.f32.mrb[57].mxu1 }
 0x14e   :  { %v4598_v6 = vpop.f32.mrb[58].mxu1 }
 0x14f   :  { %v1272_v9 = vpack.c.bf16 %v4598_v6, %v4597_v3  ;;  %v1015_v10 = vpop.f32.mrb[59].mxu1 }
 0x150   :  { %v1271_v11 = vpack.c.bf16 %v1015_v10, %v1012_v4 }
 0x151   :  { %4720 = vmatmul.mubr.bf16.gmra.mrb[164].mxu1 %v1390_v7  ;;  %v1336_v53 = vmul.bf16 1009007652, %v1272_v9 }
 0x152   :  { %4723 = vmatprep.mubr.bf16.mxu1 %v1391_v58  ;;  %v1335_v39 = vmul.bf16 1009007652, %v1271_v11 }
 0x153   :  { %v1400_v56 = vmax.bf16 %v1336_v53, %v1272_v9 }
 0x154   :  { %v4601_v13 = vpop.f32.mrb[60].mxu1  ;;  %v1399_v35 = vmax.bf16 %v1335_v39, %v1271_v11 }
 0x155   :  { %v1028_v14 = vpop.f32.mrb[61].mxu1 }
 0x156   :  { %v4602_v15 = vpop.f32.mrb[62].mxu1 }
 0x157   :  { %v1274_v17 = vpack.c.bf16 %v4602_v15, %v4601_v13  ;;  %v1031_v18 = vpop.f32.mrb[63].mxu1 }
 0x158   :  { %v1273_v22 = vpack.c.bf16 %v1031_v18, %v1028_v14 }
 0x159   :  { %4724 = vmatmul.mubr.bf16.gmra.mrb[168].mxu1 %v1392_v16  ;;  %v1338_v63 = vmul.bf16 1009007652, %v1274_v17 }
 0x15a   :  { %4727 = vmatprep.mubr.bf16.mxu1 %v1393_v21  ;;  %v1337_v49 = vmul.bf16 1009007652, %v1273_v22 }
 0x15b   :  { %v1402_v3 = vmax.bf16 %v1338_v63, %v1274_v17 }
 0x15c   :  { %v4605_v25 = vpop.f32.mrb[64].mxu1  ;;  %v1401_v60 = vmax.bf16 %v1337_v49, %v1273_v22 }
 0x15d   :  { %v1044_v26 = vpop.f32.mrb[65].mxu1 }
 0x15e   :  { %v4606_v27 = vpop.f32.mrb[66].mxu1 }
 0x15f   :  { %v1276_v29 = vpack.c.bf16 %v4606_v27, %v4605_v25  ;;  %v1047_v30 = vpop.f32.mrb[67].mxu1 }
 0x160   :  { %v1275_v32 = vpack.c.bf16 %v1047_v30, %v1044_v26 }
 0x161   :  { %4728 = vmatmul.mubr.bf16.gmra.mrb[172].mxu1 %v1394_v28  ;;  %v1340_v58 = vmul.bf16 1009007652, %v1276_v29 }
 0x162   :  { %4731 = vmatprep.mubr.bf16.mxu1 %v1395_v31  ;;  %v1339_v61 = vmul.bf16 1009007652, %v1275_v32 }
 0x163   :  { %v1404_v13 = vmax.bf16 %v1340_v58, %v1276_v29 }
 0x164   :  { %v4609_v33 = vpop.f32.mrb[68].mxu1  ;;  %v1403_v7 = vmax.bf16 %v1339_v61, %v1275_v32 }
 0x165   :  { %v1060_v36 = vpop.f32.mrb[69].mxu1 }
 0x166   :  { %v4610_v37 = vpop.f32.mrb[70].mxu1 }
 0x167   :  { %v1278_v41 = vpack.c.bf16 %v4610_v37, %v4609_v33  ;;  %v1063_v42 = vpop.f32.mrb[71].mxu1 }
 0x168   :  { %v1277_v20 = vpack.c.bf16 %v1063_v42, %v1060_v36 }
 0x169   :  { %4732 = vmatmul.mubr.bf16.gmra.mrb[176].mxu1 %v1396_v38  ;;  %v1342_v21 = vmul.bf16 1009007652, %v1278_v41 }
 0x16a   :  { %4735 = vmatprep.mubr.bf16.mxu1 %v1397_v40  ;;  %v1341_v9 = vmul.bf16 1009007652, %v1277_v20 }
 0x16b   :  { %v1406_v25 = vmax.bf16 %v1342_v21, %v1278_v41 }
 0x16c   :  { %v4613_v43 = vpop.f32.mrb[72].mxu1  ;;  %v1405_v16 = vmax.bf16 %v1341_v9, %v1277_v20 }
 0x16d   :  { %v1076_v44 = vpop.f32.mrb[73].mxu1 }
 0x16e   :  { %v4614_v45 = vpop.f32.mrb[74].mxu1 }
 0x16f   :  { %v1280_v47 = vpack.c.bf16 %v4614_v45, %v4613_v43  ;;  %v1079_v50 = vpop.f32.mrb[75].mxu1 }
 0x170   :  { %v1279_v52 = vpack.c.bf16 %v1079_v50, %v1076_v44 }
 0x171   :  { %4736 = vmatmul.mubr.bf16.gmra.mrb[180].mxu1 %v1398_v46  ;;  %v1344_v31 = vmul.bf16 1009007652, %v1280_v47 }
 0x172   :  { %4739 = vmatprep.mubr.bf16.mxu1 %v1399_v35  ;;  %v1343_v17 = vmul.bf16 1009007652, %v1279_v52 }
 0x173   :  { %v1408_v33 = vmax.bf16 %v1344_v31, %v1280_v47 }
 0x174   :  { %v4617_v54 = vpop.f32.mrb[76].mxu1  ;;  %v1407_v28 = vmax.bf16 %v1343_v17, %v1279_v52 }
 0x175   :  { %v1092_v48 = vpop.f32.mrb[77].mxu1 }
 0x176   :  { %v4618_v55 = vpop.f32.mrb[78].mxu1 }
 0x177   :  { %v1282_v57 = vpack.c.bf16 %v4618_v55, %v4617_v54  ;;  %v1095_v51 = vpop.f32.mrb[79].mxu1 }
 0x178   :  { %v1281_v62 = vpack.c.bf16 %v1095_v51, %v1092_v48 }
 0x179   :  { %4740 = vmatmul.mubr.bf16.gmra.mrb[184].mxu1 %v1400_v56  ;;  %v1346_v40 = vmul.bf16 1009007652, %v1282_v57 }
 0x17a   :  { %4743 = vmatprep.mubr.bf16.mxu1 %v1401_v60  ;;  %v1345_v29 = vmul.bf16 1009007652, %v1281_v62 }
 0x17b   :  { %v1410_v43 = vmax.bf16 %v1346_v40, %v1282_v57 }
 0x17c   :  { %v4621_v0 = vpop.f32.mrb[80].mxu1  ;;  %v1409_v38 = vmax.bf16 %v1345_v29, %v1281_v62 }
 0x17d   :  { %v1108_v1 = vpop.f32.mrb[81].mxu1 }
 0x17e   :  { %v4622_v2 = vpop.f32.mrb[82].mxu1 }
 0x17f   :  { %v1284_v4 = vpack.c.bf16 %v4622_v2, %v4621_v0  ;;  %v1111_v6 = vpop.f32.mrb[83].mxu1 }
 0x180   :  { %v1283_v10 = vpack.c.bf16 %v1111_v6, %v1108_v1 }
 0x181   :  { %4744 = vmatmul.mubr.bf16.gmra.mrb[188].mxu1 %v1402_v3  ;;  %v1348_v35 = vmul.bf16 1009007652, %v1284_v4 }
 0x182   :  { %4747 = vmatprep.mubr.bf16.mxu1 %v1403_v7  ;;  %v1347_v41 = vmul.bf16 1009007652, %v1283_v10 }
 0x183   :  { %v1412_v54 = vmax.bf16 %v1348_v35, %v1284_v4 }
 0x184   :  { %v4625_v11 = vpop.f32.mrb[84].mxu1  ;;  %v1411_v46 = vmax.bf16 %v1347_v41, %v1283_v10 }
 0x185   :  { %v1124_v8 = vpop.f32.mrb[85].mxu1 }
 0x186   :  { %v4626_v12 = vpop.f32.mrb[86].mxu1 }
 0x187   :  { %v1286_v14 = vpack.c.bf16 %v4626_v12, %v4625_v11  ;;  %v1127_v15 = vpop.f32.mrb[87].mxu1 }
 0x188   :  { %v1285_v18 = vpack.c.bf16 %v1127_v15, %v1124_v8 }
 0x189   :  { %4748 = vmatmul.mubr.bf16.gmra.mrb[192].mxu1 %v1404_v13  ;;  %v1350_v57 = vmul.bf16 1009007652, %v1286_v14 }
 0x18a   :  { %4751 = vmatprep.mubr.bf16.mxu1 %v1405_v16  ;;  %v1349_v47 = vmul.bf16 1009007652, %v1285_v18 }
 0x18b   :  { %v1414_v0 = vmax.bf16 %v1350_v57, %v1286_v14 }
 0x18c   :  { %v4629_v22 = vpop.f32.mrb[88].mxu1  ;;  %v1413_v56 = vmax.bf16 %v1349_v47, %v1285_v18 }
 0x18d   :  { %v1140_v5 = vpop.f32.mrb[89].mxu1 }
 0x18e   :  { %v4630_v23 = vpop.f32.mrb[90].mxu1 }
 0x18f   :  { %v1288_v26 = vpack.c.bf16 %v4630_v23, %v4629_v22  ;;  %v1143_v27 = vpop.f32.mrb[91].mxu1 }
 0x190   :  { %v1287_v30 = vpack.c.bf16 %v1143_v27, %v1140_v5 }
 0x191   :  { %4752 = vmatmul.mubr.bf16.gmra.mrb[196].mxu1 %v1406_v25  ;;  %v1352_v4 = vmul.bf16 1009007652, %v1288_v26 }
 0x192   :  { %4755 = vmatprep.mubr.bf16.mxu1 %v1407_v28  ;;  %v1351_v60 = vmul.bf16 1009007652, %v1287_v30 }
 0x193   :  { %v1416_v11 = vmax.bf16 %v1352_v4, %v1288_v26 }
 0x194   :  { %v4633_v32 = vpop.f32.mrb[92].mxu1  ;;  %v1415_v3 = vmax.bf16 %v1351_v60, %v1287_v30 }
 0x195   :  { %v1156_v19 = vpop.f32.mrb[93].mxu1 }
 0x196   :  { %v4634_v24 = vpop.f32.mrb[94].mxu1 }
 0x197   :  { %v1290_v36 = vpack.c.bf16 %v4634_v24, %v4633_v32  ;;  %v1159_v37 = vpop.f32.mrb[95].mxu1 }
 0x198   :  { %v1289_v42 = vpack.c.bf16 %v1159_v37, %v1156_v19 }
 0x199   :  { %4756 = vmatmul.mubr.bf16.gmra.mrb[200].mxu1 %v1408_v33  ;;  %v1354_v14 = vmul.bf16 1009007652, %v1290_v36 }
 0x19a   :  { %4759 = vmatprep.mubr.bf16.mxu1 %v1409_v38  ;;  %v1353_v7 = vmul.bf16 1009007652, %v1289_v42 }
 0x19b   :  { %v1418_v22 = vmax.bf16 %v1354_v14, %v1290_v36 }
 0x19c   :  { %v4637_v20 = vpop.f32.mrb[96].mxu1  ;;  %v1417_v13 = vmax.bf16 %v1353_v7, %v1289_v42 }
 0x19d   :  { %v1172_v34 = vpop.f32.mrb[97].mxu1 }
 0x19e   :  { %v4638_v39 = vpop.f32.mrb[98].mxu1 }
 0x19f   :  { %v1292_v44 = vpack.c.bf16 %v4638_v39, %v4637_v20  ;;  %v1175_v45 = vpop.f32.mrb[99].mxu1 }
 0x1a0   :  { %v1291_v50 = vpack.c.bf16 %v1175_v45, %v1172_v34 }
 0x1a1   :  { %4760 = vmatmul.mubr.bf16.gmra.mrb[204].mxu1 %v1410_v43  ;;  %v1356_v26 = vmul.bf16 1009007652, %v1292_v44 }
 0x1a2   :  { %4763 = vmatprep.mubr.bf16.mxu1 %v1411_v46  ;;  %v1355_v16 = vmul.bf16 1009007652, %v1291_v50 }
 0x1a3   :  { %v1420_v24 = vmax.bf16 %v1356_v26, %v1292_v44 }
 0x1a4   :  { %v4641_v52 = vpop.f32.mrb[100].mxu1  ;;  %v1419_v25 = vmax.bf16 %v1355_v16, %v1291_v50 }
 0x1a5   :  { %v1188_v53 = vpop.f32.mrb[101].mxu1 }
 0x1a6   :  { %v4642_v49 = vpop.f32.mrb[102].mxu1 }
 0x1a7   :  { %v5424_v48 = vpack.c.bf16 %v4642_v49, %v4641_v52  ;;  %v1191_v55 = vpop.f32.mrb[103].mxu1 }
 0x1a8   :  { %v1293_v51 = vpack.c.bf16 %v1191_v55, %v1188_v53 }
 0x1a9   :  { %4764 = vmatmul.mubr.bf16.gmra.mrb[208].mxu1 %v1412_v54  ;;  %v1358_v40 = vmul.bf16 1009007652, %v5424_v48 }
 0x1aa   :  { %4767 = vmatprep.mubr.bf16.mxu1 %v1413_v56  ;;  %v1357_v30 = vmul.bf16 1009007652, %v1293_v51 }
 0x1ab   :  { %v1422_v45 = vmax.bf16 %v1358_v40, %v5424_v48 }
 0x1ac   :  { %v4645_v62 = vpop.f32.mrb[104].mxu1  ;;  %v1421_v36 = vmax.bf16 %v1357_v30, %v1293_v51 }
 0x1ad   :  { %v1204_v63 = vpop.f32.mrb[105].mxu1 }
 0x1ae   :  { %v4646_v61 = vpop.f32.mrb[106].mxu1 }
 0x1af   :  { %v5426_v1 = vpack.c.bf16 %v4646_v61, %v4645_v62  ;;  %v1207_v2 = vpop.f32.mrb[107].mxu1 }
 0x1b0   :  { %v1295_v6 = vpack.c.bf16 %v1207_v2, %v1204_v63 }
 0x1b1   :  { %4768 = vmatmul.mubr.bf16.gmra.mrb[212].mxu1 %v1414_v0  ;;  %v1360_v52 = vmul.bf16 1009007652, %v5426_v1 }
 0x1b2   :  { %4771 = vmatprep.mubr.bf16.mxu1 %v1415_v3  ;;  %v1359_v41 = vmul.bf16 1009007652, %v1295_v6 }
 0x1b3   :  { %v1424_v51 = vmax.bf16 %v1360_v52, %v5426_v1 }
 0x1b4   :  { %v4649_v10 = vpop.f32.mrb[108].mxu1  ;;  %v1423_v50 = vmax.bf16 %v1359_v41, %v1295_v6 }
 0x1b5   :  { %v1220_v58 = vpop.f32.mrb[109].mxu1 }
 0x1b6   :  { %v4650_v9 = vpop.f32.mrb[110].mxu1 }
 0x1b7   :  { %v5428_v8 = vpack.c.bf16 %v4650_v9, %v4649_v10  ;;  %v1223_v12 = vpop.f32.mrb[111].mxu1 }
 0x1b8   :  { %v1297_v15 = vpack.c.bf16 %v1223_v12, %v1220_v58 }
 0x1b9   :  { %4772 = vmatmul.mubr.bf16.gmra.mrb[216].mxu1 %v1416_v11  ;;  %v1362_v61 = vmul.bf16 1009007652, %v5428_v8 }
 0x1ba   :  { %4775 = vmatprep.mubr.bf16.mxu1 %v1417_v13  ;;  %v1361_v53 = vmul.bf16 1009007652, %v1297_v15 }
 0x1bb   :  { %v1426_v4 = vmax.bf16 %v1362_v61, %v5428_v8 }
 0x1bc   :  { %v4669_v18 = vpop.f32.mrb[112].mxu1  ;;  %v1425_v60 = vmax.bf16 %v1361_v53, %v1297_v15 }
 0x1bd   :  { %v1525_v21 = vpop.f32.mrb[113].mxu1 }
 0x1be   :  { %v4670_v17 = vpop.f32.mrb[114].mxu1 }
 0x1bf   :  { %v2037_v5 = vpack.c.bf16 %v4670_v17, %v4669_v18  ;;  %v1528_v23 = vpop.f32.mrb[115].mxu1 }
 0x1c0   :  { %v2036_v27 = vpack.c.bf16 %v1528_v23, %v1525_v21 }
 0x1c1   :  { %4776 = vmatmul.mubr.bf16.gmra.mrb[220].mxu1 %v1418_v22  ;;  %v2101_v38 = vmul.bf16 1009007652, %v2037_v5 }
 0x1c2   :  { %v2100_v28 = vmul.bf16 1009007652, %v2036_v27  ;;  %4779 = vmatprep.mubr.bf16.mxu1 %v1419_v25 }
 0x1c3   :  { %v2165_v20 = vmax.bf16 %v2101_v38, %v2037_v5 }
 0x1c4   :  { %v2164_v31 = vmax.bf16 %v2100_v28, %v2036_v27  ;;  %v4673_v29 = vpop.f32.mrb[116].mxu1 }
 0x1c5   :  { %v1541_v32 = vpop.f32.mrb[117].mxu1 }
 0x1c6   :  { %v4674_v19 = vpop.f32.mrb[118].mxu1  ;;  %2357 = vmatmul.mubr.bf16.vlgmr.msra.gmra.mrb[16].mxu0 %v2164_v31 }
 0x1c7   :  { %v2039_v33 = vpack.c.bf16 %v4674_v19, %v4673_v29  ;;  %v1544_v37 = vpop.f32.mrb[119].mxu1  ;;  %2366 = vmatprep.mubr.bf16.mxu0 %v4969_v59 }
 0x1c8   :  { %v2038_v42 = vpack.c.bf16 %v1544_v37, %v1541_v32 }
 0x1c9   :  { %4780 = vmatmul.mubr.bf16.gmra.mrb[224].mxu1 %v1420_v24  ;;  %v2103_v62 = vmul.bf16 1009007652, %v2039_v33 }
 0x1ca   :  { %4783 = vmatprep.mubr.bf16.mxu1 %v1421_v36  ;;  %v2102_v35 = vmul.bf16 1009007652, %v2038_v42 }
 0x1cb   :  { %v2167_v0 = vmax.bf16 %v2103_v62, %v2039_v33 }
 0x1cc   :  { %v4677_v34 = vpop.f32.mrb[120].mxu1  ;;  %v2166_v49 = vmax.bf16 %v2102_v35, %v2038_v42 }
 0x1cd   :  { %v1557_v39 = vpop.f32.mrb[121].mxu1 }
 0x1ce   :  { %2367 = vmatmul.mubr.bf16.gmra.mrb[20].mxu0 %v2165_v20  ;;  %v4678_v43 = vpop.f32.mrb[122].mxu1 }
 0x1cf   :  { %v2041_v44 = vpack.c.bf16 %v4678_v43, %v4677_v34  ;;  %v1560_v46 = vpop.f32.mrb[123].mxu1  ;;  %2376 = vmatprep.mubr.bf16.mxu0 %v4969_v59 }
 0x1d0   :  { %v2040_v47 = vpack.c.bf16 %v1560_v46, %v1557_v39 }
 0x1d1   :  { %4784 = vmatmul.mubr.bf16.gmra.mrb[228].mxu1 %v1422_v45  ;;  %v2105_v16 = vmul.bf16 1009007652, %v2041_v44 }
 0x1d2   :  { %4787 = vmatprep.mubr.bf16.mxu1 %v1423_v50  ;;  %v2104_v10 = vmul.bf16 1009007652, %v2040_v47 }
 0x1d3   :  { %v2169_v8 = vmax.bf16 %v2105_v16, %v2041_v44 }
 0x1d4   :  { %v4681_v54 = vpop.f32.mrb[124].mxu1  ;;  %v2168_v9 = vmax.bf16 %v2104_v10, %v2040_v47 }
 0x1d5   :  { %v1573_v55 = vpop.f32.mrb[125].mxu1 }
 0x1d6   :  { %2377 = vmatmul.mubr.bf16.gmra.mrb[24].mxu0 %v2166_v49  ;;  %v4682_v56 = vpop.f32.mrb[126].mxu1 }
 0x1d7   :  { %v2043_v48 = vpack.c.bf16 %v4682_v56, %v4681_v54  ;;  %v1576_v57 = vpop.f32.mrb[127].mxu1  ;;  %2386 = vmatprep.mubr.bf16.mxu0 %v4969_v59 }
 0x1d8   :  { %v2042_v63 = vpack.c.bf16 %v1576_v57, %v1573_v55 }
 0x1d9   :  { %4788 = vmatmul.mubr.bf16.gmra.mrb[232].mxu1 %v1424_v51  ;;  %v2107_v19 = vmul.bf16 1009007652, %v2043_v48 }
 0x1da   :  { %4791 = vmatprep.mubr.bf16.mxu1 %v1425_v60  ;;  %v2106_v25 = vmul.bf16 1009007652, %v2042_v63 }
 0x1db   :  { %v2171_v33 = vmax.bf16 %v2107_v19, %v2043_v48 }
 0x1dc   :  { %v4685_v2 = vpop.f32.mrb[128].mxu1  ;;  %v2170_v28 = vmax.bf16 %v2106_v25, %v2042_v63 }
 0x1dd   :  { %v1589_v3 = vpop.f32.mrb[129].mxu1 }
 0x1de   :  { %v4686_v6 = vpop.f32.mrb[130].mxu1  ;;  %2387 = vmatmul.mubr.bf16.gmra.mrb[28].mxu0 %v2167_v0 }
 0x1df   :  { %v2045_v7 = vpack.c.bf16 %v4686_v6, %v4685_v2  ;;  %v1592_v1 = vpop.f32.mrb[131].mxu1  ;;  %2396 = vmatprep.mubr.bf16.mxu0 %v4969_v59 }
 0x1e0   :  { %v2044_v58 = vpack.c.bf16 %v1592_v1, %v1589_v3 }
 0x1e1   :  { %4792 = vmatmul.mubr.bf16.gmra.mrb[236].mxu1 %v1426_v4  ;;  %v2109_v50 = vmul.bf16 1009007652, %v2045_v7 }
 0x1e2   :  { %v2108_v41 = vmul.bf16 1009007652, %v2044_v58 }
 0x1e3   :  { %v2173_v47 = vmax.bf16 %v2109_v50, %v2045_v7 }
 0x1e4   :  { %v4689_v11 = vpop.f32.mrb[132].mxu1  ;;  %v2172_v34 = vmax.bf16 %v2108_v41, %v2044_v58 }
 0x1e5   :  { %v1605_v12 = vpop.f32.mrb[133].mxu1 }
 0x1e6   :  { %v4690_v13 = vpop.f32.mrb[134].mxu1  ;;  %2397 = vmatmul.mubr.bf16.gmra.mrb[32].mxu0 %v2168_v9 }
 0x1e7   :  { %v5440_v15 = vpack.c.bf16 %v4690_v13, %v4689_v11  ;;  %v1608_v14 = vpop.f32.mrb[135].mxu1  ;;  %2406 = vmatprep.mubr.bf16.mxu0 %v4969_v59 }
 0x1e8   :  { %v2046_v18 = vpack.c.bf16 %v1608_v14, %v1605_v12 }
 0x1e9   :  { %v2111_v0 = vmul.bf16 1009007652, %v5440_v15 }
 0x1ea   :  { %v2110_v56 = vmul.bf16 1009007652, %v2046_v18 }
 0x1eb   :  { %v2175_v3 = vmax.bf16 %v2111_v0, %v5440_v15 }
 0x1ec   :  { %v4693_v21 = vpop.f32.mrb[136].mxu1  ;;  %v2174_v48 = vmax.bf16 %v2110_v56, %v2046_v18 }
 0x1ed   :  { %v1621_v17 = vpop.f32.mrb[137].mxu1 }
 0x1ee   :  { %v4694_v22 = vpop.f32.mrb[138].mxu1  ;;  %2407 = vmatmul.mubr.bf16.gmra.mrb[36].mxu0 %v2169_v8 }
 0x1ef   :  { %v5443_v5 = vpack.c.bf16 %v4694_v22, %v4693_v21  ;;  %v1624_v23 = vpop.f32.mrb[139].mxu1  ;;  %2416 = vmatprep.mubr.bf16.mxu0 %v4969_v59 }
 0x1f0   :  { %v2048_v27 = vpack.c.bf16 %v1624_v23, %v1621_v17 }
 0x1f1   :  { %v2113_v18 = vmul.bf16 1009007652, %v5443_v5 }
 0x1f2   :  { %v2112_v58 = vmul.bf16 1009007652, %v2048_v27 }
 0x1f3   :  { %v2177_v21 = vmax.bf16 %v2113_v18, %v5443_v5 }
 0x1f4   :  { %v4697_v26 = vpop.f32.mrb[140].mxu1  ;;  %v2176_v11 = vmax.bf16 %v2112_v58, %v2048_v27 }
 0x1f5   :  { %v1637_v30 = vpop.f32.mrb[141].mxu1 }
 0x1f6   :  { %v4698_v31 = vpop.f32.mrb[142].mxu1  ;;  %2417 = vmatmul.mubr.bf16.gmra.mrb[40].mxu0 %v2170_v28 }
 0x1f7   :  { %v5446_v29 = vpack.c.bf16 %v4698_v31, %v4697_v26  ;;  %v1640_v32 = vpop.f32.mrb[143].mxu1  ;;  %2426 = vmatprep.mubr.bf16.mxu0 %v4969_v59 }
 0x1f8   :  { %v5449_v24 = vpack.c.bf16 %v1640_v32, %v1637_v30 }
 0x1fa   :  { %v2114_v28 = vmul.bf16 1009007652, %v5449_v24 }
 0x1fc   :  { %v4701_v37 = vpop.f32.mrb[144].mxu1  ;;  %v2178_v30 = vmax.bf16 %v2114_v28, %v5449_v24 }
 0x1fd   :  { %v1653_v36 = vpop.f32.mrb[145].mxu1 }
 0x1fe   :  { %v4702_v38 = vpop.f32.mrb[146].mxu1  ;;  %2427 = vmatmul.mubr.bf16.gmra.mrb[44].mxu0 %v2171_v33 }
 0x1ff   :  { %v5451_v42 = vpack.c.bf16 %v4702_v38, %v4701_v37  ;;  %v1656_v40 = vpop.f32.mrb[147].mxu1  ;;  %2436 = vmatprep.mubr.bf16.mxu0 %v4969_v59  ;;  %v2115_v37 = vmul.bf16 1009007652, %v5446_v29 }
 0x200   :  { %v5454_v20 = vpack.c.bf16 %v1656_v40, %v1653_v36 }
 0x201   :  { %v2179_v38 = vmax.bf16 %v2115_v37, %v5446_v29 }
 0x204   :  { %v4705_v39 = vpop.f32.mrb[148].mxu1 }
 0x205   :  { %v1669_v43 = vpop.f32.mrb[149].mxu1 }
 0x206   :  { %v4706_v45 = vpop.f32.mrb[150].mxu1  ;;  %2437 = vmatmul.mubr.bf16.gmra.mrb[48].mxu0 %v2172_v34 }
 0x207   :  { %v5456_v44 = vpack.c.bf16 %v4706_v45, %v4705_v39  ;;  %v1672_v46 = vpop.f32.mrb[151].mxu1  ;;  %2446 = vmatprep.mubr.bf16.mxu0 %v4969_v59 }
 0x208   :  { %v5459_v35 = vpack.c.bf16 %v1672_v46, %v1669_v43  ;;  %v2116_v43 = vmul.bf16 1009007652, %v5454_v20 }
 0x209   :  { %v2119_v58 = vmul.bf16 1009007652, %v5456_v44 }
 0x20a   :  { %v2180_v46 = vmax.bf16 %v2116_v43, %v5454_v20 }
 0x20c   :  { %v4709_v52 = vpop.f32.mrb[152].mxu1 }
 0x20d   :  { %v1685_v53 = vpop.f32.mrb[153].mxu1 }
 0x20e   :  { %v4710_v49 = vpop.f32.mrb[154].mxu1  ;;  %2447 = vmatmul.mubr.bf16.gmra.mrb[52].mxu0 %v2173_v47 }
 0x20f   :  { %v5461_v54 = vpack.c.bf16 %v4710_v49, %v4709_v52  ;;  %v1688_v55 = vpop.f32.mrb[155].mxu1  ;;  %2456 = vmatprep.mubr.bf16.mxu0 %v4969_v59  ;;  %v2117_v49 = vmul.bf16 1009007652, %v5451_v42 }
 0x210   :  { %v5464_v51 = vpack.c.bf16 %v1688_v55, %v1685_v53 }
 0x211   :  { %v2181_v56 = vmax.bf16 %v2117_v49, %v5451_v42 }
 0x214   :  { %v4713_v57 = vpop.f32.mrb[156].mxu1 }
 0x215   :  { %v1701_v60 = vpop.f32.mrb[157].mxu1 }
 0x216   :  { %v4714_v62 = vpop.f32.mrb[158].mxu1  ;;  %2457 = vmatmul.mubr.bf16.gmra.mrb[56].mxu0 %v2174_v48 }
 0x217   :  { %v5466_v63 = vpack.c.bf16 %v4714_v62, %v4713_v57  ;;  %v1704_v61 = vpop.f32.mrb[159].mxu1  ;;  %2466 = vmatprep.mubr.bf16.mxu0 %v4969_v59 }
 0x218   :  { %v5470_v2 = vpack.c.bf16 %v1704_v61, %v1701_v60  ;;  %v2118_v61 = vmul.bf16 1009007652, %v5459_v35 }
 0x21c   :  { %v4717_v6 = vpop.f32.mrb[160].mxu1 }
 0x21d   :  { %v1717_v4 = vpop.f32.mrb[161].mxu1 }
 0x21e   :  { %v4718_v7 = vpop.f32.mrb[162].mxu1  ;;  %2467 = vmatmul.mubr.bf16.gmra.mrb[60].mxu0 %v2175_v3  ;;  %v2182_v3 = vmax.bf16 %v2118_v61, %v5459_v35 }
 0x21f   :  { %v5473_v1 = vpack.c.bf16 %v4718_v7, %v4717_v6  ;;  %v1720_v10 = vpop.f32.mrb[163].mxu1  ;;  %2476 = vmatprep.mubr.bf16.mxu0 %v4969_v59 }
 0x220   :  { %v5476_v9 = vpack.c.bf16 %v1720_v10, %v1717_v4 }
 0x224   :  { %v4721_v12 = vpop.f32.mrb[164].mxu1 }
 0x225   :  { %v1733_v13 = vpop.f32.mrb[165].mxu1 }
 0x226   :  { %v4722_v14 = vpop.f32.mrb[166].mxu1  ;;  %2477 = vmatmul.mubr.bf16.gmra.mrb[64].mxu0 %v2176_v11 }
 0x227   :  { %v5478_v16 = vpack.c.bf16 %v4722_v14, %v4721_v12  ;;  %v1736_v15 = vpop.f32.mrb[167].mxu1  ;;  %2486 = vmatprep.mubr.bf16.mxu0 %v4969_v59  ;;  %v2183_v12 = vmax.bf16 %v2119_v58, %v5456_v44  ;;  %v2125_v58 = vmul.bf16 1009007652, %v5473_v1 }
 0x228   :  { %v5482_v8 = vpack.c.bf16 %v1736_v15, %v1733_v13 }
 0x22c   :  { %v4725_v17 = vpop.f32.mrb[168].mxu1 }
 0x22d   :  { %v1749_v22 = vpop.f32.mrb[169].mxu1 }
 0x22e   :  { %v4726_v23 = vpop.f32.mrb[170].mxu1  ;;  %2487 = vmatmul.mubr.bf16.gmra.mrb[68].mxu0 %v2177_v21  ;;  %v2120_v21 = vmul.bf16 1009007652, %v5464_v51 }
 0x22f   :  { %v5485_v25 = vpack.c.bf16 %v4726_v23, %v4725_v17  ;;  %v1752_v27 = vpop.f32.mrb[171].mxu1  ;;  %2496 = vmatprep.mubr.bf16.mxu0 %v4969_v59 }
 0x230   :  { %v5489_v26 = vpack.c.bf16 %v1752_v27, %v1749_v22  ;;  %v2184_v22 = vmax.bf16 %v2120_v21, %v5464_v51 }
 0x234   :  { %v4729_v31 = vpop.f32.mrb[172].mxu1 }
 0x235   :  { %v1765_v32 = vpop.f32.mrb[173].mxu1 }
 0x236   :  { %v4730_v19 = vpop.f32.mrb[174].mxu1  ;;  %2497 = vmatmul.mubr.bf16.gmra.mrb[72].mxu0 %v2178_v30 }
 0x237   :  { %v5492_v5 = vpack.c.bf16 %v4730_v19, %v4729_v31  ;;  %v1768_v33 = vpop.f32.mrb[175].mxu1  ;;  %2506 = vmatprep.mubr.bf16.mxu0 %v4969_v59  ;;  %v2121_v31 = vmul.bf16 1009007652, %v5461_v54 }
 0x238   :  { %v5496_v36 = vpack.c.bf16 %v1768_v33, %v1765_v32 }
 0x239   :  { %v2185_v19 = vmax.bf16 %v2121_v31, %v5461_v54  ;;  %v2126_v31 = vmul.bf16 1009007652, %v5482_v8 }
 0x23c   :  { %v4733_v40 = vpop.f32.mrb[176].mxu1 }
 0x23d   :  { %v1781_v41 = vpop.f32.mrb[177].mxu1 }
 0x23e   :  { %v4734_v34 = vpop.f32.mrb[178].mxu1  ;;  %2507 = vmatmul.mubr.bf16.gmra.mrb[76].mxu0 %v2179_v38 }
 0x23f   :  { %v5499_v24 = vpack.c.bf16 %v4734_v34, %v4733_v40  ;;  %v1784_v39 = vpop.f32.mrb[179].mxu1  ;;  %2516 = vmatprep.mubr.bf16.mxu0 %v4969_v59 }
 0x240   :  { %v5503_v45 = vpack.c.bf16 %v1784_v39, %v1781_v41  ;;  %v2122_v41 = vmul.bf16 1009007652, %v5470_v2 }
 0x242   :  { %v2186_v39 = vmax.bf16 %v2122_v41, %v5470_v2 }
 0x244   :  { %v4737_v50 = vpop.f32.mrb[180].mxu1 }
 0x245   :  { %v1797_v47 = vpop.f32.mrb[181].mxu1 }
 0x246   :  { %v4738_v52 = vpop.f32.mrb[182].mxu1  ;;  %2517 = vmatmul.mubr.bf16.gmra.mrb[80].mxu0 %v2180_v46 }
 0x247   :  { %v5506_v29 = vpack.c.bf16 %v4738_v52, %v4737_v50  ;;  %v1800_v53 = vpop.f32.mrb[183].mxu1  ;;  %2526 = vmatprep.mubr.bf16.mxu0 %v4969_v59  ;;  %v2123_v52 = vmul.bf16 1009007652, %v5466_v63 }
 0x248   :  { %v5510_v55 = vpack.c.bf16 %v1800_v53, %v1797_v47 }
 0x249   :  { %v2187_v49 = vmax.bf16 %v2123_v52, %v5466_v63  ;;  %v2127_v52 = vmul.bf16 1009007652, %v5478_v16 }
 0x24c   :  { %v4741_v48 = vpop.f32.mrb[184].mxu1 }
 0x24d   :  { %v1813_v57 = vpop.f32.mrb[185].mxu1 }
 0x24e   :  { %v4742_v60 = vpop.f32.mrb[186].mxu1  ;;  %2527 = vmatmul.mubr.bf16.gmra.mrb[84].mxu0 %v2181_v56 }
 0x24f   :  { %v5513_v20 = vpack.c.bf16 %v4742_v60, %v4741_v48  ;;  %v1816_v62 = vpop.f32.mrb[187].mxu1  ;;  %2536 = vmatprep.mubr.bf16.mxu0 %v4969_v59 }
 0x250   :  { %v5517_v0 = vpack.c.bf16 %v1816_v62, %v1813_v57  ;;  %v2124_v62 = vmul.bf16 1009007652, %v5476_v9 }
 0x254   :  { %v4745_v6 = vpop.f32.mrb[188].mxu1 }
 0x255   :  { %v1829_v4 = vpop.f32.mrb[189].mxu1 }
 0x256   :  { %v4746_v7 = vpop.f32.mrb[190].mxu1  ;;  %2537 = vmatmul.mubr.bf16.gmra.mrb[88].mxu0 %v2182_v3  ;;  %v2188_v3 = vmax.bf16 %v2124_v62, %v5476_v9 }
 0x257   :  { %v5520_v42 = vpack.c.bf16 %v4746_v7, %v4745_v6  ;;  %v1832_v10 = vpop.f32.mrb[191].mxu1  ;;  %2546 = vmatprep.mubr.bf16.mxu0 %v4969_v59 }
 0x258   :  { %v5524_v11 = vpack.c.bf16 %v1832_v10, %v1829_v4 }
 0x25c   :  { %v4749_v13 = vpop.f32.mrb[192].mxu1 }
 0x25d   :  { %v1845_v14 = vpop.f32.mrb[193].mxu1 }
 0x25e   :  { %v4750_v15 = vpop.f32.mrb[194].mxu1  ;;  %2547 = vmatmul.mubr.bf16.gmra.mrb[92].mxu0 %v2183_v12 }
 0x25f   :  { %v5527_v35 = vpack.c.bf16 %v4750_v15, %v4749_v13  ;;  %v1848_v18 = vpop.f32.mrb[195].mxu1  ;;  %2556 = vmatprep.mubr.bf16.mxu0 %v4969_v59  ;;  %v4970_v13 = vmov 1966171168   ;;  %v3138_v15 = vlaneseq }
 0x260   :  { %v5531_v17 = vpack.c.bf16 %v1848_v18, %v1845_v14  ;;  %v3136_v14 = vunpack.c.l.s4 %v4970_v13  ;;  %v2189_v18 = vmax.bf16 %v2125_v58, %v5473_v1 }
 0x264   :  { %v4753_v23 = vpop.f32.mrb[196].mxu1 }
 0x265   :  { %v1861_v27 = vpop.f32.mrb[197].mxu1 }
 0x266   :  { %v4754_v28 = vpop.f32.mrb[198].mxu1  ;;  %2557 = vmatmul.mubr.bf16.gmra.mrb[96].mxu0 %v2184_v22 }
 0x267   :  { %v5534_v44 = vpack.c.bf16 %v4754_v28, %v4753_v23  ;;  %v1864_v30 = vpop.f32.mrb[199].mxu1  ;;  %2566 = vmatprep.mubr.bf16.mxu0 %v4969_v59  ;;  %v3137_v23 = vunpack.c.0.s8 %v3136_v14 }
 0x268   :  { %v5538_v32 = vpack.c.bf16 %v1864_v30, %v1861_v27  ;;  %v3139_v27 = vshrl.u32 %v3138_v15, 7 }
 0x26a   :  { %v3140_v1 = vsub.s32 %v3137_v23, %v3139_v27 }
 0x26c   :  { %v4757_v33 = vpop.f32.mrb[200].mxu1 }
 0x26d   :  { %v1877_v37 = vpop.f32.mrb[201].mxu1 }
 0x26e   :  { %v4758_v38 = vpop.f32.mrb[202].mxu1  ;;  %2567 = vmatmul.mubr.bf16.gmra.mrb[100].mxu0 %v2185_v19 }
 0x26f   :  { %v5541_v51 = vpack.c.bf16 %v4758_v38, %v4757_v33  ;;  %v1880_v40 = vpop.f32.mrb[203].mxu1  ;;  %2576 = vmatprep.mubr.bf16.mxu0 %v4969_v59  ;;  %v4327_v33 = vld.sshfl [vmem:[%s5994_s5] sm:$0x11 pattern:$0x75316420]  ;;  %v2190_v38 = vmax.bf16 %v2126_v31, %v5482_v8 }
 0x270   :  { %v5545_v34 = vpack.c.bf16 %v1880_v40, %v1877_v37  ;;  %v3134_v37 = vcombine.high %v4327_v33, %v4327_v33 }
 0x274   :  { %v4761_v43 = vpop.f32.mrb[204].mxu1 }
 0x275   :  { %v1893_v46 = vpop.f32.mrb[205].mxu1 }
 0x276   :  { %v4762_v50 = vpop.f32.mrb[206].mxu1  ;;  %2577 = vmatmul.mubr.bf16.gmra.mrb[104].mxu0 %v2186_v39 }
 0x277   :  { %v5548_v54 = vpack.c.bf16 %v4762_v50, %v4761_v43  ;;  %v1896_v47 = vpop.f32.mrb[207].mxu1  ;;  %2586 = vmatprep.mubr.bf16.mxu0 %v4969_v59  ;;  %v3141_v43 = vrot.slane %v4327_v33, %v3140_v1 }
 0x278   :  { %v5552_v53 = vpack.c.bf16 %v1896_v47, %v1893_v46  ;;  %v3148_v47 = vrot.slane %v3134_v37, %v3140_v1 }
 0x27a   :  { %v3157_v62 = vpack.i.b16 %v3148_v47, %v3148_v47 }
 0x27c   :  { %v4765_v56 = vpop.f32.mrb[208].mxu1 }
 0x27d   :  { %v1909_v48 = vpop.f32.mrb[209].mxu1 }
 0x27e   :  { %v4766_v57 = vpop.f32.mrb[210].mxu1  ;;  %2587 = vmatmul.mubr.bf16.gmra.mrb[108].mxu0 %v2187_v49 }
 0x27f   :  { %v5555_v2 = vpack.c.bf16 %v4766_v57, %v4765_v56  ;;  %v1912_v60 = vpop.f32.mrb[211].mxu1  ;;  %2596 = vmatprep.mubr.bf16.mxu0 %v4969_v59  ;;  %v3150_v57 = vpack.i.b16 %v3141_v43, %v3141_v43 }
 0x280   :  { %v5559_v61 = vpack.c.bf16 %v1912_v60, %v1909_v48  ;;  %v3154_v60 = vsub.s32 0, %v3139_v27 }
 0x282   :  { %v5586_v13 = vrot.slane %v3150_v57, %v3154_v60  ;;  %v5588_v15 = vrot.slane %v3157_v62, %v3154_v60 }
 0x284   :  { %v4769_v6 = vpop.f32.mrb[212].mxu1 }
 0x285   :  { %v1925_v4 = vpop.f32.mrb[213].mxu1 }
 0x286   :  { %v4770_v7 = vpop.f32.mrb[214].mxu1  ;;  %2597 = vmatmul.mubr.bf16.gmra.mrb[112].mxu0 %v2188_v3  ;;  %v2191_v3 = vmax.bf16 %v2127_v52, %v5478_v16 }
 0x287   :  { %v5562_v63 = vpack.c.bf16 %v4770_v7, %v4769_v6  ;;  %v1928_v10 = vpop.f32.mrb[215].mxu1  ;;  %2606 = vmatprep.mubr.bf16.mxu0 %v4969_v59 }
 0x288   :  { %v5566_v12 = vpack.c.bf16 %v1928_v10, %v1925_v4 }
 0x28c   :  { %v4773_v21 = vpop.f32.mrb[216].mxu1 }
 0x28d   :  { %v1941_v9 = vpop.f32.mrb[217].mxu1 }
 0x28e   :  { %v4774_v22 = vpop.f32.mrb[218].mxu1  ;;  %2607 = vmatmul.mubr.bf16.gmra.mrb[116].mxu0 %v2189_v18 }
 0x28f   :  { %v5569_v28 = vpack.c.bf16 %v4774_v22, %v4773_v21  ;;  %v1944_v30 = vpop.f32.mrb[219].mxu1  ;;  %2616 = vmatprep.mubr.bf16.mxu0 %v4969_v59 }
 0x290   :  { %v5573_v19 = vpack.c.bf16 %v1944_v30, %v1941_v9  ;;  %v2128_v9 = vmul.bf16 1009007652, %v5489_v26 }
 0x292   :  { %v2192_v33 = vmax.bf16 %v2128_v9, %v5489_v26  ;;  %v2129_v26 = vmul.bf16 1009007652, %v5485_v25 }
 0x294   :  { %v4777_v40 = vpop.f32.mrb[220].mxu1 }
 0x295   :  { %v1957_v41 = vpop.f32.mrb[221].mxu1 }
 0x296   :  { %v4778_v39 = vpop.f32.mrb[222].mxu1  ;;  %2617 = vmatmul.mubr.bf16.gmra.mrb[120].mxu0 %v2190_v38 }
 0x297   :  { %v5579_v46 = vpack.c.bf16 %v4778_v39, %v4777_v40  ;;  %v1960_v50 = vpop.f32.mrb[223].mxu1  ;;  %2626 = vmatprep.mubr.bf16.mxu0 %v4969_v59 }
 0x298   :  { %v5583_v49 = vpack.c.bf16 %v1960_v50, %v1957_v41 }
 0x299   :  { %v2358_v56 = vpop.f32.mrb[16].mxu0 }
 0x29a   :  { %v2360_v48 = vpop.f32.mrb[17].mxu0 }
 0x29b   :  { %v2362_v8 = vpop.f32.mrb[18].mxu0 }
 0x29c   :  { %v2997_v6 = vpack.c.bf16 %v2362_v8, %v2358_v56  ;;  %v4781_v4 = vpop.f32.mrb[224].mxu1  ;;  %v2364_v7 = vpop.f32.mrb[19].mxu0 }
 0x29d   :  { %v2998_v10 = vpack.c.bf16 %v2364_v7, %v2360_v48  ;;  %v1973_v58 = vpop.f32.mrb[225].mxu1 }
 0x29e   :  { %v4782_v14 = vpop.f32.mrb[226].mxu1  ;;  %2627 = vmatmul.mubr.bf16.gmra.mrb[124].mxu0 %v2191_v3  ;;  %v3163_v23 = vadd.bf16 %v5586_v13, %v2997_v6 }
 0x29f   :  { %v5590_v18 = vpack.c.bf16 %v4782_v14, %v4781_v4  ;;  %v1976_v21 = vpop.f32.mrb[227].mxu1  ;;  %2636 = vmatprep.mubr.bf16.mxu0 %v4969_v59  ;;  %v3164_v30 = vadd.bf16 %v5588_v15, %v2998_v10  ;;  %v2193_v14 = vmax.bf16 %v2129_v26, %v5485_v25  ;;  %v2130_v25 = vmul.bf16 1009007652, %v5496_v36 }
 0x2a0   :  { %v5594_v22 = vpack.c.bf16 %v1976_v21, %v1973_v58  ;;  %v3291_v39 = vmul.bf16 1009007652, %v3163_v23 }
 0x2a1   :  { %v2368_v16 = vpop.f32.mrb[20].mxu0  ;;  %v3292_v47 = vmul.bf16 1009007652, %v3164_v30 }
 0x2a2   :  { %v2370_v27 = vpop.f32.mrb[21].mxu0  ;;  %v3419_v3 = vmax.bf16 %v3291_v39, %v3163_v23 }
 0x2a3   :  { %v2372_v31 = vpop.f32.mrb[22].mxu0  ;;  %v3420_v7 = vmax.bf16 %v3292_v47, %v3164_v30 }
 0x2a4   :  { %v2999_v1 = vpack.c.bf16 %v2372_v31, %v2368_v16  ;;  %v4785_v37 = vpop.f32.mrb[228].mxu1  ;;  %v2374_v38 = vpop.f32.mrb[23].mxu0 }
 0x2a5   :  { %v3000_v40 = vpack.c.bf16 %v2374_v38, %v2370_v27  ;;  %v1989_v41 = vpop.f32.mrb[229].mxu1 }
 0x2a6   :  { %v3165_v43 = vadd.bf16 %v5586_v13, %v2999_v1  ;;  %v4786_v50 = vpop.f32.mrb[230].mxu1  ;;  %2637 = vmatmul.mubr.bf16.gmra.mrb[128].mxu0 %v2192_v33 }
 0x2a7   :  { %v3166_v52 = vadd.bf16 %v5588_v15, %v3000_v40  ;;  %v5601_v56 = vpack.c.bf16 %v4786_v50, %v4785_v37  ;;  %v1992_v48 = vpop.f32.mrb[231].mxu1  ;;  %2646 = vmatprep.mubr.bf16.mxu0 %v4969_v59 }
 0x2a8   :  { %v3293_v57 = vmul.bf16 1009007652, %v3165_v43  ;;  %v5605_v60 = vpack.c.bf16 %v1992_v48, %v1989_v41 }
 0x2a9   :  { %v3294_v8 = vmul.bf16 1009007652, %v3166_v52  ;;  %v2378_v62 = vpop.f32.mrb[24].mxu0 }
 0x2aa   :  { %v3421_v6 = vmax.bf16 %v3293_v57, %v3165_v43  ;;  %v2380_v4 = vpop.f32.mrb[25].mxu0  ;;  %v2194_v57 = vmax.bf16 %v2130_v25, %v5496_v36  ;;  %v2131_v36 = vmul.bf16 1009007652, %v5492_v5 }
 0x2ab   :  { %v3422_v10 = vmax.bf16 %v3294_v8, %v3166_v52  ;;  %v2382_v58 = vpop.f32.mrb[26].mxu0 }
 0x2ac   :  { %v3547_v21 = vmax.bf16 %v3421_v6, %v3419_v3  ;;  %v3001_v9 = vpack.c.bf16 %v2382_v58, %v2378_v62  ;;  %v4789_v16 = vpop.f32.mrb[232].mxu1  ;;  %v2384_v27 = vpop.f32.mrb[27].mxu0  ;;  %v2195_v25 = vmax.bf16 %v2131_v36, %v5492_v5 }
 0x2ad   :  { %v3564_v31 = vmax.bf16 %v3422_v10, %v3420_v7  ;;  %v3002_v33 = vpack.c.bf16 %v2384_v27, %v2380_v4  ;;  %v2005_v1 = vpop.f32.mrb[233].mxu1 }
 0x2ae   :  { %v3167_v37 = vadd.bf16 %v5586_v13, %v3001_v9  ;;  %v4790_v38 = vpop.f32.mrb[234].mxu1  ;;  %2647 = vmatmul.mubr.bf16.gmra.mrb[132].mxu0 %v2193_v14 }
 0x2af   :  { %v3168_v23 = vadd.bf16 %v5588_v15, %v3002_v33  ;;  %v5610_v40 = vpack.c.bf16 %v4790_v38, %v4789_v16  ;;  %v2008_v30 = vpop.f32.mrb[235].mxu1  ;;  %2656 = vmatprep.mubr.bf16.mxu0 %v4969_v59 }
 0x2b0   :  { %v3295_v41 = vmul.bf16 1009007652, %v3167_v37  ;;  %v5614_v39 = vpack.c.bf16 %v2008_v30, %v2005_v1 }
 0x2b1   :  { %v3296_v43 = vmul.bf16 1009007652, %v3168_v23  ;;  %v2388_v50 = vpop.f32.mrb[28].mxu0 }
 0x2b2   :  { %v3423_v47 = vmax.bf16 %v3295_v41, %v3167_v37  ;;  %v2390_v52 = vpop.f32.mrb[29].mxu0 }
 0x2b3   :  { %v3424_v48 = vmax.bf16 %v3296_v43, %v3168_v23  ;;  %v2392_v26 = vpop.f32.mrb[30].mxu0 }
 0x2b4   :  { %v3548_v8 = vmax.bf16 %v3547_v21, %v3423_v47  ;;  %v3003_v62 = vpack.c.bf16 %v2392_v26, %v2388_v50  ;;  %v4793_v3 = vpop.f32.mrb[236].mxu1  ;;  %v2394_v6 = vpop.f32.mrb[31].mxu0 }
 0x2b5   :  { %v3565_v4 = vmax.bf16 %v3564_v31, %v3424_v48  ;;  %v3004_v7 = vpack.c.bf16 %v2394_v6, %v2390_v52  ;;  %v2021_v10 = vpop.f32.mrb[237].mxu1 }
 0x2b6   :  { %v3169_v58 = vadd.bf16 %v5586_v13, %v3003_v62  ;;  %v4794_v14 = vpop.f32.mrb[238].mxu1  ;;  %2657 = vmatmul.mubr.bf16.gmra.mrb[136].mxu0 %v2194_v57  ;;  %v2132_v57 = vmul.bf16 1009007652, %v5503_v45 }
 0x2b7   :  { %v3170_v9 = vadd.bf16 %v5588_v15, %v3004_v7  ;;  %v5619_v16 = vpack.c.bf16 %v4794_v14, %v4793_v3  ;;  %v2024_v27 = vpop.f32.mrb[239].mxu1  ;;  %2666 = vmatprep.mubr.bf16.mxu0 %v4969_v59 }
 0x2b8   :  { %v3297_v21 = vmul.bf16 1009007652, %v3169_v58  ;;  %v5623_v33 = vpack.c.bf16 %v2024_v27, %v2021_v10 }
 0x2b9   :  { %v3298_v1 = vmul.bf16 1009007652, %v3170_v9  ;;  %v2398_v31 = vpop.f32.mrb[32].mxu0 }
 0x2ba   :  { %v3425_v37 = vmax.bf16 %v3297_v21, %v3169_v58  ;;  %v2400_v38 = vpop.f32.mrb[33].mxu0  ;;  %v2196_v58 = vmax.bf16 %v2132_v57, %v5503_v45 }
 0x2bb   :  { %v3426_v23 = vmax.bf16 %v3298_v1, %v3170_v9  ;;  %v2402_v30 = vpop.f32.mrb[34].mxu0 }
 0x2bc   :  { %v3549_v41 = vmax.bf16 %v3548_v8, %v3425_v37  ;;  %v3005_v43 = vpack.c.bf16 %v2402_v30, %v2398_v31  ;;  %v2404_v50 = vpop.f32.mrb[35].mxu0  ;;  %v2133_v31 = vmul.bf16 1009007652, %v5499_v24 }
 0x2bd   :  { %v3566_v47 = vmax.bf16 %v3565_v4, %v3426_v23  ;;  %v3006_v52 = vpack.c.bf16 %v2404_v50, %v2400_v38 }
 0x2be   :  { %v3171_v48 = vadd.bf16 %v5586_v13, %v3005_v43  ;;  %2667 = vmatmul.mubr.bf16.gmra.mrb[140].mxu0 %v2195_v25  ;;  %v2197_v43 = vmax.bf16 %v2133_v31, %v5499_v24 }
 0x2bf   :  { %v3172_v26 = vadd.bf16 %v5588_v15, %v3006_v52  ;;  %2676 = vmatprep.mubr.bf16.mxu0 %v4969_v59 }
 0x2c0   :  { %v3299_v62 = vmul.bf16 1009007652, %v3171_v48 }
 0x2c1   :  { %v3300_v3 = vmul.bf16 1009007652, %v3172_v26  ;;  %v2408_v6 = vpop.f32.mrb[36].mxu0 }
 0x2c2   :  { %v3427_v7 = vmax.bf16 %v3299_v62, %v3171_v48  ;;  %v2410_v10 = vpop.f32.mrb[37].mxu0 }
 0x2c3   :  { %v3428_v5 = vmax.bf16 %v3300_v3, %v3172_v26  ;;  %v2412_v8 = vpop.f32.mrb[38].mxu0  ;;  %v2134_v3 = vmul.bf16 1009007652, %v5510_v55 }
 0x2c4   :  { %v3550_v4 = vmax.bf16 %v3549_v41, %v3427_v7  ;;  %v3007_v14 = vpack.c.bf16 %v2412_v8, %v2408_v6  ;;  %v2414_v9 = vpop.f32.mrb[39].mxu0 }
 0x2c5   :  { %v3567_v27 = vmax.bf16 %v3566_v47, %v3428_v5  ;;  %v3008_v36 = vpack.c.bf16 %v2414_v9, %v2410_v10 }
 0x2c6   :  { %v3173_v21 = vadd.bf16 %v5586_v13, %v3007_v14  ;;  %2677 = vmatmul.mubr.bf16.gmra.mrb[144].mxu0 %v2196_v58 }
 0x2c7   :  { %v3174_v1 = vadd.bf16 %v5588_v15, %v3008_v36  ;;  %2686 = vmatprep.mubr.bf16.mxu0 %v4969_v59 }
 0x2c8   :  { %v3301_v37 = vmul.bf16 1009007652, %v3173_v21 }
 0x2c9   :  { %v3302_v38 = vmul.bf16 1009007652, %v3174_v1  ;;  %v2418_v23 = vpop.f32.mrb[40].mxu0 }
 0x2ca   :  { %v3429_v30 = vmax.bf16 %v3301_v37, %v3173_v21  ;;  %v2420_v25 = vpop.f32.mrb[41].mxu0  ;;  %v2135_v37 = vmul.bf16 1009007652, %v5506_v29 }
 0x2cb   :  { %v3430_v45 = vmax.bf16 %v3302_v38, %v3174_v1  ;;  %v2422_v41 = vpop.f32.mrb[42].mxu0 }
 0x2cc   :  { %v3551_v50 = vmax.bf16 %v3550_v4, %v3429_v30  ;;  %v3009_v47 = vpack.c.bf16 %v2422_v41, %v2418_v23  ;;  %v2424_v52 = vpop.f32.mrb[43].mxu0  ;;  %v2198_v4 = vmax.bf16 %v2134_v3, %v5510_v55 }
 0x2cd   :  { %v3568_v48 = vmax.bf16 %v3567_v27, %v3430_v45  ;;  %v3010_v26 = vpack.c.bf16 %v2424_v52, %v2420_v25 }
 0x2ce   :  { %v3175_v57 = vadd.bf16 %v5586_v13, %v3009_v47  ;;  %2687 = vmatmul.mubr.bf16.gmra.mrb[148].mxu0 %v2197_v43  ;;  %v2199_v43 = vmax.bf16 %v2135_v37, %v5506_v29 }
 0x2cf   :  { %v3176_v62 = vadd.bf16 %v5588_v15, %v3010_v26  ;;  %2696 = vmatprep.mubr.bf16.mxu0 %v4969_v59 }
 0x2d0   :  { %v3303_v6 = vmul.bf16 1009007652, %v3175_v57 }
 0x2d1   :  { %v3304_v7 = vmul.bf16 1009007652, %v3176_v62  ;;  %v2428_v10 = vpop.f32.mrb[44].mxu0 }
 0x2d2   :  { %v3431_v5 = vmax.bf16 %v3303_v6, %v3175_v57  ;;  %v2430_v8 = vpop.f32.mrb[45].mxu0  ;;  %v2136_v57 = vmul.bf16 1009007652, %v5517_v0 }
 0x2d3   :  { %v3432_v24 = vmax.bf16 %v3304_v7, %v3176_v62  ;;  %v2432_v58 = vpop.f32.mrb[46].mxu0 }
 0x2d4   :  { %v3552_v14 = vmax.bf16 %v3551_v50, %v3431_v5  ;;  %v3011_v9 = vpack.c.bf16 %v2432_v58, %v2428_v10  ;;  %v2434_v27 = vpop.f32.mrb[47].mxu0  ;;  %v2200_v29 = vmax.bf16 %v2136_v57, %v5517_v0  ;;  %v2138_v57 = vmul.bf16 1009007652, %v5524_v11 }
 0x2d5   :  { %v3569_v36 = vmax.bf16 %v3568_v48, %v3432_v24  ;;  %v3012_v21 = vpack.c.bf16 %v2434_v27, %v2430_v8  ;;  %v2137_v27 = vmul.bf16 1009007652, %v5513_v20 }
 0x2d6   :  { %v3177_v1 = vadd.bf16 %v5586_v13, %v3011_v9  ;;  %2697 = vmatmul.mubr.bf16.gmra.mrb[152].mxu0 %v2198_v4 }
 0x2d7   :  { %v3178_v31 = vadd.bf16 %v5588_v15, %v3012_v21  ;;  %2706 = vmatprep.mubr.bf16.mxu0 %v4969_v59 }
 0x2d8   :  { %v3305_v38 = vmul.bf16 1009007652, %v3177_v1 }
 0x2d9   :  { %v3306_v23 = vmul.bf16 1009007652, %v3178_v31  ;;  %v2438_v30 = vpop.f32.mrb[48].mxu0 }
 0x2da   :  { %v3433_v25 = vmax.bf16 %v3305_v38, %v3177_v1  ;;  %v2440_v45 = vpop.f32.mrb[49].mxu0 }
 0x2db   :  { %v3434_v55 = vmax.bf16 %v3306_v23, %v3178_v31  ;;  %v2442_v41 = vpop.f32.mrb[50].mxu0 }
 0x2dc   :  { %v5646_v50 = vmax.bf16 %v3552_v14, %v3433_v25  ;;  %v3013_v47 = vpack.c.bf16 %v2442_v41, %v2438_v30  ;;  %v2444_v52 = vpop.f32.mrb[51].mxu0  ;;  %v2201_v25 = vmax.bf16 %v2137_v27, %v5513_v20 }
 0x2dd   :  { %v5648_v48 = vmax.bf16 %v3569_v36, %v3434_v55  ;;  %v3014_v26 = vpack.c.bf16 %v2444_v52, %v2440_v45 }
 0x2de   :  { %2707 = vmatmul.mubr.bf16.gmra.mrb[156].mxu0 %v2199_v43  ;;  %v3179_v3 = vadd.bf16 %v5586_v13, %v3013_v47 }
 0x2df   :  { %2716 = vmatprep.mubr.bf16.mxu0 %v4969_v59  ;;  %v3180_v7 = vadd.bf16 %v5588_v15, %v3014_v26 }
 0x2e0   :  { %v3307_v58 = vmul.bf16 1009007652, %v3179_v3 }
 0x2e1   :  { %v2448_v62 = vpop.f32.mrb[52].mxu0  ;;  %v3308_v14 = vmul.bf16 1009007652, %v3180_v7 }
 0x2e2   :  { %v2450_v6 = vpop.f32.mrb[53].mxu0  ;;  %v3435_v31 = vmax.bf16 %v3307_v58, %v3179_v3 }
 0x2e3   :  { %v2452_v10 = vpop.f32.mrb[54].mxu0  ;;  %v3436_v38 = vmax.bf16 %v3308_v14, %v3180_v7 }
 0x2e4   :  { %v3015_v5 = vpack.c.bf16 %v2452_v10, %v2448_v62  ;;  %v2454_v8 = vpop.f32.mrb[55].mxu0 }
 0x2e5   :  { %v3016_v24 = vpack.c.bf16 %v2454_v8, %v2450_v6 }
 0x2e6   :  { %v3181_v4 = vadd.bf16 %v5586_v13, %v3015_v5  ;;  %2717 = vmatmul.mubr.bf16.gmra.mrb[160].mxu0 %v2200_v29  ;;  %v2202_v5 = vmax.bf16 %v2138_v57, %v5524_v11 }
 0x2e7   :  { %v3182_v9 = vadd.bf16 %v5588_v15, %v3016_v24  ;;  %2726 = vmatprep.mubr.bf16.mxu0 %v4969_v59 }
 0x2e8   :  { %v3309_v36 = vmul.bf16 1009007652, %v3181_v4 }
 0x2e9   :  { %v3310_v21 = vmul.bf16 1009007652, %v3182_v9  ;;  %v2458_v1 = vpop.f32.mrb[56].mxu0 }
 0x2ea   :  { %v3437_v37 = vmax.bf16 %v3309_v36, %v3181_v4  ;;  %v2460_v0 = vpop.f32.mrb[57].mxu0  ;;  %v2139_v36 = vmul.bf16 1009007652, %v5520_v42 }
 0x2eb   :  { %v3438_v23 = vmax.bf16 %v3310_v21, %v3182_v9  ;;  %v2462_v30 = vpop.f32.mrb[58].mxu0 }
 0x2ec   :  { %v3581_v45 = vmax.bf16 %v3437_v37, %v3435_v31  ;;  %v3017_v55 = vpack.c.bf16 %v2462_v30, %v2458_v1  ;;  %v2464_v41 = vpop.f32.mrb[59].mxu0 }
 0x2ed   :  { %v3598_v43 = vmax.bf16 %v3438_v23, %v3436_v38  ;;  %v3018_v47 = vpack.c.bf16 %v2464_v41, %v2460_v0  ;;  %v2203_v23 = vmax.bf16 %v2139_v36, %v5520_v42 }
 0x2ee   :  { %v3183_v52 = vadd.bf16 %v5586_v13, %v3017_v55  ;;  %2727 = vmatmul.mubr.bf16.gmra.mrb[164].mxu0 %v2201_v25 }
 0x2ef   :  { %v3184_v26 = vadd.bf16 %v5588_v15, %v3018_v47  ;;  %2736 = vmatprep.mubr.bf16.mxu0 %v4969_v59 }
 0x2f0   :  { %v3311_v62 = vmul.bf16 1009007652, %v3183_v52 }
 0x2f1   :  { %v3312_v3 = vmul.bf16 1009007652, %v3184_v26  ;;  %v2468_v6 = vpop.f32.mrb[60].mxu0 }
 0x2f2   :  { %v3439_v7 = vmax.bf16 %v3311_v62, %v3183_v52  ;;  %v2470_v10 = vpop.f32.mrb[61].mxu0  ;;  %v2140_v52 = vmul.bf16 1009007652, %v5531_v17 }
 0x2f3   :  { %v3440_v20 = vmax.bf16 %v3312_v3, %v3184_v26  ;;  %v2472_v29 = vpop.f32.mrb[62].mxu0 }
 0x2f4   :  { %v3582_v8 = vmax.bf16 %v3581_v45, %v3439_v7  ;;  %v3019_v24 = vpack.c.bf16 %v2472_v29, %v2468_v6  ;;  %v2474_v58 = vpop.f32.mrb[63].mxu0 }
 0x2f5   :  { %v3599_v4 = vmax.bf16 %v3598_v43, %v3440_v20  ;;  %v3020_v14 = vpack.c.bf16 %v2474_v58, %v2470_v10  ;;  %v2204_v10 = vmax.bf16 %v2140_v52, %v5531_v17 }
 0x2f6   :  { %v3185_v9 = vadd.bf16 %v5586_v13, %v3019_v24  ;;  %2737 = vmatmul.mubr.bf16.gmra.mrb[168].mxu0 %v2202_v5 }
 0x2f7   :  { %v3186_v27 = vadd.bf16 %v5588_v15, %v3020_v14  ;;  %2746 = vmatprep.mubr.bf16.mxu0 %v4969_v59 }
 0x2f8   :  { %v3313_v21 = vmul.bf16 1009007652, %v3185_v9 }
 0x2f9   :  { %v3314_v1 = vmul.bf16 1009007652, %v3186_v27  ;;  %v2478_v31 = vpop.f32.mrb[64].mxu0 }
 0x2fa   :  { %v3441_v37 = vmax.bf16 %v3313_v21, %v3185_v9  ;;  %v2480_v0 = vpop.f32.mrb[65].mxu0 }
 0x2fb   :  { %v3442_v11 = vmax.bf16 %v3314_v1, %v3186_v27  ;;  %v2482_v38 = vpop.f32.mrb[66].mxu0 }
 0x2fc   :  { %v3583_v30 = vmax.bf16 %v3582_v8, %v3441_v37  ;;  %v3021_v25 = vpack.c.bf16 %v2482_v38, %v2478_v31  ;;  %v2484_v45 = vpop.f32.mrb[67].mxu0 }
 0x2fd   :  { %v3600_v55 = vmax.bf16 %v3599_v4, %v3442_v11  ;;  %v3022_v41 = vpack.c.bf16 %v2484_v45, %v2480_v0  ;;  %v2141_v4 = vmul.bf16 1009007652, %v5527_v35  ;;  %v3554_v0 = vunpack.i.l.bf16 %v5646_v50 }
 0x2fe   :  { %v3187_v43 = vadd.bf16 %v5586_v13, %v3021_v25  ;;  %2747 = vmatmul.mubr.bf16.gmra.mrb[172].mxu0 %v2203_v23  ;;  %v3555_v11 = vunpack.i.h.bf16 %v5646_v50  ;;  %v3571_v25 = vunpack.i.l.bf16 %v5648_v48  ;;  %v3572_v45 = vunpack.i.h.bf16 %v5648_v48 }
 0x2ff   :  { %v3188_v47 = vadd.bf16 %v5588_v15, %v3022_v41  ;;  %2756 = vmatprep.mubr.bf16.mxu0 %v4969_v59  ;;  %v2205_v17 = vmax.bf16 %v2141_v4, %v5527_v35 }
 0x300   :  { %v3315_v26 = vmul.bf16 1009007652, %v3187_v43  ;;  %v3556_v52 = vmax.f32 %v3554_v0, %v3555_v11 }
 0x301   :  { %v3316_v57 = vmul.bf16 1009007652, %v3188_v47  ;;  %v2488_v62 = vpop.f32.mrb[68].mxu0 }
 0x302   :  { %v3443_v3 = vmax.bf16 %v3315_v26, %v3187_v43  ;;  %v2490_v6 = vpop.f32.mrb[69].mxu0  ;;  %v3573_v26 = vmax.f32 %v3571_v25, %v3572_v45 }
 0x303   :  { %v3444_v42 = vmax.bf16 %v3316_v57, %v3188_v47  ;;  %v2492_v7 = vpop.f32.mrb[70].mxu0  ;;  %v2142_v47 = vmul.bf16 1009007652, %v5538_v32 }
 0x304   :  { %v3584_v20 = vmax.bf16 %v3583_v30, %v3443_v3  ;;  %v3023_v29 = vpack.c.bf16 %v2492_v7, %v2488_v62  ;;  %v2494_v5 = vpop.f32.mrb[71].mxu0 }
 0x305   :  { %v3601_v8 = vmax.bf16 %v3600_v55, %v3444_v42  ;;  %v3024_v24 = vpack.c.bf16 %v2494_v5, %v2490_v6  ;;  %v2206_v7 = vmax.bf16 %v2142_v47, %v5538_v32 }
 0x306   :  { %v3189_v58 = vadd.bf16 %v5586_v13, %v3023_v29  ;;  %2757 = vmatmul.mubr.bf16.gmra.mrb[176].mxu0 %v2204_v10  ;;  %v3557_v10 = vrot.slane %v3556_v52, 4 }
 0x307   :  { %v3190_v14 = vadd.bf16 %v5588_v15, %v3024_v24  ;;  %2766 = vmatprep.mubr.bf16.mxu0 %v4969_v59 }
 0x308   :  { %v3317_v9 = vmul.bf16 1009007652, %v3189_v58 }
 0x309   :  { %v3318_v27 = vmul.bf16 1009007652, %v3190_v14  ;;  %v2498_v36 = vpop.f32.mrb[72].mxu0 }
 0x30a   :  { %v3445_v21 = vmax.bf16 %v3317_v9, %v3189_v58  ;;  %v2500_v1 = vpop.f32.mrb[73].mxu0  ;;  %v2143_v9 = vmul.bf16 1009007652, %v5534_v44 }
 0x30b   :  { %v3446_v31 = vmax.bf16 %v3318_v27, %v3190_v14  ;;  %v2502_v37 = vpop.f32.mrb[74].mxu0  ;;  %v3558_v27 = vmax.f32 %v3556_v52, %v3557_v10 }
 0x30c   :  { %v3585_v38 = vmax.bf16 %v3584_v20, %v3445_v21  ;;  %v3025_v23 = vpack.c.bf16 %v2502_v37, %v2498_v36  ;;  %v2504_v30 = vpop.f32.mrb[75].mxu0  ;;  %v2207_v11 = vmax.bf16 %v2143_v9, %v5534_v44 }
 0x30d   :  { %v3602_v55 = vmax.bf16 %v3601_v8, %v3446_v31  ;;  %v3026_v41 = vpack.c.bf16 %v2504_v30, %v2500_v1  ;;  %v3574_v8 = vrot.slane %v3573_v26, 4 }
 0x30e   :  { %v3191_v43 = vadd.bf16 %v5586_v13, %v3025_v23  ;;  %2767 = vmatmul.mubr.bf16.gmra.mrb[180].mxu0 %v2205_v17 }
 0x30f   :  { %v3192_v35 = vadd.bf16 %v5588_v15, %v3026_v41  ;;  %2776 = vmatprep.mubr.bf16.mxu0 %v4969_v59  ;;  %v3575_v21 = vmax.f32 %v3573_v26, %v3574_v8 }
 0x310   :  { %v3319_v50 = vmul.bf16 1009007652, %v3191_v43 }
 0x311   :  { %v3320_v57 = vmul.bf16 1009007652, %v3192_v35  ;;  %v2508_v62 = vpop.f32.mrb[76].mxu0  ;;  %v3576_v45 = vrot.slane %v3575_v21, 2 }
 0x312   :  { %v3447_v3 = vmax.bf16 %v3319_v50, %v3191_v43  ;;  %v2510_v6 = vpop.f32.mrb[77].mxu0  ;;  %v2144_v50 = vmul.bf16 1009007652, %v5545_v34 }
 0x313   :  { %v3448_v42 = vmax.bf16 %v3320_v57, %v3192_v35  ;;  %v2512_v48 = vpop.f32.mrb[78].mxu0 }
 0x314   :  { %v3586_v20 = vmax.bf16 %v3585_v38, %v3447_v3  ;;  %v3027_v29 = vpack.c.bf16 %v2512_v48, %v2508_v62  ;;  %v2514_v5 = vpop.f32.mrb[79].mxu0  ;;  %v3559_v38 = vrot.slane %v3558_v27, 2  ;;  %v3577_v62 = vmax.f32 %v3575_v21, %v3576_v45 }
 0x315   :  { %v3603_v24 = vmax.bf16 %v3602_v55, %v3448_v42  ;;  %v3028_v58 = vpack.c.bf16 %v2514_v5, %v2510_v6 }
 0x316   :  { %v3193_v4 = vadd.bf16 %v5586_v13, %v3027_v29  ;;  %2777 = vmatmul.mubr.bf16.gmra.mrb[184].mxu0 %v2206_v7  ;;  %v3560_v26 = vmax.f32 %v3558_v27, %v3559_v38  ;;  %v2208_v29 = vmax.bf16 %v2144_v50, %v5545_v34 }
 0x317   :  { %v3194_v14 = vadd.bf16 %v5588_v15, %v3028_v58  ;;  %2786 = vmatprep.mubr.bf16.mxu0 %v4969_v59 }
 0x318   :  { %v3321_v36 = vmul.bf16 1009007652, %v3193_v4  ;;  %v3561_v5 = vrot.slane %v3560_v26, 1 }
 0x319   :  { %v3322_v32 = vmul.bf16 1009007652, %v3194_v14  ;;  %v2518_v1 = vpop.f32.mrb[80].mxu0 }
 0x31a   :  { %v3449_v17 = vmax.bf16 %v3321_v36, %v3193_v4  ;;  %v2520_v31 = vpop.f32.mrb[81].mxu0  ;;  %v3578_v4 = vrot.slane %v3577_v62, 1  ;;  %v3562_v34 = vmax.f32 %v3560_v26, %v3561_v5 }
 0x31b   :  { %v3450_v37 = vmax.bf16 %v3322_v32, %v3194_v14  ;;  %v2522_v0 = vpop.f32.mrb[82].mxu0  ;;  %v2145_v32 = vmul.bf16 1009007652, %v5541_v51 }
 0x31c   :  { %v3587_v23 = vmax.bf16 %v3586_v20, %v3449_v17  ;;  %v3029_v30 = vpack.c.bf16 %v2522_v0, %v2518_v1  ;;  %v2524_v25 = vpop.f32.mrb[83].mxu0 }
 0x31d   :  { %v3604_v55 = vmax.bf16 %v3603_v24, %v3450_v37  ;;  %v3030_v41 = vpack.c.bf16 %v2524_v25, %v2520_v31 }
 0x31e   :  { %v3588_v43 = vunpack.i.l.bf16 %v3587_v23  ;;  %v3589_v35 = vunpack.i.h.bf16 %v3587_v23  ;;  %2787 = vmatmul.mubr.bf16.gmra.mrb[188].mxu0 %v2207_v11  ;;  %v3195_v42 = vadd.bf16 %v5586_v13, %v3029_v30  ;;  %v3579_v11 = vmax.f32 %v3577_v62, %v3578_v4 }
 0x31f   :  { %v3605_v47 = vunpack.i.l.bf16 %v3604_v55  ;;  %v3606_v52 = vunpack.i.h.bf16 %v3604_v55  ;;  %2796 = vmatprep.mubr.bf16.mxu0 %v4969_v59  ;;  %v3196_v10 = vadd.bf16 %v5588_v15, %v3030_v41 }
 0x320   :  { %v3590_v57 = vmax.f32 %v3588_v43, %v3589_v35  ;;  %v3323_v36 = vmul.bf16 1009007652, %v3195_v42  ;;  %v2209_v43 = vmax.bf16 %v2145_v32, %v5541_v51 }
 0x321   :  { %v3607_v44 = vmax.f32 %v3605_v47, %v3606_v52  ;;  %v2528_v3 = vpop.f32.mrb[84].mxu0  ;;  %v3324_v17 = vmul.bf16 1009007652, %v3196_v10 }
 0x322   :  { %v3591_v6 = vrot.slane %v3590_v57, 4  ;;  %v2530_v48 = vpop.f32.mrb[85].mxu0  ;;  %v3451_v45 = vmax.bf16 %v3323_v36, %v3195_v42 }
 0x323   :  { %v3608_v7 = vrot.slane %v3607_v44, 4  ;;  %v2532_v20 = vpop.f32.mrb[86].mxu0  ;;  %v3452_v47 = vmax.bf16 %v3324_v17, %v3196_v10  ;;  %v2146_v10 = vmul.bf16 1009007652, %v5552_v53 }
 0x324   :  { %v3592_v8 = vmax.f32 %v3590_v57, %v3591_v6  ;;  %v3031_v24 = vpack.c.bf16 %v2532_v20, %v2528_v3  ;;  %v2534_v58 = vpop.f32.mrb[87].mxu0  ;;  %v3563_v57 = vpack.i.bf16 %v3562_v34, %v3562_v34 }
 0x325   :  { %v3609_v14 = vmax.f32 %v3607_v44, %v3608_v7  ;;  %v3032_v9 = vpack.c.bf16 %v2534_v58, %v2530_v48  ;;  %v3580_v48 = vpack.i.bf16 %v3579_v11, %v3579_v11  ;;  %v2210_v34 = vmax.bf16 %v2146_v10, %v5552_v53 }
 0x326   :  { %v3593_v27 = vrot.slane %v3592_v8, 2  ;;  %v3197_v21 = vadd.bf16 %v5586_v13, %v3031_v24  ;;  %2797 = vmatmul.mubr.bf16.gmra.mrb[192].mxu0 %v2208_v29 }
 0x327   :  { %v3610_v1 = vrot.slane %v3609_v14, 2  ;;  %v3198_v31 = vadd.bf16 %v5588_v15, %v3032_v9  ;;  %2806 = vmatprep.mubr.bf16.mxu0 %v4969_v59  ;;  %v3869_v4 = vunpack.c.l.b16 %v3580_v48  ;;  %v4920_v48 = vld [vmem:[%s5995_s6 + $0x40] sm:$0xff]  }
 0x328   :  { %v3594_v37 = vmax.f32 %v3592_v8, %v3593_v27  ;;  %v3325_v0 = vmul.bf16 1009007652, %v3197_v21  ;;  %v3868_v8 = vunpack.c.l.b16 %v3563_v57  ;;  %4490 = vmatprep.subr.bf16.mxu1 %v4920_v48 }
 0x329   :  { %v3611_v38 = vmax.f32 %v3609_v14, %v3610_v1  ;;  %v3326_v23 = vmul.bf16 1009007652, %v3198_v31  ;;  %v2538_v30 = vpop.f32.mrb[88].mxu0 }
 0x32a   :  { %v3595_v25 = vrot.slane %v3594_v37, 1  ;;  %v3453_v55 = vmax.bf16 %v3325_v0, %v3197_v21  ;;  %v2540_v41 = vpop.f32.mrb[89].mxu0 }
 0x32b   :  { %v3612_v35 = vrot.slane %v3611_v38, 1  ;;  %v3454_v52 = vmax.bf16 %v3326_v23, %v3198_v31  ;;  %v2542_v50 = vpop.f32.mrb[90].mxu0 }
 0x32c   :  { %v3596_v44 = vmax.f32 %v3594_v37, %v3595_v25  ;;  %v3615_v3 = vmax.bf16 %v3453_v55, %v3451_v45  ;;  %v3033_v26 = vpack.c.bf16 %v2542_v50, %v2538_v30  ;;  %v2544_v6 = vpop.f32.mrb[91].mxu0  ;;  %v2147_v45 = vmul.bf16 1009007652, %v5548_v54 }
 0x32d   :  { %v3613_v62 = vmax.f32 %v3611_v38, %v3612_v35  ;;  %v3632_v7 = vmax.bf16 %v3454_v52, %v3452_v47  ;;  %v3034_v20 = vpack.c.bf16 %v2544_v6, %v2540_v41 }
 0x32e   :  { %v3597_v29 = vpack.i.bf16 %v3596_v44, %v3596_v44  ;;  %v3199_v42 = vadd.bf16 %v5586_v13, %v3033_v26  ;;  %2807 = vmatmul.mubr.bf16.gmra.mrb[196].mxu0 %v2209_v43  ;;  %v2211_v50 = vmax.bf16 %v2147_v45, %v5548_v54  ;;  %v2148_v54 = vmul.bf16 1009007652, %v5559_v61 }
 0x32f   :  { %v3614_v5 = vpack.i.bf16 %v3613_v62, %v3613_v62  ;;  %v3200_v51 = vadd.bf16 %v5588_v15, %v3034_v20  ;;  %2816 = vmatprep.mubr.bf16.mxu0 %v4969_v59  ;;  %v4921_v62 = vld [vmem:[%s5995_s6] sm:$0xff]  }
 0x330   :  { %v3870_v24 = vunpack.c.l.b16 %v3597_v29  ;;  %v3327_v58 = vmul.bf16 1009007652, %v3199_v42  ;;  %4491 = vmatpush3.bf16.msra.mxu1 %v4921_v62 }
 0x331   :  { %v3871_v14 = vunpack.c.l.b16 %v3614_v5  ;;  %v3328_v9 = vmul.bf16 1009007652, %v3200_v51  ;;  %v2548_v27 = vpop.f32.mrb[92].mxu0 }
 0x332   :  { %v3455_v36 = vmax.bf16 %v3327_v58, %v3199_v42  ;;  %v2550_v21 = vpop.f32.mrb[93].mxu0  ;;  %v5708_v32 = vsel %vm3884_vm3, %v3870_v24, %v3868_v8  ;;  %v2212_v58 = vmax.bf16 %v2148_v54, %v5559_v61 }
 0x333   :  { %v3456_v1 = vmax.bf16 %v3328_v9, %v3200_v51  ;;  %v2552_v17 = vpop.f32.mrb[94].mxu0  ;;  %v5710_v31 = vsel %vm3884_vm3, %v3871_v14, %v3869_v4 }
 0x334   :  { %v3616_v37 = vmax.bf16 %v3615_v3, %v3455_v36  ;;  %v3035_v0 = vpack.c.bf16 %v2552_v17, %v2548_v27  ;;  %v2554_v11 = vpop.f32.mrb[95].mxu0  ;;  %v2149_v17 = vmul.bf16 1009007652, %v5555_v2 }
 0x335   :  { %v3633_v38 = vmax.bf16 %v3632_v7, %v3456_v1  ;;  %v3036_v23 = vpack.c.bf16 %v2554_v11, %v2550_v21 }
 0x336   :  { %v3201_v30 = vadd.bf16 %v5586_v13, %v3035_v0  ;;  %2817 = vmatmul.mubr.bf16.gmra.mrb[200].mxu0 %v2210_v34 }
 0x337   :  { %v3202_v25 = vadd.bf16 %v5588_v15, %v3036_v23  ;;  %2826 = vmatprep.mubr.bf16.mxu0 %v4969_v59 }
 0x338   :  { %v3329_v55 = vmul.bf16 1009007652, %v3201_v30 }
 0x339   :  { %v3330_v41 = vmul.bf16 1009007652, %v3202_v25  ;;  %v2558_v43 = vpop.f32.mrb[96].mxu0 }
 0x33a   :  { %v3457_v35 = vmax.bf16 %v3329_v55, %v3201_v30  ;;  %v2560_v47 = vpop.f32.mrb[97].mxu0  ;;  %v2213_v30 = vmax.bf16 %v2149_v17, %v5555_v2 }
 0x33b   :  { %v3458_v53 = vmax.bf16 %v3330_v41, %v3202_v25  ;;  %v2562_v52 = vpop.f32.mrb[98].mxu0 }
 0x33c   :  { %v3617_v57 = vmax.bf16 %v3616_v37, %v3457_v35  ;;  %v3037_v44 = vpack.c.bf16 %v2562_v52, %v2558_v43  ;;  %v2564_v3 = vpop.f32.mrb[99].mxu0 }
 0x33d   :  { %v3634_v26 = vmax.bf16 %v3633_v38, %v3458_v53  ;;  %v3038_v6 = vpack.c.bf16 %v2564_v3, %v2560_v47  ;;  %v2150_v53 = vmul.bf16 1009007652, %v5566_v12 }
 0x33e   :  { %v3203_v7 = vadd.bf16 %v5586_v13, %v3037_v44  ;;  %2827 = vmatmul.mubr.bf16.gmra.mrb[204].mxu0 %v2211_v50 }
 0x33f   :  { %v3204_v20 = vadd.bf16 %v5588_v15, %v3038_v6  ;;  %2836 = vmatprep.mubr.bf16.mxu0 %v4969_v59  ;;  %v2214_v6 = vmax.bf16 %v2150_v53, %v5566_v12 }
 0x340   :  { %v3331_v29 = vmul.bf16 1009007652, %v3203_v7 }
 0x341   :  { %v3332_v42 = vmul.bf16 1009007652, %v3204_v20  ;;  %v2568_v5 = vpop.f32.mrb[100].mxu0 }
 0x342   :  { %v3459_v51 = vmax.bf16 %v3331_v29, %v3203_v7  ;;  %v2570_v10 = vpop.f32.mrb[101].mxu0 }
 0x343   :  { %v3460_v8 = vmax.bf16 %v3332_v42, %v3204_v20  ;;  %v2572_v24 = vpop.f32.mrb[102].mxu0 }
 0x344   :  { %v3618_v4 = vmax.bf16 %v3617_v57, %v3459_v51  ;;  %v3039_v14 = vpack.c.bf16 %v2572_v24, %v2568_v5  ;;  %v2574_v9 = vpop.f32.mrb[103].mxu0  ;;  %v2151_v5 = vmul.bf16 1009007652, %v5562_v63 }
 0x345   :  { %v3635_v27 = vmax.bf16 %v3634_v26, %v3460_v8  ;;  %v3040_v36 = vpack.c.bf16 %v2574_v9, %v2570_v10 }
 0x346   :  { %v3205_v21 = vadd.bf16 %v5586_v13, %v3039_v14  ;;  %2837 = vmatmul.mubr.bf16.gmra.mrb[208].mxu0 %v2212_v58  ;;  %v2215_v14 = vmax.bf16 %v2151_v5, %v5562_v63 }
 0x347   :  { %v3206_v1 = vadd.bf16 %v5588_v15, %v3040_v36  ;;  %2846 = vmatprep.mubr.bf16.mxu0 %v4969_v59 }
 0x348   :  { %v3333_v34 = vmul.bf16 1009007652, %v3205_v21 }
 0x349   :  { %v3334_v37 = vmul.bf16 1009007652, %v3206_v1  ;;  %v2578_v0 = vpop.f32.mrb[104].mxu0 }
 0x34a   :  { %v3461_v11 = vmax.bf16 %v3333_v34, %v3205_v21  ;;  %v2580_v38 = vpop.f32.mrb[105].mxu0 }
 0x34b   :  { %v3462_v61 = vmax.bf16 %v3334_v37, %v3206_v1  ;;  %v2582_v23 = vpop.f32.mrb[106].mxu0 }
 0x34c   :  { %v3619_v25 = vmax.bf16 %v3618_v4, %v3461_v11  ;;  %v3041_v45 = vpack.c.bf16 %v2582_v23, %v2578_v0  ;;  %v2584_v55 = vpop.f32.mrb[107].mxu0  ;;  %v2152_v11 = vmul.bf16 1009007652, %v5573_v19 }
 0x34d   :  { %v3636_v41 = vmax.bf16 %v3635_v27, %v3462_v61  ;;  %v3042_v43 = vpack.c.bf16 %v2584_v55, %v2580_v38 }
 0x34e   :  { %v3207_v35 = vadd.bf16 %v5586_v13, %v3041_v45  ;;  %2847 = vmatmul.mubr.bf16.gmra.mrb[212].mxu0 %v2213_v30 }
 0x34f   :  { %v3208_v47 = vadd.bf16 %v5588_v15, %v3042_v43  ;;  %2856 = vmatprep.mubr.bf16.mxu0 %v4969_v59  ;;  %v2216_v43 = vmax.bf16 %v2152_v11, %v5573_v19  ;;  %v2154_v11 = vmul.bf16 1009007652, %v5583_v49 }
 0x350   :  { %v3335_v52 = vmul.bf16 1009007652, %v3207_v35 }
 0x351   :  { %v3336_v50 = vmul.bf16 1009007652, %v3208_v47  ;;  %v2588_v57 = vpop.f32.mrb[108].mxu0 }
 0x352   :  { %v3463_v44 = vmax.bf16 %v3335_v52, %v3207_v35  ;;  %v2590_v3 = vpop.f32.mrb[109].mxu0 }
 0x353   :  { %v3464_v2 = vmax.bf16 %v3336_v50, %v3208_v47  ;;  %v2592_v26 = vpop.f32.mrb[110].mxu0 }
 0x354   :  { %v3620_v48 = vmax.bf16 %v3619_v25, %v3463_v44  ;;  %v3043_v62 = vpack.c.bf16 %v2592_v26, %v2588_v57  ;;  %v2594_v7 = vpop.f32.mrb[111].mxu0 }
 0x355   :  { %v3637_v20 = vmax.bf16 %v3636_v41, %v3464_v2  ;;  %v3044_v54 = vpack.c.bf16 %v2594_v7, %v2590_v3 }
 0x356   :  { %v3209_v29 = vadd.bf16 %v5586_v13, %v3043_v62  ;;  %2857 = vmatmul.mubr.bf16.gmra.mrb[216].mxu0 %v2214_v6 }
 0x357   :  { %v3210_v42 = vadd.bf16 %v5588_v15, %v3044_v54  ;;  %2866 = vmatprep.mubr.bf16.mxu0 %v4969_v59 }
 0x358   :  { %v3337_v51 = vmul.bf16 1009007652, %v3209_v29 }
 0x359   :  { %v3338_v10 = vmul.bf16 1009007652, %v3210_v42  ;;  %v2598_v8 = vpop.f32.mrb[112].mxu0 }
 0x35a   :  { %v3465_v24 = vmax.bf16 %v3337_v51, %v3209_v29  ;;  %v2600_v58 = vpop.f32.mrb[113].mxu0 }
 0x35b   :  { %v3466_v12 = vmax.bf16 %v3338_v10, %v3210_v42  ;;  %v2602_v4 = vpop.f32.mrb[114].mxu0 }
 0x35c   :  { %v3621_v9 = vmax.bf16 %v3620_v48, %v3465_v24  ;;  %v3045_v27 = vpack.c.bf16 %v2602_v4, %v2598_v8  ;;  %v2604_v36 = vpop.f32.mrb[115].mxu0  ;;  %v2153_v48 = vmul.bf16 1009007652, %v5569_v28 }
 0x35d   :  { %v3638_v21 = vmax.bf16 %v3637_v20, %v3466_v12  ;;  %v3046_v1 = vpack.c.bf16 %v2604_v36, %v2600_v58 }
 0x35e   :  { %v3622_v17 = vunpack.i.l.bf16 %v3621_v9  ;;  %v3623_v34 = vunpack.i.h.bf16 %v3621_v9  ;;  %2867 = vmatmul.mubr.bf16.gmra.mrb[220].mxu0 %v2215_v14  ;;  %v3211_v63 = vadd.bf16 %v5586_v13, %v3045_v27  ;;  %v2217_v12 = vmax.bf16 %v2153_v48, %v5569_v28 }
 0x35f   :  { %v3639_v37 = vunpack.i.l.bf16 %v3638_v21  ;;  %v3640_v0 = vunpack.i.h.bf16 %v3638_v21  ;;  %2876 = vmatprep.mubr.bf16.mxu0 %v4969_v59  ;;  %v3212_v55 = vadd.bf16 %v5588_v15, %v3046_v1 }
 0x360   :  { %v3624_v38 = vmax.f32 %v3622_v17, %v3623_v34  ;;  %v3339_v44 = vmul.bf16 1009007652, %v3211_v63 }
 0x361   :  { %v3641_v61 = vmax.f32 %v3639_v37, %v3640_v0  ;;  %v2608_v23 = vpop.f32.mrb[116].mxu0  ;;  %v3340_v26 = vmul.bf16 1009007652, %v3212_v55 }
 0x362   :  { %v3625_v30 = vrot.slane %v3624_v38, 4  ;;  %v2610_v25 = vpop.f32.mrb[117].mxu0  ;;  %v3467_v42 = vmax.bf16 %v3339_v44, %v3211_v63 }
 0x363   :  { %v3642_v45 = vrot.slane %v3641_v61, 4  ;;  %v2612_v41 = vpop.f32.mrb[118].mxu0  ;;  %v3468_v8 = vmax.bf16 %v3340_v26, %v3212_v55  ;;  %v2155_v26 = vmul.bf16 1009007652, %v5579_v46 }
 0x364   :  { %v3626_v35 = vmax.f32 %v3624_v38, %v3625_v30  ;;  %v3047_v47 = vpack.c.bf16 %v2612_v41, %v2608_v23  ;;  %v2614_v53 = vpop.f32.mrb[119].mxu0  ;;  %v4923_v23 = vld [vmem:[%s5995_s6 + $0x8] sm:$0xff]  }
 0x365   :  { %v3643_v52 = vmax.f32 %v3641_v61, %v3642_v45  ;;  %v3048_v50 = vpack.c.bf16 %v2614_v53, %v2610_v25  ;;  %v4922_v61 = vld [vmem:[%s5995_s6 + $0x48] sm:$0xff]   ;;  %v2218_v53 = vmax.bf16 %v2154_v11, %v5583_v49 }
 0x366   :  { %v3627_v57 = vrot.slane %v3626_v35, 2  ;;  %v3213_v3 = vadd.bf16 %v5586_v13, %v3047_v47  ;;  %2877 = vmatmul.mubr.bf16.gmra.mrb[224].mxu0 %v2216_v43  ;;  %4492 = vmatprep.subr.bf16.mxu1 %v4922_v61  ;;  %v2157_v61 = vmul.bf16 1009007652, %v5590_v18 }
 0x367   :  { %v3644_v2 = vrot.slane %v3643_v52, 2  ;;  %v3214_v6 = vadd.bf16 %v5588_v15, %v3048_v50  ;;  %2886 = vmatprep.mubr.bf16.mxu0 %v4969_v59  ;;  %4493 = vmatpush3.bf16.msra.mxu1 %v4923_v23 }
 0x368   :  { %v3628_v62 = vmax.f32 %v3626_v35, %v3627_v57  ;;  %v3341_v19 = vmul.bf16 1009007652, %v3213_v3 }
 0x369   :  { %v3645_v7 = vmax.f32 %v3643_v52, %v3644_v2  ;;  %v3342_v20 = vmul.bf16 1009007652, %v3214_v6  ;;  %v2618_v54 = vpop.f32.mrb[120].mxu0 }
 0x36a   :  { %v3629_v29 = vrot.slane %v3628_v62, 1  ;;  %v3469_v5 = vmax.bf16 %v3341_v19, %v3213_v3  ;;  %v2620_v51 = vpop.f32.mrb[121].mxu0 }
 0x36b   :  { %v3646_v10 = vrot.slane %v3645_v7, 1  ;;  %v3470_v24 = vmax.bf16 %v3342_v20, %v3214_v6  ;;  %v2622_v58 = vpop.f32.mrb[122].mxu0  ;;  %v2219_v20 = vmax.bf16 %v2155_v26, %v5579_v46  ;;  %v2156_v46 = vmul.bf16 1009007652, %v5594_v22 }
 0x36c   :  { %v3630_v4 = vmax.f32 %v3628_v62, %v3629_v29  ;;  %v3649_v14 = vmax.bf16 %v3469_v5, %v3467_v42  ;;  %v3049_v9 = vpack.c.bf16 %v2622_v58, %v2618_v54  ;;  %v2624_v27 = vpop.f32.mrb[123].mxu0 }
 0x36d   :  { %v3647_v36 = vmax.f32 %v3645_v7, %v3646_v10  ;;  %v3666_v21 = vmax.bf16 %v3470_v24, %v3468_v8  ;;  %v3050_v1 = vpack.c.bf16 %v2624_v27, %v2620_v51  ;;  %v4924_v10 = vld [vmem:[%s5995_s6 + $0x50] sm:$0xff]  }
 0x36e   :  { %v3631_v17 = vpack.i.bf16 %v3630_v4, %v3630_v4  ;;  %v3215_v34 = vadd.bf16 %v5586_v13, %v3049_v9  ;;  %2887 = vmatmul.mubr.bf16.gmra.mrb[228].mxu0 %v2217_v12  ;;  %v4925_v8 = vld [vmem:[%s5995_s6 + $0x10] sm:$0xff]   ;;  %4494 = vmatprep.subr.bf16.mxu1 %v4924_v10 }
 0x36f   :  { %v3648_v37 = vpack.i.bf16 %v3647_v36, %v3647_v36  ;;  %v3216_v0 = vadd.bf16 %v5588_v15, %v3050_v1  ;;  %2896 = vmatprep.mubr.bf16.mxu0 %v4969_v59  ;;  %4495 = vmatpush3.bf16.msra.mxu1 %v4925_v8  ;;  %v2220_v1 = vmax.bf16 %v2156_v46, %v5594_v22 }
 0x370   :  { %v3872_v28 = vunpack.c.l.b16 %v3631_v17  ;;  %v3343_v38 = vmul.bf16 1009007652, %v3215_v34 }
 0x371   :  { %v3873_v30 = vunpack.c.l.b16 %v3648_v37  ;;  %v3344_v63 = vmul.bf16 1009007652, %v3216_v0  ;;  %v2628_v25 = vpop.f32.mrb[124].mxu0 }
 0x372   :  { %v3471_v45 = vmax.bf16 %v3343_v38, %v3215_v34  ;;  %v2630_v55 = vpop.f32.mrb[125].mxu0  ;;  %v5766_v41 = vsel %vm3886_vm4, %v3872_v28, %v5708_v32 }
 0x373   :  { %v3472_v43 = vmax.bf16 %v3344_v63, %v3216_v0  ;;  %v2632_v35 = vpop.f32.mrb[126].mxu0  ;;  %v5770_v47 = vsel %vm3886_vm4, %v3873_v30, %v5710_v31 }
 0x374   :  { %v3650_v52 = vmax.bf16 %v3649_v14, %v3471_v45  ;;  %v3051_v50 = vpack.c.bf16 %v2632_v35, %v2628_v25  ;;  %v2634_v57 = vpop.f32.mrb[127].mxu0 }
 0x375   :  { %v3667_v44 = vmax.bf16 %v3666_v21, %v3472_v43  ;;  %v3052_v3 = vpack.c.bf16 %v2634_v57, %v2630_v55  ;;  %v2221_v43 = vmax.bf16 %v2157_v61, %v5590_v18 }
 0x376   :  { %v3217_v2 = vadd.bf16 %v5586_v13, %v3051_v50  ;;  %2897 = vmatmul.mubr.bf16.gmra.mrb[232].mxu0 %v2218_v53 }
 0x377   :  { %v3218_v32 = vadd.bf16 %v5588_v15, %v3052_v3  ;;  %2906 = vmatprep.mubr.bf16.mxu0 %v4969_v59 }
 0x378   :  { %v3345_v6 = vmul.bf16 1009007652, %v3217_v2 }
 0x379   :  { %v3346_v48 = vmul.bf16 1009007652, %v3218_v32  ;;  %v2638_v31 = vpop.f32.mrb[128].mxu0 }
 0x37a   :  { %v3473_v62 = vmax.bf16 %v3345_v6, %v3217_v2  ;;  %v2640_v19 = vpop.f32.mrb[129].mxu0  ;;  %v2158_v2 = vmul.bf16 1009007652, %v5605_v60 }
 0x37b   :  { %v3474_v49 = vmax.bf16 %v3346_v48, %v3218_v32  ;;  %v2642_v7 = vpop.f32.mrb[130].mxu0 }
 0x37c   :  { %v3651_v54 = vmax.bf16 %v3650_v52, %v3473_v62  ;;  %v3053_v29 = vpack.c.bf16 %v2642_v7, %v2638_v31  ;;  %v2644_v42 = vpop.f32.mrb[131].mxu0 }
 0x37d   :  { %v3668_v5 = vmax.bf16 %v3667_v44, %v3474_v49  ;;  %v3054_v51 = vpack.c.bf16 %v2644_v42, %v2640_v19  ;;  %v2222_v19 = vmax.bf16 %v2158_v2, %v5605_v60 }
 0x37e   :  { %v3219_v24 = vadd.bf16 %v5586_v13, %v3053_v29  ;;  %2907 = vmatmul.mubr.bf16.gmra.mrb[236].mxu0 %v2219_v20 }
 0x37f   :  { %v3220_v58 = vadd.bf16 %v5588_v15, %v3054_v51  ;;  %2916 = vmatprep.mubr.bf16.mxu0 %v4969_v59  ;;  %v2159_v51 = vmul.bf16 1009007652, %v5601_v56 }
 0x380   :  { %v3347_v12 = vmul.bf16 1009007652, %v3219_v24 }
 0x381   :  { %v3348_v4 = vmul.bf16 1009007652, %v3220_v58  ;;  %v2648_v14 = vpop.f32.mrb[132].mxu0 }
 0x382   :  { %v3475_v9 = vmax.bf16 %v3347_v12, %v3219_v24  ;;  %v2650_v27 = vpop.f32.mrb[133].mxu0 }
 0x383   :  { %v3476_v36 = vmax.bf16 %v3348_v4, %v3220_v58  ;;  %v2652_v21 = vpop.f32.mrb[134].mxu0  ;;  %v2223_v4 = vmax.bf16 %v2159_v51, %v5601_v56 }
 0x384   :  { %v3652_v17 = vmax.bf16 %v3651_v54, %v3475_v9  ;;  %v3055_v34 = vpack.c.bf16 %v2652_v21, %v2648_v14  ;;  %v2654_v37 = vpop.f32.mrb[135].mxu0 }
 0x385   :  { %v3669_v0 = vmax.bf16 %v3668_v5, %v3476_v36  ;;  %v3056_v11 = vpack.c.bf16 %v2654_v37, %v2650_v27 }
 0x386   :  { %v3221_v28 = vadd.bf16 %v5586_v13, %v3055_v34  ;;  %2917 = vmatmul.mubr.bf16.gmra.mrb[240].mxu0 %v2220_v1 }
 0x387   :  { %v3222_v38 = vadd.bf16 %v5588_v15, %v3056_v11  ;;  %2926 = vmatprep.mubr.bf16.mxu0 %v4969_v59 }
 0x388   :  { %v3349_v23 = vmul.bf16 1009007652, %v3221_v28 }
 0x389   :  { %v3350_v30 = vmul.bf16 1009007652, %v3222_v38  ;;  %v2658_v63 = vpop.f32.mrb[136].mxu0 }
 0x38a   :  { %v3477_v25 = vmax.bf16 %v3349_v23, %v3221_v28  ;;  %v2660_v45 = vpop.f32.mrb[137].mxu0 }
 0x38b   :  { %v3478_v22 = vmax.bf16 %v3350_v30, %v3222_v38  ;;  %v2662_v55 = vpop.f32.mrb[138].mxu0 }
 0x38c   :  { %v3653_v35 = vmax.bf16 %v3652_v17, %v3477_v25  ;;  %v3057_v53 = vpack.c.bf16 %v2662_v55, %v2658_v63  ;;  %v2664_v52 = vpop.f32.mrb[139].mxu0 }
 0x38d   :  { %v3670_v50 = vmax.bf16 %v3669_v0, %v3478_v22  ;;  %v3058_v57 = vpack.c.bf16 %v2664_v52, %v2660_v45  ;;  %v2160_v0 = vmul.bf16 1009007652, %v5614_v39 }
 0x38e   :  { %v3223_v44 = vadd.bf16 %v5586_v13, %v3057_v53  ;;  %2927 = vmatmul.mubr.bf16.gmra.mrb[244].mxu0 %v2221_v43 }
 0x38f   :  { %v3224_v3 = vadd.bf16 %v5588_v15, %v3058_v57  ;;  %2936 = vmatprep.mubr.bf16.mxu0 %v4969_v59  ;;  %v2224_v45 = vmax.bf16 %v2160_v0, %v5614_v39 }
 0x390   :  { %v3351_v32 = vmul.bf16 1009007652, %v3223_v44 }
 0x391   :  { %v3352_v26 = vmul.bf16 1009007652, %v3224_v3  ;;  %v2668_v6 = vpop.f32.mrb[140].mxu0 }
 0x392   :  { %v3479_v48 = vmax.bf16 %v3351_v32, %v3223_v44  ;;  %v2670_v31 = vpop.f32.mrb[141].mxu0  ;;  %v2161_v32 = vmul.bf16 1009007652, %v5610_v40 }
 0x393   :  { %v3480_v18 = vmax.bf16 %v3352_v26, %v3224_v3  ;;  %v2672_v62 = vpop.f32.mrb[142].mxu0 }
 0x394   :  { %v3654_v49 = vmax.bf16 %v3653_v35, %v3479_v48  ;;  %v3059_v7 = vpack.c.bf16 %v2672_v62, %v2668_v6  ;;  %v2674_v20 = vpop.f32.mrb[143].mxu0 }
 0x395   :  { %v3671_v54 = vmax.bf16 %v3670_v50, %v3480_v18  ;;  %v3060_v29 = vpack.c.bf16 %v2674_v20, %v2670_v31 }
 0x396   :  { %v3225_v42 = vadd.bf16 %v5586_v13, %v3059_v7  ;;  %2937 = vmatmul.mubr.bf16.gmra.mrb[248].mxu0 %v2222_v19 }
 0x397   :  { %v3226_v5 = vadd.bf16 %v5588_v15, %v3060_v29  ;;  %2946 = vmatprep.mubr.bf16.mxu0 %v4969_v59 }
 0x398   :  { %v3353_v10 = vmul.bf16 1009007652, %v3225_v42 }
 0x399   :  { %v3354_v8 = vmul.bf16 1009007652, %v3226_v5  ;;  %v2678_v24 = vpop.f32.mrb[144].mxu0 }
 0x39a   :  { %v3481_v58 = vmax.bf16 %v3353_v10, %v3225_v42  ;;  %v2680_v46 = vpop.f32.mrb[145].mxu0  ;;  %v2225_v42 = vmax.bf16 %v2161_v32, %v5610_v40 }
 0x39b   :  { %v3482_v60 = vmax.bf16 %v3354_v8, %v3226_v5  ;;  %v2682_v12 = vpop.f32.mrb[146].mxu0 }
 0x39c   :  { %v3655_v14 = vmax.bf16 %v3654_v49, %v3481_v58  ;;  %v3061_v9 = vpack.c.bf16 %v2682_v12, %v2678_v24  ;;  %v2684_v27 = vpop.f32.mrb[147].mxu0 }
 0x39d   :  { %v3672_v36 = vmax.bf16 %v3671_v54, %v3482_v60  ;;  %v3062_v21 = vpack.c.bf16 %v2684_v27, %v2680_v46 }
 0x39e   :  { %v3656_v1 = vunpack.i.l.bf16 %v3655_v14  ;;  %v3657_v17 = vunpack.i.h.bf16 %v3655_v14  ;;  %2947 = vmatmul.mubr.bf16.gmra.mrb[252].mxu0 %v2223_v4  ;;  %v3227_v56 = vadd.bf16 %v5586_v13, %v3061_v9  ;;  %v2162_v9 = vmul.bf16 1009007652, %v5623_v33 }
 0x39f   :  { %v3673_v34 = vunpack.i.l.bf16 %v3672_v36  ;;  %v3674_v37 = vunpack.i.h.bf16 %v3672_v36  ;;  %2956 = vmatprep.mubr.bf16.mxu0 %v4969_v59  ;;  %v3228_v63 = vadd.bf16 %v5588_v15, %v3062_v21  ;;  %v4926_v36 = vld [vmem:[%s5995_s6 + $0x58] sm:$0xff]  }
 0x3a0   :  { %v3658_v11 = vmax.f32 %v3656_v1, %v3657_v17  ;;  %v3355_v50 = vmul.bf16 1009007652, %v3227_v56  ;;  %v4927_v21 = vld [vmem:[%s5995_s6 + $0x18] sm:$0xff]   ;;  %4496 = vmatprep.subr.bf16.mxu1 %v4926_v36 }
 0x3a1   :  { %v3675_v28 = vmax.f32 %v3673_v34, %v3674_v37  ;;  %v2688_v38 = vpop.f32.mrb[148].mxu0  ;;  %v3356_v3 = vmul.bf16 1009007652, %v3228_v63  ;;  %4497 = vmatpush3.bf16.msra.mxu1 %v4927_v21 }
 0x3a2   :  { %v3659_v61 = vrot.slane %v3658_v11, 4  ;;  %v2690_v23 = vpop.f32.mrb[149].mxu0  ;;  %v3483_v62 = vmax.bf16 %v3355_v50, %v3227_v56  ;;  %v2226_v56 = vmax.bf16 %v2162_v9, %v5623_v33 }
 0x3a3   :  { %v3676_v30 = vrot.slane %v3675_v28, 4  ;;  %v2692_v25 = vpop.f32.mrb[150].mxu0  ;;  %v3484_v20 = vmax.bf16 %v3356_v3, %v3228_v63 }
 0x3a4   :  { %v3660_v22 = vmax.f32 %v3658_v11, %v3659_v61  ;;  %v3063_v55 = vpack.c.bf16 %v2692_v25, %v2688_v38  ;;  %v2694_v43 = vpop.f32.mrb[151].mxu0 }
 0x3a5   :  { %v3677_v35 = vmax.f32 %v3675_v28, %v3676_v30  ;;  %v3064_v53 = vpack.c.bf16 %v2694_v43, %v2690_v23 }
 0x3a6   :  { %v3661_v52 = vrot.slane %v3660_v22, 2  ;;  %v3229_v57 = vadd.bf16 %v5586_v13, %v3063_v55  ;;  %2957 = vmatmul.mubr.bf16.gmra.mrb[0].mxu0 %v2224_v45  ;;  %v2163_v55 = vmul.bf16 1009007652, %v5619_v16 }
 0x3a7   :  { %v3678_v44 = vrot.slane %v3677_v35, 2  ;;  %v3230_v2 = vadd.bf16 %v5588_v15, %v3064_v53  ;;  %2966 = vmatprep.mubr.bf16.mxu0 %v4969_v59 }
 0x3a8   :  { %v3662_v26 = vmax.f32 %v3660_v22, %v3661_v52  ;;  %v3357_v39 = vmul.bf16 1009007652, %v3229_v57 }
 0x3a9   :  { %v3679_v6 = vmax.f32 %v3677_v35, %v3678_v44  ;;  %v3358_v48 = vmul.bf16 1009007652, %v3230_v2  ;;  %v2698_v31 = vpop.f32.mrb[152].mxu0 }
 0x3aa   :  { %v3663_v18 = vrot.slane %v3662_v26, 1  ;;  %v3485_v19 = vmax.bf16 %v3357_v39, %v3229_v57  ;;  %v2700_v49 = vpop.f32.mrb[153].mxu0  ;;  %v2227_v57 = vmax.bf16 %v2163_v55, %v5619_v16  ;;  %v4929_v39 = vld [vmem:[%s5995_s6 + $0x20] sm:$0xff]  }
 0x3ab   :  { %v3680_v7 = vrot.slane %v3679_v6, 1  ;;  %v3486_v54 = vmax.bf16 %v3358_v48, %v3230_v2  ;;  %v2702_v29 = vpop.f32.mrb[154].mxu0 }
 0x3ac   :  { %v3664_v5 = vmax.f32 %v3662_v26, %v3663_v18  ;;  %v3683_v51 = vmax.bf16 %v3485_v19, %v3483_v62  ;;  %v3065_v10 = vpack.c.bf16 %v2702_v29, %v2698_v31  ;;  %v2704_v8 = vpop.f32.mrb[155].mxu0 }
 0x3ad   :  { %v3681_v24 = vmax.f32 %v3679_v6, %v3680_v7  ;;  %v3700_v58 = vmax.bf16 %v3486_v54, %v3484_v20  ;;  %v3066_v46 = vpack.c.bf16 %v2704_v8, %v2700_v49 }
 0x3ae   :  { %v3665_v60 = vpack.i.bf16 %v3664_v5, %v3664_v5  ;;  %v3231_v12 = vadd.bf16 %v5586_v13, %v3065_v10  ;;  %2967 = vmatmul.mubr.bf16.gmra.mrb[4].mxu0 %v2225_v42 }
 0x3af   :  { %v3682_v4 = vpack.i.bf16 %v3681_v24, %v3681_v24  ;;  %v3232_v14 = vadd.bf16 %v5588_v15, %v3066_v46  ;;  %2976 = vmatprep.mubr.bf16.mxu0 %v4969_v59 }
 0x3b0   :  { %v3874_v40 = vunpack.c.l.b16 %v3665_v60  ;;  %v3359_v27 = vmul.bf16 1009007652, %v3231_v12 }
 0x3b1   :  { %v3875_v1 = vunpack.c.l.b16 %v3682_v4  ;;  %v3360_v17 = vmul.bf16 1009007652, %v3232_v14  ;;  %v2708_v34 = vpop.f32.mrb[156].mxu0 }
 0x3b2   :  { %v3487_v37 = vmax.bf16 %v3359_v27, %v3231_v12  ;;  %v2710_v0 = vpop.f32.mrb[157].mxu0  ;;  %v5826_v11 = vsel %vm3888_vm5, %v3874_v40, %v5766_v41 }
 0x3b3   :  { %v3488_v28 = vmax.bf16 %v3360_v17, %v3232_v14  ;;  %v2712_v38 = vpop.f32.mrb[158].mxu0  ;;  %v5830_v61 = vsel %vm3888_vm5, %v3875_v1, %v5770_v47 }
 0x3b4   :  { %v3684_v23 = vmax.bf16 %v3683_v51, %v3487_v37  ;;  %v3067_v30 = vpack.c.bf16 %v2712_v38, %v2708_v34  ;;  %v2714_v63 = vpop.f32.mrb[159].mxu0 }
 0x3b5   :  { %v3701_v25 = vmax.bf16 %v3700_v58, %v3488_v28  ;;  %v3068_v45 = vpack.c.bf16 %v2714_v63, %v2710_v0 }
 0x3b6   :  { %v3233_v22 = vadd.bf16 %v5586_v13, %v3067_v30  ;;  %2977 = vmatmul.mubr.bf16.gmra.mrb[8].mxu0 %v2226_v56 }
 0x3b7   :  { %v3234_v41 = vadd.bf16 %v5588_v15, %v3068_v45  ;;  %2986 = vmatprep.mubr.bf16.mxu0 %v4969_v59  ;;  %v4928_v59 = vld [vmem:[%s5995_s6 + $0x60] sm:$0xff]  }
 0x3b8   :  { %v3361_v43 = vmul.bf16 1009007652, %v3233_v22  ;;  %4498 = vmatprep.subr.bf16.mxu1 %v4928_v59 }
 0x3b9   :  { %v3362_v35 = vmul.bf16 1009007652, %v3234_v41  ;;  %v2718_v47 = vpop.f32.mrb[160].mxu0  ;;  %4499 = vmatpush3.bf16.msra.mxu1 %v4929_v39 }
 0x3ba   :  { %v3489_v53 = vmax.bf16 %v3361_v43, %v3233_v22  ;;  %v2720_v52 = vpop.f32.mrb[161].mxu0 }
 0x3bb   :  { %v3490_v33 = vmax.bf16 %v3362_v35, %v3234_v41  ;;  %v2722_v50 = vpop.f32.mrb[162].mxu0 }
 0x3bc   :  { %v3685_v44 = vmax.bf16 %v3684_v23, %v3489_v53  ;;  %v3069_v3 = vpack.c.bf16 %v2722_v50, %v2718_v47  ;;  %v2724_v2 = vpop.f32.mrb[163].mxu0 }
 0x3bd   :  { %v3702_v32 = vmax.bf16 %v3701_v25, %v3490_v33  ;;  %v3070_v26 = vpack.c.bf16 %v2724_v2, %v2720_v52 }
 0x3be   :  { %v3235_v6 = vadd.bf16 %v5586_v13, %v3069_v3  ;;  %2987 = vmatmul.mubr.bf16.gmra.mrb[12].mxu0 %v2227_v57 }
 0x3bf   :  { %v3236_v48 = vadd.bf16 %v5588_v15, %v3070_v26 }
 0x3c0   :  { %v3363_v16 = vmul.bf16 1009007652, %v3235_v6 }
 0x3c1   :  { %v3364_v31 = vmul.bf16 1009007652, %v3236_v48  ;;  %v2728_v18 = vpop.f32.mrb[164].mxu0 }
 0x3c2   :  { %v3491_v62 = vmax.bf16 %v3363_v16, %v3235_v6  ;;  %v2730_v19 = vpop.f32.mrb[165].mxu0 }
 0x3c3   :  { %v3492_v49 = vmax.bf16 %v3364_v31, %v3236_v48  ;;  %v2732_v7 = vpop.f32.mrb[166].mxu0 }
 0x3c4   :  { %v3686_v20 = vmax.bf16 %v3685_v44, %v3491_v62  ;;  %v3071_v54 = vpack.c.bf16 %v2732_v7, %v2728_v18  ;;  %v2734_v29 = vpop.f32.mrb[167].mxu0 }
 0x3c5   :  { %v3703_v42 = vmax.bf16 %v3702_v32, %v3492_v49  ;;  %v3072_v5 = vpack.c.bf16 %v2734_v29, %v2730_v19 }
 0x3c6   :  { %v3237_v51 = vadd.bf16 %v5586_v13, %v3071_v54 }
 0x3c7   :  { %v3238_v10 = vadd.bf16 %v5588_v15, %v3072_v5 }
 0x3c8   :  { %v3365_v8 = vmul.bf16 1009007652, %v3237_v51 }
 0x3c9   :  { %v3366_v24 = vmul.bf16 1009007652, %v3238_v10  ;;  %v2738_v58 = vpop.f32.mrb[168].mxu0 }
 0x3ca   :  { %v3493_v46 = vmax.bf16 %v3365_v8, %v3237_v51  ;;  %v2740_v60 = vpop.f32.mrb[169].mxu0 }
 0x3cb   :  { %v3494_v12 = vmax.bf16 %v3366_v24, %v3238_v10  ;;  %v2742_v4 = vpop.f32.mrb[170].mxu0 }
 0x3cc   :  { %v3687_v14 = vmax.bf16 %v3686_v20, %v3493_v46  ;;  %v3073_v9 = vpack.c.bf16 %v2742_v4, %v2738_v58  ;;  %v2744_v40 = vpop.f32.mrb[171].mxu0 }
 0x3cd   :  { %v3704_v27 = vmax.bf16 %v3703_v42, %v3494_v12  ;;  %v3074_v36 = vpack.c.bf16 %v2744_v40, %v2740_v60 }
 0x3ce   :  { %v3239_v21 = vadd.bf16 %v5586_v13, %v3073_v9 }
 0x3cf   :  { %v3240_v1 = vadd.bf16 %v5588_v15, %v3074_v36 }
 0x3d0   :  { %v3367_v17 = vmul.bf16 1009007652, %v3239_v21 }
 0x3d1   :  { %v3368_v34 = vmul.bf16 1009007652, %v3240_v1  ;;  %v2748_v37 = vpop.f32.mrb[172].mxu0 }
 0x3d2   :  { %v3495_v0 = vmax.bf16 %v3367_v17, %v3239_v21  ;;  %v2750_v28 = vpop.f32.mrb[173].mxu0  ;;  %v4931_v17 = vld [vmem:[%s5995_s6 + $0x28] sm:$0xff]  }
 0x3d3   :  { %v3496_v38 = vmax.bf16 %v3368_v34, %v3240_v1  ;;  %v2752_v56 = vpop.f32.mrb[174].mxu0  ;;  %v4930_v1 = vld [vmem:[%s5995_s6 + $0x68] sm:$0xff]  }
 0x3d4   :  { %v3688_v23 = vmax.bf16 %v3687_v14, %v3495_v0  ;;  %v3075_v30 = vpack.c.bf16 %v2752_v56, %v2748_v37  ;;  %v2754_v63 = vpop.f32.mrb[175].mxu0  ;;  %4500 = vmatprep.subr.bf16.mxu1 %v4930_v1 }
 0x3d5   :  { %v3705_v25 = vmax.bf16 %v3704_v27, %v3496_v38  ;;  %v3076_v45 = vpack.c.bf16 %v2754_v63, %v2750_v28  ;;  %4501 = vmatpush3.bf16.msra.mxu1 %v4931_v17 }
 0x3d6   :  { %v3241_v22 = vadd.bf16 %v5586_v13, %v3075_v30 }
 0x3d7   :  { %v3242_v41 = vadd.bf16 %v5588_v15, %v3076_v45 }
 0x3d8   :  { %v3369_v55 = vmul.bf16 1009007652, %v3241_v22 }
 0x3d9   :  { %v3370_v43 = vmul.bf16 1009007652, %v3242_v41  ;;  %v2758_v35 = vpop.f32.mrb[176].mxu0 }
 0x3da   :  { %v3497_v47 = vmax.bf16 %v3369_v55, %v3241_v22  ;;  %v2760_v53 = vpop.f32.mrb[177].mxu0 }
 0x3db   :  { %v3498_v52 = vmax.bf16 %v3370_v43, %v3242_v41  ;;  %v2762_v33 = vpop.f32.mrb[178].mxu0 }
 0x3dc   :  { %v3689_v50 = vmax.bf16 %v3688_v23, %v3497_v47  ;;  %v3077_v57 = vpack.c.bf16 %v2762_v33, %v2758_v35  ;;  %v2764_v44 = vpop.f32.mrb[179].mxu0 }
 0x3dd   :  { %v3706_v3 = vmax.bf16 %v3705_v25, %v3498_v52  ;;  %v3078_v2 = vpack.c.bf16 %v2764_v44, %v2760_v53 }
 0x3de   :  { %v3690_v32 = vunpack.i.l.bf16 %v3689_v50  ;;  %v3691_v26 = vunpack.i.h.bf16 %v3689_v50  ;;  %v3243_v18 = vadd.bf16 %v5586_v13, %v3077_v57 }
 0x3df   :  { %v3707_v59 = vunpack.i.l.bf16 %v3706_v3  ;;  %v3708_v39 = vunpack.i.h.bf16 %v3706_v3  ;;  %v3244_v49 = vadd.bf16 %v5588_v15, %v3078_v2 }
 0x3e0   :  { %v3692_v6 = vmax.f32 %v3690_v32, %v3691_v26  ;;  %v3371_v10 = vmul.bf16 1009007652, %v3243_v18 }
 0x3e1   :  { %v3709_v48 = vmax.f32 %v3707_v59, %v3708_v39  ;;  %v2768_v16 = vpop.f32.mrb[180].mxu0  ;;  %v3372_v58 = vmul.bf16 1009007652, %v3244_v49 }
 0x3e2   :  { %v3693_v31 = vrot.slane %v3692_v6, 4  ;;  %v2770_v62 = vpop.f32.mrb[181].mxu0  ;;  %v3499_v27 = vmax.bf16 %v3371_v10, %v3243_v18  ;;  %v4933_v10 = vld [vmem:[%s5995_s6 + $0x30] sm:$0xff]  }
 0x3e3   :  { %v3710_v19 = vrot.slane %v3709_v48, 4  ;;  %v2772_v7 = vpop.f32.mrb[182].mxu0  ;;  %v3500_v37 = vmax.bf16 %v3372_v58, %v3244_v49 }
 0x3e4   :  { %v3694_v20 = vmax.f32 %v3692_v6, %v3693_v31  ;;  %v3079_v54 = vpack.c.bf16 %v2772_v7, %v2768_v16  ;;  %v2774_v29 = vpop.f32.mrb[183].mxu0 }
 0x3e5   :  { %v3711_v42 = vmax.f32 %v3709_v48, %v3710_v19  ;;  %v3080_v5 = vpack.c.bf16 %v2774_v29, %v2770_v62 }
 0x3e6   :  { %v3695_v51 = vrot.slane %v3694_v20, 2  ;;  %v3245_v8 = vadd.bf16 %v5586_v13, %v3079_v54 }
 0x3e7   :  { %v3712_v24 = vrot.slane %v3711_v42, 2  ;;  %v3246_v46 = vadd.bf16 %v5588_v15, %v3080_v5 }
 0x3e8   :  { %v3696_v60 = vmax.f32 %v3694_v20, %v3695_v51  ;;  %v3373_v12 = vmul.bf16 1009007652, %v3245_v8  ;;  %v4932_v51 = vld [vmem:[%s5995_s6 + $0x70] sm:$0xff]  }
 0x3e9   :  { %v3713_v4 = vmax.f32 %v3711_v42, %v3712_v24  ;;  %v3374_v14 = vmul.bf16 1009007652, %v3246_v46  ;;  %v2778_v9 = vpop.f32.mrb[184].mxu0  ;;  %4502 = vmatprep.subr.bf16.mxu1 %v4932_v51 }
 0x3ea   :  { %v3697_v40 = vrot.slane %v3696_v60, 1  ;;  %v3501_v36 = vmax.bf16 %v3373_v12, %v3245_v8  ;;  %v2780_v21 = vpop.f32.mrb[185].mxu0  ;;  %4503 = vmatpush3.bf16.msra.mxu1 %v4933_v10 }
 0x3eb   :  { %v3714_v34 = vrot.slane %v3713_v4, 1  ;;  %v3502_v0 = vmax.bf16 %v3374_v14, %v3246_v46  ;;  %v2782_v28 = vpop.f32.mrb[186].mxu0 }
 0x3ec   :  { %v3698_v38 = vmax.f32 %v3696_v60, %v3697_v40  ;;  %v3717_v56 = vmax.bf16 %v3501_v36, %v3499_v27  ;;  %v3081_v23 = vpack.c.bf16 %v2782_v28, %v2778_v9  ;;  %v2784_v30 = vpop.f32.mrb[187].mxu0 }
 0x3ed   :  { %v3734_v63 = vmax.bf16 %v3502_v0, %v3500_v37  ;;  %v3082_v25 = vpack.c.bf16 %v2784_v30, %v2780_v21  ;;  %v3715_v45 = vmax.f32 %v3713_v4, %v3714_v34 }
 0x3ee   :  { %v3699_v22 = vpack.i.bf16 %v3698_v38, %v3698_v38  ;;  %v3247_v41 = vadd.bf16 %v5586_v13, %v3081_v23 }
 0x3ef   :  { %v3248_v55 = vadd.bf16 %v5588_v15, %v3082_v25  ;;  %v3716_v43 = vpack.i.bf16 %v3715_v45, %v3715_v45 }
 0x3f0   :  { %v3876_v35 = vunpack.c.l.b16 %v3699_v22  ;;  %v3375_v47 = vmul.bf16 1009007652, %v3247_v41 }
 0x3f1   :  { %v3376_v53 = vmul.bf16 1009007652, %v3248_v55  ;;  %v2788_v52 = vpop.f32.mrb[188].mxu0  ;;  %v3877_v33 = vunpack.c.l.b16 %v3716_v43 }
 0x3f2   :  { %v3503_v50 = vmax.bf16 %v3375_v47, %v3247_v41  ;;  %v2790_v57 = vpop.f32.mrb[189].mxu0  ;;  %v5865_v44 = vsel %vm3890_vm6, %v3876_v35, %v5826_v11 }
 0x3f3   :  { %v3504_v3 = vmax.bf16 %v3376_v53, %v3248_v55  ;;  %v2792_v2 = vpop.f32.mrb[190].mxu0  ;;  %v5868_v32 = vsel %vm3890_vm6, %v3877_v33, %v5830_v61 }
 0x3f4   :  { %v3718_v26 = vmax.bf16 %v3717_v56, %v3503_v50  ;;  %v3083_v59 = vpack.c.bf16 %v2792_v2, %v2788_v52  ;;  %v2794_v39 = vpop.f32.mrb[191].mxu0 }
 0x3f5   :  { %v3735_v6 = vmax.bf16 %v3734_v63, %v3504_v3  ;;  %v3084_v48 = vpack.c.bf16 %v2794_v39, %v2790_v57 }
 0x3f6   :  { %v3249_v16 = vadd.bf16 %v5586_v13, %v3083_v59 }
 0x3f7   :  { %v3250_v31 = vadd.bf16 %v5588_v15, %v3084_v48 }
 0x3f8   :  { %v3377_v18 = vmul.bf16 1009007652, %v3249_v16 }
 0x3f9   :  { %v3378_v62 = vmul.bf16 1009007652, %v3250_v31  ;;  %v2798_v19 = vpop.f32.mrb[192].mxu0 }
 0x3fa   :  { %v3505_v49 = vmax.bf16 %v3377_v18, %v3249_v16  ;;  %v2800_v11 = vpop.f32.mrb[193].mxu0 }
 0x3fb   :  { %v3506_v7 = vmax.bf16 %v3378_v62, %v3250_v31  ;;  %v2802_v20 = vpop.f32.mrb[194].mxu0 }
 0x3fc   :  { %v3719_v54 = vmax.bf16 %v3718_v26, %v3505_v49  ;;  %v3085_v29 = vpack.c.bf16 %v2802_v20, %v2798_v19  ;;  %v2804_v61 = vpop.f32.mrb[195].mxu0 }
 0x3fd   :  { %v3736_v42 = vmax.bf16 %v3735_v6, %v3506_v7  ;;  %v3086_v5 = vpack.c.bf16 %v2804_v61, %v2800_v11 }
 0x3fe   :  { %v3251_v8 = vadd.bf16 %v5586_v13, %v3085_v29 }
 0x3ff   :  { %v3252_v24 = vadd.bf16 %v5588_v15, %v3086_v5 }
 0x400   :  { %v3379_v58 = vmul.bf16 1009007652, %v3251_v8 }
 0x401   :  { %v3380_v46 = vmul.bf16 1009007652, %v3252_v24  ;;  %v2808_v60 = vpop.f32.mrb[196].mxu0 }
 0x402   :  { %v3507_v12 = vmax.bf16 %v3379_v58, %v3251_v8  ;;  %v2810_v4 = vpop.f32.mrb[197].mxu0 }
 0x403   :  { %v3508_v14 = vmax.bf16 %v3380_v46, %v3252_v24  ;;  %v2812_v9 = vpop.f32.mrb[198].mxu0 }
 0x404   :  { %v3720_v40 = vmax.bf16 %v3719_v54, %v3507_v12  ;;  %v3087_v27 = vpack.c.bf16 %v2812_v9, %v2808_v60  ;;  %v2814_v36 = vpop.f32.mrb[199].mxu0 }
 0x405   :  { %v3737_v21 = vmax.bf16 %v3736_v42, %v3508_v14  ;;  %v3088_v1 = vpack.c.bf16 %v2814_v36, %v2810_v4 }
 0x406   :  { %v3253_v17 = vadd.bf16 %v5586_v13, %v3087_v27 }
 0x407   :  { %v3254_v34 = vadd.bf16 %v5588_v15, %v3088_v1 }
 0x408   :  { %v3381_v37 = vmul.bf16 1009007652, %v3253_v17 }
 0x409   :  { %v3382_v0 = vmul.bf16 1009007652, %v3254_v34  ;;  %v2818_v28 = vpop.f32.mrb[200].mxu0 }
 0x40a   :  { %v3509_v38 = vmax.bf16 %v3381_v37, %v3253_v17  ;;  %v2820_v56 = vpop.f32.mrb[201].mxu0 }
 0x40b   :  { %v3510_v23 = vmax.bf16 %v3382_v0, %v3254_v34  ;;  %v2822_v30 = vpop.f32.mrb[202].mxu0 }
 0x40c   :  { %v3721_v63 = vmax.bf16 %v3720_v40, %v3509_v38  ;;  %v3089_v25 = vpack.c.bf16 %v2822_v30, %v2818_v28  ;;  %v2824_v45 = vpop.f32.mrb[203].mxu0  ;;  %v4934_v30 = vld [vmem:[%s5995_s6 + $0x78] sm:$0xff]  }
 0x40d   :  { %v3738_v22 = vmax.bf16 %v3737_v21, %v3510_v23  ;;  %v3090_v41 = vpack.c.bf16 %v2824_v45, %v2820_v56  ;;  %4504 = vmatprep.subr.bf16.mxu1 %v4934_v30 }
 0x40e   :  { %v3255_v55 = vadd.bf16 %v5586_v13, %v3089_v25 }
 0x40f   :  { %v3256_v43 = vadd.bf16 %v5588_v15, %v3090_v41 }
 0x410   :  { %v3383_v35 = vmul.bf16 1009007652, %v3255_v55 }
 0x411   :  { %v3384_v47 = vmul.bf16 1009007652, %v3256_v43  ;;  %v2828_v53 = vpop.f32.mrb[204].mxu0 }
 0x412   :  { %v3511_v52 = vmax.bf16 %v3383_v35, %v3255_v55  ;;  %v2830_v33 = vpop.f32.mrb[205].mxu0 }
 0x413   :  { %v3512_v50 = vmax.bf16 %v3384_v47, %v3256_v43  ;;  %v2832_v57 = vpop.f32.mrb[206].mxu0 }
 0x414   :  { %v3722_v3 = vmax.bf16 %v3721_v63, %v3511_v52  ;;  %v3091_v2 = vpack.c.bf16 %v2832_v57, %v2828_v53  ;;  %v2834_v26 = vpop.f32.mrb[207].mxu0  ;;  %v4935_v63 = vld [vmem:[%s5995_s6 + $0x38] sm:$0xff]  }
 0x415   :  { %v3739_v59 = vmax.bf16 %v3738_v22, %v3512_v50  ;;  %v3092_v39 = vpack.c.bf16 %v2834_v26, %v2830_v33  ;;  %4505 = vmatpush3.bf16.msra.mxu1 %v4935_v63 }
 0x416   :  { %v3257_v6 = vadd.bf16 %v5586_v13, %v3091_v2 }
 0x417   :  { %v3258_v48 = vadd.bf16 %v5588_v15, %v3092_v39 }
 0x418   :  { %v3385_v16 = vmul.bf16 1009007652, %v3257_v6 }
 0x419   :  { %v3386_v31 = vmul.bf16 1009007652, %v3258_v48  ;;  %v2838_v18 = vpop.f32.mrb[208].mxu0 }
 0x41a   :  { %v3513_v62 = vmax.bf16 %v3385_v16, %v3257_v6  ;;  %v2840_v19 = vpop.f32.mrb[209].mxu0 }
 0x41b   :  { %v3514_v49 = vmax.bf16 %v3386_v31, %v3258_v48  ;;  %v2842_v11 = vpop.f32.mrb[210].mxu0 }
 0x41c   :  { %v3723_v7 = vmax.bf16 %v3722_v3, %v3513_v62  ;;  %v3093_v20 = vpack.c.bf16 %v2842_v11, %v2838_v18  ;;  %v2844_v54 = vpop.f32.mrb[211].mxu0 }
 0x41d   :  { %v3740_v29 = vmax.bf16 %v3739_v59, %v3514_v49  ;;  %v3094_v61 = vpack.c.bf16 %v2844_v54, %v2840_v19 }
 0x41e   :  { %v3724_v42 = vunpack.i.l.bf16 %v3723_v7  ;;  %v3725_v5 = vunpack.i.h.bf16 %v3723_v7  ;;  %v3259_v60 = vadd.bf16 %v5586_v13, %v3093_v20 }
 0x41f   :  { %v3741_v51 = vunpack.i.l.bf16 %v3740_v29  ;;  %v3742_v10 = vunpack.i.h.bf16 %v3740_v29  ;;  %v3260_v14 = vadd.bf16 %v5588_v15, %v3094_v61 }
 0x420   :  { %v3726_v8 = vmax.f32 %v3724_v42, %v3725_v5  ;;  %v3387_v34 = vmul.bf16 1009007652, %v3259_v60 }
 0x421   :  { %v3743_v24 = vmax.f32 %v3741_v51, %v3742_v10  ;;  %v2848_v58 = vpop.f32.mrb[212].mxu0  ;;  %v3388_v28 = vmul.bf16 1009007652, %v3260_v14 }
 0x422   :  { %v3727_v46 = vrot.slane %v3726_v8, 4  ;;  %v2850_v12 = vpop.f32.mrb[213].mxu0  ;;  %v3515_v55 = vmax.bf16 %v3387_v34, %v3259_v60 }
 0x423   :  { %v3744_v4 = vrot.slane %v3743_v24, 4  ;;  %v2852_v9 = vpop.f32.mrb[214].mxu0  ;;  %v3516_v47 = vmax.bf16 %v3388_v28, %v3260_v14 }
 0x424   :  { %v3728_v40 = vmax.f32 %v3726_v8, %v3727_v46  ;;  %v3095_v27 = vpack.c.bf16 %v2852_v9, %v2848_v58  ;;  %v2854_v36 = vpop.f32.mrb[215].mxu0 }
 0x425   :  { %v3745_v21 = vmax.f32 %v3743_v24, %v3744_v4  ;;  %v3096_v1 = vpack.c.bf16 %v2854_v36, %v2850_v12  ;;  %v4971_v12 = vmov 0.0  }
 0x426   :  { %v3729_v17 = vrot.slane %v3728_v40, 2  ;;  %v3261_v37 = vadd.bf16 %v5586_v13, %v3095_v27  ;;  %4795 = vmatprep.subr.bf16.mxu1 %v4971_v12 }
 0x427   :  { %v3746_v0 = vrot.slane %v3745_v21, 2  ;;  %v3262_v38 = vadd.bf16 %v5588_v15, %v3096_v1 }
 0x428   :  { %v3730_v56 = vmax.f32 %v3728_v40, %v3729_v17  ;;  %v3389_v23 = vmul.bf16 1009007652, %v3261_v37 }
 0x429   :  { %v3747_v25 = vmax.f32 %v3745_v21, %v3746_v0  ;;  %v3390_v45 = vmul.bf16 1009007652, %v3262_v38  ;;  %v2858_v22 = vpop.f32.mrb[216].mxu0 }
 0x42a   :  { %v3731_v41 = vrot.slane %v3730_v56, 1  ;;  %v3517_v43 = vmax.bf16 %v3389_v23, %v3261_v37  ;;  %v2860_v35 = vpop.f32.mrb[217].mxu0 }
 0x42b   :  { %v3518_v53 = vmax.bf16 %v3390_v45, %v3262_v38  ;;  %v2862_v52 = vpop.f32.mrb[218].mxu0  ;;  %v3748_v33 = vrot.slane %v3747_v25, 1 }
 0x42c   :  { %v3732_v50 = vmax.f32 %v3730_v56, %v3731_v41  ;;  %v3751_v57 = vmax.bf16 %v3517_v43, %v3515_v55  ;;  %v3097_v3 = vpack.c.bf16 %v2862_v52, %v2858_v22  ;;  %v2864_v2 = vpop.f32.mrb[219].mxu0 }
 0x42d   :  { %v3768_v26 = vmax.bf16 %v3518_v53, %v3516_v47  ;;  %v3098_v59 = vpack.c.bf16 %v2864_v2, %v2860_v35  ;;  %v3749_v39 = vmax.f32 %v3747_v25, %v3748_v33 }
 0x42e   :  { %v3733_v6 = vpack.i.bf16 %v3732_v50, %v3732_v50  ;;  %v3263_v48 = vadd.bf16 %v5586_v13, %v3097_v3 }
 0x42f   :  { %v3264_v16 = vadd.bf16 %v5588_v15, %v3098_v59  ;;  %v3750_v31 = vpack.i.bf16 %v3749_v39, %v3749_v39 }
 0x430   :  { %v3878_v18 = vunpack.c.l.b16 %v3733_v6  ;;  %v3391_v62 = vmul.bf16 1009007652, %v3263_v48 }
 0x431   :  { %v3392_v19 = vmul.bf16 1009007652, %v3264_v16  ;;  %v2868_v49 = vpop.f32.mrb[220].mxu0  ;;  %v3879_v11 = vunpack.c.l.b16 %v3750_v31 }
 0x432   :  { %v3519_v7 = vmax.bf16 %v3391_v62, %v3263_v48  ;;  %v2870_v20 = vpop.f32.mrb[221].mxu0  ;;  %v5899_v54 = vsel %vm3892_vm7, %v3878_v18, %v5865_v44 }
 0x433   :  { %v3520_v29 = vmax.bf16 %v3392_v19, %v3264_v16  ;;  %v2872_v61 = vpop.f32.mrb[222].mxu0  ;;  %v5902_v42 = vsel %vm3892_vm7, %v3879_v11, %v5868_v32 }
 0x434   :  { %v3752_v5 = vmax.bf16 %v3751_v57, %v3519_v7  ;;  %v3099_v51 = vpack.c.bf16 %v2872_v61, %v2868_v49  ;;  %v2874_v10 = vpop.f32.mrb[223].mxu0 }
 0x435   :  { %v3769_v8 = vmax.bf16 %v3768_v26, %v3520_v29  ;;  %v3100_v24 = vpack.c.bf16 %v2874_v10, %v2870_v20 }
 0x436   :  { %v3265_v58 = vadd.bf16 %v5586_v13, %v3099_v51 }
 0x437   :  { %v3266_v46 = vadd.bf16 %v5588_v15, %v3100_v24 }
 0x438   :  { %v3393_v60 = vmul.bf16 1009007652, %v3265_v58 }
 0x439   :  { %v3394_v44 = vmul.bf16 1009007652, %v3266_v46  ;;  %v2878_v4 = vpop.f32.mrb[224].mxu0 }
 0x43a   :  { %v3521_v14 = vmax.bf16 %v3393_v60, %v3265_v58  ;;  %v2880_v9 = vpop.f32.mrb[225].mxu0 }
 0x43b   :  { %v3522_v40 = vmax.bf16 %v3394_v44, %v3266_v46  ;;  %v2882_v32 = vpop.f32.mrb[226].mxu0 }
 0x43c   :  { %v3753_v27 = vmax.bf16 %v3752_v5, %v3521_v14  ;;  %v3101_v36 = vpack.c.bf16 %v2882_v32, %v2878_v4  ;;  %v2884_v21 = vpop.f32.mrb[227].mxu0 }
 0x43d   :  { %v3770_v1 = vmax.bf16 %v3769_v8, %v3522_v40  ;;  %v3102_v17 = vpack.c.bf16 %v2884_v21, %v2880_v9 }
 0x43e   :  { %v3267_v34 = vadd.bf16 %v5586_v13, %v3101_v36 }
 0x43f   :  { %v3268_v37 = vadd.bf16 %v5588_v15, %v3102_v17 }
 0x440   :  { %v3395_v0 = vmul.bf16 1009007652, %v3267_v34 }
 0x441   :  { %v3396_v28 = vmul.bf16 1009007652, %v3268_v37  ;;  %v2888_v38 = vpop.f32.mrb[228].mxu0 }
 0x442   :  { %v3523_v56 = vmax.bf16 %v3395_v0, %v3267_v34  ;;  %v2890_v23 = vpop.f32.mrb[229].mxu0 }
 0x443   :  { %v3524_v30 = vmax.bf16 %v3396_v28, %v3268_v37  ;;  %v2892_v63 = vpop.f32.mrb[230].mxu0 }
 0x444   :  { %v3754_v25 = vmax.bf16 %v3753_v27, %v3523_v56  ;;  %v3103_v45 = vpack.c.bf16 %v2892_v63, %v2888_v38  ;;  %v2894_v22 = vpop.f32.mrb[231].mxu0 }
 0x445   :  { %v3771_v41 = vmax.bf16 %v3770_v1, %v3524_v30  ;;  %v3104_v55 = vpack.c.bf16 %v2894_v22, %v2890_v23 }
 0x446   :  { %v3269_v43 = vadd.bf16 %v5586_v13, %v3103_v45 }
 0x447   :  { %v3270_v35 = vadd.bf16 %v5588_v15, %v3104_v55 }
 0x448   :  { %v3397_v47 = vmul.bf16 1009007652, %v3269_v43 }
 0x449   :  { %v3398_v53 = vmul.bf16 1009007652, %v3270_v35  ;;  %v2898_v52 = vpop.f32.mrb[232].mxu0 }
 0x44a   :  { %v3525_v33 = vmax.bf16 %v3397_v47, %v3269_v43  ;;  %v2900_v50 = vpop.f32.mrb[233].mxu0 }
 0x44b   :  { %v3526_v57 = vmax.bf16 %v3398_v53, %v3270_v35  ;;  %v2902_v3 = vpop.f32.mrb[234].mxu0 }
 0x44c   :  { %v3755_v2 = vmax.bf16 %v3754_v25, %v3525_v33  ;;  %v3105_v26 = vpack.c.bf16 %v2902_v3, %v2898_v52  ;;  %v2904_v59 = vpop.f32.mrb[235].mxu0 }
 0x44d   :  { %v3772_v39 = vmax.bf16 %v3771_v41, %v3526_v57  ;;  %v3106_v6 = vpack.c.bf16 %v2904_v59, %v2900_v50 }
 0x44e   :  { %v3271_v48 = vadd.bf16 %v5586_v13, %v3105_v26 }
 0x44f   :  { %v3272_v16 = vadd.bf16 %v5588_v15, %v3106_v6 }
 0x450   :  { %v3399_v31 = vmul.bf16 1009007652, %v3271_v48 }
 0x451   :  { %v3400_v18 = vmul.bf16 1009007652, %v3272_v16  ;;  %v2908_v62 = vpop.f32.mrb[236].mxu0 }
 0x452   :  { %v3527_v19 = vmax.bf16 %v3399_v31, %v3271_v48  ;;  %v2910_v49 = vpop.f32.mrb[237].mxu0 }
 0x453   :  { %v3528_v11 = vmax.bf16 %v3400_v18, %v3272_v16  ;;  %v2912_v7 = vpop.f32.mrb[238].mxu0 }
 0x454   :  { %v3756_v20 = vmax.bf16 %v3755_v2, %v3527_v19  ;;  %v3107_v29 = vpack.c.bf16 %v2912_v7, %v2908_v62  ;;  %v2914_v61 = vpop.f32.mrb[239].mxu0 }
 0x455   :  { %v3773_v5 = vmax.bf16 %v3772_v39, %v3528_v11  ;;  %v3108_v51 = vpack.c.bf16 %v2914_v61, %v2910_v49 }
 0x456   :  { %v3273_v10 = vadd.bf16 %v5586_v13, %v3107_v29 }
 0x457   :  { %v3274_v8 = vadd.bf16 %v5588_v15, %v3108_v51 }
 0x458   :  { %v3401_v24 = vmul.bf16 1009007652, %v3273_v10 }
 0x459   :  { %v3402_v58 = vmul.bf16 1009007652, %v3274_v8  ;;  %v2918_v46 = vpop.f32.mrb[240].mxu0 }
 0x45a   :  { %v3529_v60 = vmax.bf16 %v3401_v24, %v3273_v10  ;;  %v2920_v44 = vpop.f32.mrb[241].mxu0 }
 0x45b   :  { %v3530_v4 = vmax.bf16 %v3402_v58, %v3274_v8  ;;  %v2922_v14 = vpop.f32.mrb[242].mxu0 }
 0x45c   :  { %v3757_v9 = vmax.bf16 %v3756_v20, %v3529_v60  ;;  %v3109_v40 = vpack.c.bf16 %v2922_v14, %v2918_v46  ;;  %v2924_v32 = vpop.f32.mrb[243].mxu0 }
 0x45d   :  { %v3774_v27 = vmax.bf16 %v3773_v5, %v3530_v4  ;;  %v3110_v36 = vpack.c.bf16 %v2924_v32, %v2920_v44 }
 0x45e   :  { %v3758_v21 = vunpack.i.l.bf16 %v3757_v9  ;;  %v3759_v1 = vunpack.i.h.bf16 %v3757_v9  ;;  %v3275_v56 = vadd.bf16 %v5586_v13, %v3109_v40 }
 0x45f   :  { %v3775_v17 = vunpack.i.l.bf16 %v3774_v27  ;;  %v3776_v34 = vunpack.i.h.bf16 %v3774_v27  ;;  %v3276_v63 = vadd.bf16 %v5588_v15, %v3110_v36 }
 0x460   :  { %v3760_v37 = vmax.f32 %v3758_v21, %v3759_v1  ;;  %v3403_v47 = vmul.bf16 1009007652, %v3275_v56 }
 0x461   :  { %v3777_v0 = vmax.f32 %v3775_v17, %v3776_v34  ;;  %v2928_v28 = vpop.f32.mrb[244].mxu0  ;;  %v3404_v33 = vmul.bf16 1009007652, %v3276_v63 }
 0x462   :  { %v3761_v38 = vrot.slane %v3760_v37, 4  ;;  %v2930_v23 = vpop.f32.mrb[245].mxu0  ;;  %v3531_v6 = vmax.bf16 %v3403_v47, %v3275_v56 }
 0x463   :  { %v3778_v30 = vrot.slane %v3777_v0, 4  ;;  %v2932_v25 = vpop.f32.mrb[246].mxu0  ;;  %v3532_v31 = vmax.bf16 %v3404_v33, %v3276_v63 }
 0x464   :  { %v3762_v45 = vmax.f32 %v3760_v37, %v3761_v38  ;;  %v3111_v22 = vpack.c.bf16 %v2932_v25, %v2928_v28  ;;  %v2934_v41 = vpop.f32.mrb[247].mxu0 }
 0x465   :  { %v3779_v55 = vmax.f32 %v3777_v0, %v3778_v30  ;;  %v3112_v43 = vpack.c.bf16 %v2934_v41, %v2930_v23 }
 0x466   :  { %v3763_v35 = vrot.slane %v3762_v45, 2  ;;  %v3277_v53 = vadd.bf16 %v5586_v13, %v3111_v22 }
 0x467   :  { %v3780_v52 = vrot.slane %v3779_v55, 2  ;;  %v3278_v50 = vadd.bf16 %v5588_v15, %v3112_v43 }
 0x468   :  { %v3764_v57 = vmax.f32 %v3762_v45, %v3763_v35  ;;  %v3405_v3 = vmul.bf16 1009007652, %v3277_v53 }
 0x469   :  { %v3406_v2 = vmul.bf16 1009007652, %v3278_v50  ;;  %v2938_v26 = vpop.f32.mrb[248].mxu0  ;;  %v3781_v59 = vmax.f32 %v3779_v55, %v3780_v52 }
 0x46a   :  { %v3765_v39 = vrot.slane %v3764_v57, 1  ;;  %v3533_v48 = vmax.bf16 %v3405_v3, %v3277_v53  ;;  %v2940_v16 = vpop.f32.mrb[249].mxu0 }
 0x46b   :  { %v3534_v18 = vmax.bf16 %v3406_v2, %v3278_v50  ;;  %v2942_v62 = vpop.f32.mrb[250].mxu0  ;;  %v3782_v19 = vrot.slane %v3781_v59, 1 }
 0x46c   :  { %v3785_v49 = vmax.bf16 %v3533_v48, %v3531_v6  ;;  %v3113_v11 = vpack.c.bf16 %v2942_v62, %v2938_v26  ;;  %v2944_v7 = vpop.f32.mrb[251].mxu0  ;;  %v3766_v20 = vmax.f32 %v3764_v57, %v3765_v39 }
 0x46d   :  { %v3802_v29 = vmax.bf16 %v3534_v18, %v3532_v31  ;;  %v3114_v61 = vpack.c.bf16 %v2944_v7, %v2940_v16  ;;  %v3783_v5 = vmax.f32 %v3781_v59, %v3782_v19 }
 0x46e   :  { %v3279_v51 = vadd.bf16 %v5586_v13, %v3113_v11  ;;  %v3767_v10 = vpack.i.bf16 %v3766_v20, %v3766_v20 }
 0x46f   :  { %v3280_v8 = vadd.bf16 %v5588_v15, %v3114_v61  ;;  %v3784_v24 = vpack.i.bf16 %v3783_v5, %v3783_v5 }
 0x470   :  { %v3407_v58 = vmul.bf16 1009007652, %v3279_v51  ;;  %v3880_v46 = vunpack.c.l.b16 %v3767_v10 }
 0x471   :  { %v3408_v60 = vmul.bf16 1009007652, %v3280_v8  ;;  %v2948_v44 = vpop.f32.mrb[252].mxu0  ;;  %v3881_v4 = vunpack.c.l.b16 %v3784_v24 }
 0x472   :  { %v3535_v14 = vmax.bf16 %v3407_v58, %v3279_v51  ;;  %v2950_v9 = vpop.f32.mrb[253].mxu0  ;;  %v5922_v40 = vsel %vm3894_vm8, %v3880_v46, %v5899_v54 }
 0x473   :  { %v3536_v32 = vmax.bf16 %v3408_v60, %v3280_v8  ;;  %v2952_v27 = vpop.f32.mrb[254].mxu0  ;;  %v5925_v36 = vsel %vm3894_vm8, %v3881_v4, %v5902_v42 }
 0x474   :  { %v3786_v21 = vmax.bf16 %v3785_v49, %v3535_v14  ;;  %v3115_v1 = vpack.c.bf16 %v2952_v27, %v2948_v44  ;;  %v2954_v17 = vpop.f32.mrb[255].mxu0 }
 0x475   :  { %v3803_v34 = vmax.bf16 %v3802_v29, %v3536_v32  ;;  %v3116_v37 = vpack.c.bf16 %v2954_v17, %v2950_v9 }
 0x476   :  { %v3281_v0 = vadd.bf16 %v5586_v13, %v3115_v1 }
 0x477   :  { %v3282_v28 = vadd.bf16 %v5588_v15, %v3116_v37 }
 0x478   :  { %v3409_v38 = vmul.bf16 1009007652, %v3281_v0 }
 0x479   :  { %v3410_v56 = vmul.bf16 1009007652, %v3282_v28  ;;  %v2958_v23 = vpop.f32.mrb[0].mxu0 }
 0x47a   :  { %v3537_v30 = vmax.bf16 %v3409_v38, %v3281_v0  ;;  %v2960_v54 = vpop.f32.mrb[1].mxu0 }
 0x47b   :  { %v3538_v63 = vmax.bf16 %v3410_v56, %v3282_v28  ;;  %v2962_v25 = vpop.f32.mrb[2].mxu0 }
 0x47c   :  { %v3787_v45 = vmax.bf16 %v3786_v21, %v3537_v30  ;;  %v3117_v22 = vpack.c.bf16 %v2962_v25, %v2958_v23  ;;  %v2964_v42 = vpop.f32.mrb[3].mxu0 }
 0x47d   :  { %v3804_v41 = vmax.bf16 %v3803_v34, %v3538_v63  ;;  %v3118_v55 = vpack.c.bf16 %v2964_v42, %v2960_v54 }
 0x47e   :  { %v3283_v43 = vadd.bf16 %v5586_v13, %v3117_v22 }
 0x47f   :  { %v3284_v35 = vadd.bf16 %v5588_v15, %v3118_v55 }
 0x480   :  { %v3411_v47 = vmul.bf16 1009007652, %v3283_v43 }
 0x481   :  { %v3412_v53 = vmul.bf16 1009007652, %v3284_v35  ;;  %v2968_v52 = vpop.f32.mrb[4].mxu0 }
 0x482   :  { %v3539_v33 = vmax.bf16 %v3411_v47, %v3283_v43  ;;  %v2970_v50 = vpop.f32.mrb[5].mxu0 }
 0x483   :  { %v3540_v57 = vmax.bf16 %v3412_v53, %v3284_v35  ;;  %v2972_v3 = vpop.f32.mrb[6].mxu0 }
 0x484   :  { %v3788_v2 = vmax.bf16 %v3787_v45, %v3539_v33  ;;  %v3119_v26 = vpack.c.bf16 %v2972_v3, %v2968_v52  ;;  %v2974_v59 = vpop.f32.mrb[7].mxu0 }
 0x485   :  { %v3805_v39 = vmax.bf16 %v3804_v41, %v3540_v57  ;;  %v3120_v6 = vpack.c.bf16 %v2974_v59, %v2970_v50 }
 0x486   :  { %v3285_v48 = vadd.bf16 %v5586_v13, %v3119_v26 }
 0x487   :  { %v3286_v16 = vadd.bf16 %v5588_v15, %v3120_v6 }
 0x488   :  { %v3413_v31 = vmul.bf16 1009007652, %v3285_v48 }
 0x489   :  { %v3414_v18 = vmul.bf16 1009007652, %v3286_v16  ;;  %v2978_v62 = vpop.f32.mrb[8].mxu0 }
 0x48a   :  { %v3541_v19 = vmax.bf16 %v3413_v31, %v3285_v48  ;;  %v2980_v49 = vpop.f32.mrb[9].mxu0  ;;  %v4936_v48 = vld [vmem:[%s5996_s7] sm:$0xff]   ;;  %v4937_v31 = vld [vmem:[%s5996_s7 + $0x8] sm:$0xff]  }
 0x48b   :  { %v3542_v11 = vmax.bf16 %v3414_v18, %v3286_v16  ;;  %v2982_v7 = vpop.f32.mrb[10].mxu0  ;;  %v4940_v18 = vld [vmem:[%s5996_s7 + $0x20] sm:$0xff]  }
 0x48c   :  { %v3789_v20 = vmax.bf16 %v3788_v2, %v3541_v19  ;;  %v3121_v29 = vpack.c.bf16 %v2982_v7, %v2978_v62  ;;  %v2984_v61 = vpop.f32.mrb[11].mxu0  ;;  %v4941_v62 = vld [vmem:[%s5996_s7 + $0x28] sm:$0xff]   ;;  %v4942_v19 = vld [vmem:[%s5996_s7 + $0x30] sm:$0xff]   ;;  %v3851_v7 = vld [vmem:[%s5990_s1] sm:$0xff]  ;;  %s4944_s1 = scalar_lea.vmem %s4167_s25, 128 }
 0x48d   :  { %v3806_v5 = vmax.bf16 %v3805_v39, %v3542_v11  ;;  %v3122_v51 = vpack.c.bf16 %v2984_v61, %v2980_v49  ;;  %v4943_v49 = vld [vmem:[%s5996_s7 + $0x38] sm:$0xff]   ;;  %p4945_p0 = scmp.ne.s32.totalorder %s4167_s25, %s4944_s1  ;;  %p4950_p2 = scmp.lt.s32.totalorder %s4944_s1, %s4944_s1 }
 0x48e   :  { %v3287_v10 = vadd.bf16 %v5586_v13, %v3121_v29 }
 0x48f   :  { %v3288_v8 = vadd.bf16 %v5588_v15, %v3122_v51  ;;  %p4951_p3 = por %p4950_p2, %p4949_p1 }
 0x490   :  { %v3415_v24 = vmul.bf16 1009007652, %v3287_v10 }
 0x491   :  { %v3416_v58 = vmul.bf16 1009007652, %v3288_v8  ;;  %v2988_v46 = vpop.f32.mrb[12].mxu0  ;;  %p4952_p4 = pnand %p4951_p3, %p4945_p0 }
 0x492   :  { %v3543_v60 = vmax.bf16 %v3415_v24, %v3287_v10  ;;  %v2990_v44 = vpop.f32.mrb[13].mxu0 }
 0x493   :  { %v3544_v4 = vmax.bf16 %v3416_v58, %v3288_v8  ;;  %v2992_v14 = vpop.f32.mrb[14].mxu0  ;;  %v4344_v58 = vld [vmem:[%s5997_s8] ss:$0 sm:$0xff] }
 0x494   :  { %v3790_v9 = vmax.bf16 %v3789_v20, %v3543_v60  ;;  %v3123_v32 = vpack.c.bf16 %v2992_v14, %v2988_v46  ;;  %v2994_v27 = vpop.f32.mrb[15].mxu0 }
 0x495   :  { %v3807_v21 = vmax.bf16 %v3806_v5, %v3544_v4  ;;  %v3124_v1 = vpack.c.bf16 %v2994_v27, %v2990_v44 }
 0x496   :  { %v3289_v17 = vadd.bf16 %v5586_v13, %v3123_v32 }
 0x497   :  { %v3290_v34 = vadd.bf16 %v5588_v15, %v3124_v1 }
 0x498   :  { %v3417_v37 = vmul.bf16 1009007652, %v3289_v17 }
 0x499   :  { %v3418_v0 = vmul.bf16 1009007652, %v3290_v34 }
 0x49a   :  { %v3545_v28 = vmax.bf16 %v3417_v37, %v3289_v17 }
 0x49b   :  { %v3546_v38 = vmax.bf16 %v3418_v0, %v3290_v34 }
 0x49c   :  { %v3791_v56 = vmax.bf16 %v3790_v9, %v3545_v28 }
 0x49d   :  { %v3808_v23 = vmax.bf16 %v3807_v21, %v3546_v38 }
 0x49e   :  { %v3792_v30 = vunpack.i.l.bf16 %v3791_v56  ;;  %v3793_v54 = vunpack.i.h.bf16 %v3791_v56 }
 0x49f   :  { %v3809_v63 = vunpack.i.l.bf16 %v3808_v23  ;;  %v3810_v25 = vunpack.i.h.bf16 %v3808_v23 }
 0x4a0   :  { %v3794_v45 = vmax.f32 %v3792_v30, %v3793_v54 }
 0x4a1   :  { %v3811_v22 = vmax.f32 %v3809_v63, %v3810_v25 }
 0x4a2   :  { %v3795_v42 = vrot.slane %v3794_v45, 4 }
 0x4a3   :  { %v3812_v41 = vrot.slane %v3811_v22, 4 }
 0x4a4   :  { %v3796_v55 = vmax.f32 %v3794_v45, %v3795_v42 }
 0x4a5   :  { %v3813_v43 = vmax.f32 %v3811_v22, %v3812_v41 }
 0x4a6   :  { %v3797_v35 = vrot.slane %v3796_v55, 2 }
 0x4a7   :  { %v3814_v13 = vrot.slane %v3813_v43, 2 }
 0x4a8   :  { %v3798_v47 = vmax.f32 %v3796_v55, %v3797_v35 }
 0x4a9   :  { %v3815_v15 = vmax.f32 %v3813_v43, %v3814_v13 }
 0x4aa   :  { %v3799_v53 = vrot.slane %v3798_v47, 1 }
 0x4ab   :  { %v3816_v52 = vrot.slane %v3815_v15, 1 }
 0x4ac   :  { %v3800_v33 = vmax.f32 %v3798_v47, %v3799_v53 }
 0x4ad   :  { %v3817_v50 = vmax.f32 %v3815_v15, %v3816_v52 }
 0x4ae   :  { %v3801_v57 = vpack.i.bf16 %v3800_v33, %v3800_v33 }
 0x4af   :  { %v3818_v3 = vpack.i.bf16 %v3817_v50, %v3817_v50 }
 0x4b0   :  { %v3882_v2 = vunpack.c.l.b16 %v3801_v57 }
 0x4b1   :  { %v3883_v26 = vunpack.c.l.b16 %v3818_v3 }
 0x4b2   :  { %v3897_v59 = vsel %vm3896_vm9, %v3882_v2, %v5922_v40  ;;  %v4938_v40 = vld [vmem:[%s5996_s7 + $0x10] sm:$0xff]  }
 0x4b3   :  { %v3904_v39 = vsel %vm3896_vm9, %v3883_v26, %v5925_v36  ;;  %v3905_v16 = vpack.c.b16 %v3897_v59, %v3897_v59  ;;  %v4939_v36 = vld [vmem:[%s5996_s7 + $0x18] sm:$0xff]  }
 0x4b4   :  { %v3906_v6 = vpack.c.b16 %v3904_v39, %v3904_v39 }
 0x4b6   :  { %4037 = vmatprep.mubr.bf16.mxu1 %v3906_v6 }
 0x4b7   :  { %4038 = vmatmul.mubr.bf16.vlgmr.msra.gmra.mrb[240].mxu1 %v3905_v16 }
 0x4b8   :  { %4796 = vmatpush3.bf16.msra.mxu1 %v4936_v48  ;;  %4811 = vmatprep.mubr.msk.bf16.mxu1 %vm4972_vm10, %v4971_v12 }
 0x4b9   :  { %4797 = vmatprep.subr.bf16.mxu1 %v4971_v12 }
 0x4bc   :  { %4798 = vmatpush3.bf16.msra.mxu1 %v4937_v31 }
 0x4bd   :  { %4799 = vmatprep.subr.bf16.mxu1 %v4971_v12 }
 0x4c0   :  { %4800 = vmatpush3.bf16.msra.mxu1 %v4938_v40 }
 0x4c1   :  { %4801 = vmatprep.subr.bf16.mxu1 %v4971_v12 }
 0x4c4   :  { %4802 = vmatpush3.bf16.msra.mxu1 %v4939_v36 }
 0x4c5   :  { %4803 = vmatprep.subr.bf16.mxu1 %v4971_v12 }
 0x4c8   :  { %4804 = vmatpush3.bf16.msra.mxu1 %v4940_v18 }
 0x4c9   :  { %4805 = vmatprep.subr.bf16.mxu1 %v4971_v12 }
 0x4cc   :  { %4806 = vmatpush3.bf16.msra.mxu1 %v4941_v62 }
 0x4cd   :  { %4807 = vmatprep.subr.bf16.mxu1 %v4971_v12 }
 0x4d0   :  { %4808 = vmatpush3.bf16.msra.mxu1 %v4942_v19 }
 0x4d1   :  { %4809 = vmatprep.subr.bf16.mxu1 %v4971_v12 }
 0x4d4   :  { %4810 = vmatpush3.bf16.msra.mxu1 %v4943_v49 }
 0x58a   :  { %v4506_v11 = vpop.f32.mrb[240].mxu1 }
 0x58b   :  { %v4507_v20 = vpop.f32.mrb[241].mxu1 }
 0x58c   :  { %v4508_v29 = vadd.f32 %v4507_v20, %v4506_v11  ;;  %v4509_v61 = vpop.f32.mrb[242].mxu1 }
 0x58d   :  { %v4510_v5 = vpop.f32.mrb[243].mxu1 }
 0x58e   :  { %v4040_v51 = vadd.f32 %v4508_v29, %v3851_v7 }
 0x590   :  { %v4045_v10 = vmul.f32 0.01, %v4040_v51 }
 0x592   :  { %v4046_v8 = vmax.f32 %v4040_v51, %v4045_v10 }
 0x594   :  { %v4047_v24 = vpack.c.bf16 %v4046_v8, %v4046_v8 }
 0x596   :  { %4812 = vmatmul.mubr.bf16.vlgmr.msra.gmra.mrb[244].mxu1 %v4047_v24 }
 0x669   :  { %v4153_v12 = vpop.f32.mrb[244].mxu1 }
 0x66a   :  { %v4154_v46 = vadd.f32 %v4344_v58, %v4153_v12  ;;  %v4813_v60 = vpop.f32.mrb[245].mxu1 }
 0x66b   :  { %v4156_v44 = vpop.f32.mrb[246].mxu1 }
 0x66c   :  { %4159 = vst [vmem:[#allocation2] sm:$0xff] %v4154_v46  ;;  %v4814_v4 = vpop.f32.mrb[247].mxu1 }
 0x66d   :  { %4955 = shalt.err (!%p4952_p4)
}
 0x66e   :  { %s4956_s8 = scalar_lea.hbm %s5998_s9, 128 }
 0x66f   :  { %p4957_p5 = scmp.ne.s32.totalorder %s5998_s9, %s4956_s8  ;;  %p4960_p6 = scmp.lt.u32.totalorder %s4956_s8, %s5998_s9 }
 0x671   :  { %p4962_p7 = pnand %p4960_p6, %p4957_p5 }
 0x673   :  { %4965 = shalt.err (!%p4962_p7)
}
 0x674   :  { %4169 = dma.vmem_to_hbm [thread:$0]  %s4167_s25, 128, %s5998_s9, [#allocation3]  }
 0x675   :  { %4966 = dma.done.wait [#allocation3], 128  }
 0x676   :  { %4967 = vsyncadd [#allocation3], 4294967168 }
 0x677   :  { %4173 = vsyncpa [#allocation3], 1 }

</bundles_post_ra>
